<compile_context>
chip_gen: v7x
topology: tpu7x:2x2x1
jax: 0.10.0
libtpu: 0.0.40
codegen_flags: <defaults>
</compile_context>

<pallas_src>
import math

import numpy as np
import jax
import jax.numpy as jnp
from jax.experimental import pallas as pl
from jax.experimental.pallas import tpu as pltpu


# ----------------------------------------------------------------------------
# Host-side exact statevector gate algebra (PennyLane default.qubit convention:
# wire 0 is the most-significant bit of the computational-basis index).
# ----------------------------------------------------------------------------
I2 = np.eye(2, dtype=complex)
X2 = np.array([[0.0, 1.0], [1.0, 0.0]], dtype=complex)
Z2 = np.array([[1.0, 0.0], [0.0, -1.0]], dtype=complex)


def RX(t):
    c, s = np.cos(t / 2.0), np.sin(t / 2.0)
    return np.array([[c, -1j * s], [-1j * s, c]], dtype=complex)


def RZ(t):
    return np.array([[np.exp(-1j * t / 2.0), 0.0], [0.0, np.exp(1j * t / 2.0)]],
                    dtype=complex)


def single_gate(n, wire, g):
    U = np.array([[1.0 + 0j]])
    for w in range(n):
        U = np.kron(U, g if w == wire else I2)
    return U


def controlled_gate(n, control, target, g):
    dim = 1 << n
    U = np.zeros((dim, dim), dtype=complex)
    mc = 1 << (n - 1 - control)
    mt = 1 << (n - 1 - target)
    for j in range(dim):
        if (j & mc) == 0:
            U[j, j] = 1.0
        else:
            bt = 1 if (j & mt) else 0
            U[j & ~mt, j] += g[0, bt]
            U[j | mt, j] += g[1, bt]
    return U


def init_qkv_gates(n, offset, rot, crx):
    """Gate list (application order) of initQKV_on_wires on an n-qubit register."""
    gs = []

    def zxz(idx, w):
        gs.append(single_gate(n, w, RZ(rot[idx])))
        gs.append(single_gate(n, w, RX(rot[idx + 1])))
        gs.append(single_gate(n, w, RZ(rot[idx + 2])))

    zxz(0, offset + 0)
    zxz(3, offset + 1)
    zxz(6, offset + 2)
    zxz(9, offset + 3)
    gs.append(controlled_gate(n, offset + 0, offset + 1, RX(crx[0])))
    gs.append(controlled_gate(n, offset + 1, offset + 2, RX(crx[1])))
    gs.append(controlled_gate(n, offset + 2, offset + 3, RX(crx[2])))
    gs.append(controlled_gate(n, offset + 3, offset + 0, RX(crx[3])))
    gs.append(controlled_gate(n, offset + 0, offset + 3, X2))
    gs.append(controlled_gate(n, offset + 3, offset + 2, X2))
    gs.append(controlled_gate(n, offset + 2, offset + 1, X2))
    gs.append(controlled_gate(n, offset + 1, offset + 0, X2))
    return gs


def cross_gates(cross_rot, cross_crx):
    """Gate list (application order) of the cross block of qmha_score (8 qubits)."""
    n = 8
    gs = []
    crx_pairs = [(0, 4), (1, 5), (2, 6), (3, 7), (4, 0), (5, 1), (6, 2), (7, 3)]
    for i, (c, t) in enumerate(crx_pairs):
        gs.append(controlled_gate(n, c, t, RX(cross_crx[i])))
    cnot_pairs = [(0, 4), (4, 0), (1, 5), (5, 1), (2, 6), (6, 2), (3, 7), (7, 3)]
    for c, t in cnot_pairs:
        gs.append(controlled_gate(n, c, t, X2))

    def zxz(idx, w):
        gs.append(single_gate(n, w, RZ(cross_rot[idx])))
        gs.append(single_gate(n, w, RX(cross_rot[idx + 1])))
        gs.append(single_gate(n, w, RZ(cross_rot[idx + 2])))

    zxz(0, 0)
    zxz(3, 1)
    zxz(6, 2)
    zxz(9, 3)
    return gs


def gates_to_unitary(n, gates):
    U = np.eye(1 << n, dtype=complex)
    for g in gates:
        U = g @ U
    return U


def pauli_z_op(n, wire):
    return single_gate(n, wire, Z2)


def pauli_x_op(n, wire):
    return single_gate(n, wire, X2)


# ----------------------------------------------------------------------------
# Pallas kernel: one batch tile of TB samples per grid step, lane-dense layout.
# ----------------------------------------------------------------------------
def quantum_attention_kernel(x1t_ref, x2t_ref, w_ref, b_ref, f4_ref,
                             uq_ref, uv_ref, gs_ref, gv_ref, out_ref):
    f32 = jnp.float32
    TB = x1t_ref.shape[1]

    # pre_net for both inputs in one (4,96)@(96,2*TB) matmul.
    xcat = jnp.concatenate([x1t_ref[...], x2t_ref[...]], axis=1)          # (96, 2TB)
    A = jnp.dot(w_ref[...], xcat, preferred_element_type=f32) + b_ref[...]
    aq = [A[w:w + 1, :TB] for w in range(4)]          # RX angles from x1   (1, TB)
    ak = [A[w:w + 1, TB:2 * TB] for w in range(4)]    # RX angles from x2   (1, TB)

    def rx_layer(t, ang_rows):
        # RX(theta_w) on wire w:  t <- cos(th/2)*t + sin(th/2)*(F_w @ t),
        # with F_w = [[0, X_w], [-X_w, 0]] acting on the stacked [re; im] state.
        for w in range(4):
            a = ang_rows[w]
            c = jnp.cos(0.5 * a)
            s = jnp.sin(0.5 * a)
            ft = jnp.dot(f4_ref[w], t, preferred_element_type=f32)        # (32, TB)
            t = c * t + s * ft
        return t

    def expvals(t, g_ref):
        # 8 quadratic forms t^T G_k t via one stacked (256,32)@(32,TB) matmul
        # followed by cheap sublane reductions.
        R = jnp.dot(g_ref[...], t, preferred_element_type=f32)            # (256, TB)
        return [jnp.sum(t * R[32 * k:32 * (k + 1), :], axis=0, keepdims=True)
                for k in range(8)]                                        # 8 x (1, TB)

    # |0000> stacked state: row 0 (real amplitude of basis state 0) is 1.
    row = jax.lax.broadcasted_iota(jnp.int32, (32, TB), 0)
    t0 = jnp.where(row == 0, f32(1.0), f32(0.0))

    # ---- qmha_score, reduced to the 16-dim Q register ------------------------
    t = rx_layer(t0, aq)                                                  # AngleEmbedding(x1)
    t = jnp.dot(uq_ref[...], t, preferred_element_type=f32)               # initQKV (Q)
    t = rx_layer(t, ak)                                                   # AngleEmbedding(x2)
    e = expvals(t, gs_ref)                                                # [Z1..Z4, X1..X4]

    ang = []
    for w in range(4):
        mag = jnp.sqrt(e[w] * e[w] + e[w + 4] * e[w + 4])
        ang.append(jnp.tanh(mag) * f32(math.pi))

    # ---- qmha_value ----------------------------------------------------------
    v = rx_layer(t0, ak)                                                  # AngleEmbedding(x2)
    v = jnp.dot(uv_ref[...], v, preferred_element_type=f32)               # initQKV (V)
    v = rx_layer(v, ang)                                                  # score-driven RX

    # CNOT ring folded into gv; single lane-dense store of all 8 expectations.
    out_ref[...] = jnp.concatenate(expvals(v, gv_ref), axis=0)            # (8, TB)


# ----------------------------------------------------------------------------
# Wrapper: fold weight-only circuit pieces into constants, call pallas_call.
# ----------------------------------------------------------------------------
def make_quantum_attention(params):
    W = np.asarray(params["W"], dtype=np.float64)     # (4, 96)
    b = np.asarray(params["b"], dtype=np.float64)     # (4,)

    U_q = gates_to_unitary(4, init_qkv_gates(4, 0, params["q_rot"], params["q_crx"]))
    U_k = gates_to_unitary(4, init_qkv_gates(4, 0, params["k_rot"], params["k_crx"]))
    U_v = gates_to_unitary(4, init_qkv_gates(4, 0, params["v_rot"], params["v_crx"]))
    chi = U_k[:, 0]                                              # U_k |0000>  (wires 4-7)
    U_post = gates_to_unitary(8, cross_gates(params["cross_rot"], params["cross_crx"]))
    M = U_post @ np.kron(np.eye(16), chi.reshape(16, 1))         # (256, 16)

    def quad_block(H):
        # Hermitian H -> 32x32 real symmetric G with  Re(s^H H s) = [sr;si]^T G [sr;si].
        Hr, Hi = H.real, H.imag
        assert np.allclose(Hr, Hr.T, atol=1e-10)
        assert np.allclose(Hi, -Hi.T, atol=1e-10)
        return np.block([[Hr, -Hi], [Hi, Hr]])

    def op_block(U):
        Ur, Ui = U.real, U.imag
        return np.block([[Ur, -Ui], [Ui, Ur]])                   # (32, 32)

    # Score observables (Z then X on wires 1..4) folded through M.
    obs8 = ([pauli_z_op(8, w) for w in (1, 2, 3, 4)]
            + [pauli_x_op(8, w) for w in (1, 2, 3, 4)])
    GS = np.concatenate([quad_block(M.conj().T @ A @ M) for A in obs8], axis=0)

    # Value observables with the trailing CNOT ring folded in.
    U_ring = gates_to_unitary(4, [controlled_gate(4, 0, 1, X2),
                                  controlled_gate(4, 1, 2, X2),
                                  controlled_gate(4, 2, 3, X2),
                                  controlled_gate(4, 3, 0, X2)])
    obs4 = [pauli_z_op(4, w) for w in range(4)] + [pauli_x_op(4, w) for w in range(4)]
    GV = np.concatenate([quad_block(U_ring.conj().T @ A @ U_ring) for A in obs4], axis=0)

    # Stacked (-i X_w) generators for the data-dependent RX layers.
    Z16 = np.zeros((16, 16))
    F4 = np.stack([np.block([[Z16, single_gate(4, w, X2).real],
                             [-single_gate(4, w, X2).real, Z16]]) for w in range(4)])

    f32 = jnp.float32
    consts = (
        jnp.asarray(W, f32),                  # (4, 96)
        jnp.asarray(b.reshape(4, 1), f32),    # (4, 1)
        jnp.asarray(F4, f32),                 # (4, 32, 32)
        jnp.asarray(op_block(U_q), f32),      # (32, 32)
        jnp.asarray(op_block(U_v), f32),      # (32, 32)
        jnp.asarray(GS, f32),                 # (256, 32)
        jnp.asarray(GV, f32),                 # (256, 32)
    )
    const_shapes = [tuple(c.shape) for c in consts]

    def forward(x1, x2):
        Bsz = x1.shape[0]
        B_pad = ((Bsz + 127) // 128) * 128
        TB = 512 if B_pad % 512 == 0 else (256 if B_pad % 256 == 0 else 128)
        pad = ((0, B_pad - Bsz), (0, 0))
        x1t = jnp.pad(jnp.asarray(x1, f32), pad).T               # (96, B_pad)
        x2t = jnp.pad(jnp.asarray(x2, f32), pad).T               # (96, B_pad)

        def const_spec(shape):
            zeros = (0,) * len(shape)
            return pl.BlockSpec(shape, lambda i, z=zeros: z)     # resident in VMEM

        batch_spec = pl.BlockSpec((96, TB), lambda i: (0, i))
        out = pl.pallas_call(
            quantum_attention_kernel,
            out_shape=jax.ShapeDtypeStruct((8, B_pad), f32),
            grid=(B_pad // TB,),
            in_specs=[batch_spec, batch_spec] + [const_spec(s) for s in const_shapes],
            out_specs=pl.BlockSpec((8, TB), lambda i: (0, i)),
            compiler_params=pltpu.CompilerParams(
                dimension_semantics=("parallel",)),
        )(x1t, x2t, *consts)
        return out.T[:Bsz]                                       # (B, 8)

    return jax.jit(forward)


# ----------------------------------------------------------------------------
# Pure-NumPy reference: gate-by-gate statevector simulation of the PyTorch module.
# ----------------------------------------------------------------------------
def reference_forward(x1, x2, params):
    W, b = params["W"], params["b"]
    a1 = x1 @ W.T + b
    a2 = x2 @ W.T + b
    B = x1.shape[0]
    out = np.zeros((B, 8))
    for i in range(B):
        # qmha_score
        psi = np.zeros(256, dtype=complex)
        psi[0] = 1.0
        gates = [single_gate(8, w, RX(a1[i, w])) for w in range(4)]
        gates += init_qkv_gates(8, 0, params["q_rot"], params["q_crx"])
        gates += [single_gate(8, w, RX(a2[i, w])) for w in range(4)]
        gates += init_qkv_gates(8, 4, params["k_rot"], params["k_crx"])
        gates += cross_gates(params["cross_rot"], params["cross_crx"])
        for g in gates:
            psi = g @ psi
        z = np.array([np.real(np.vdot(psi, pauli_z_op(8, w) @ psi)) for w in (1, 2, 3, 4)])
        x = np.array([np.real(np.vdot(psi, pauli_x_op(8, w) @ psi)) for w in (1, 2, 3, 4)])
        score = np.sqrt(z ** 2 + x ** 2)
        # qmha_value
        phi = np.zeros(16, dtype=complex)
        phi[0] = 1.0
        gates = [single_gate(4, w, RX(a2[i, w])) for w in range(4)]
        gates += init_qkv_gates(4, 0, params["v_rot"], params["v_crx"])
        gates += [single_gate(4, w, RX(np.tanh(score[w]) * np.pi)) for w in range(4)]
        gates += [controlled_gate(4, 0, 1, X2), controlled_gate(4, 1, 2, X2),
                  controlled_gate(4, 2, 3, X2), controlled_gate(4, 3, 0, X2)]
        for g in gates:
            phi = g @ phi
        vz = [np.real(np.vdot(phi, pauli_z_op(4, w) @ phi)) for w in range(4)]
        vx = [np.real(np.vdot(phi, pauli_x_op(4, w) @ phi)) for w in range(4)]
        out[i] = np.array(vz + vx)
    return out


if __name__ == "__main__":
    Bsz, in_embed, embed_dim = 2, 96, 4

    # Deterministic synthetic parameters (shapes from QuantumAttention.__init__).
    rng = np.random.default_rng(0)
    bound = 1.0 / np.sqrt(in_embed)
    params = {
        "W": rng.uniform(-bound, bound, size=(embed_dim, in_embed)),
        "b": rng.uniform(-bound, bound, size=(embed_dim,)),
        "q_rot": rng.uniform(-np.pi / 2, np.pi / 2, size=24),
        "k_rot": rng.uniform(-np.pi / 2, np.pi / 2, size=24),
        "v_rot": rng.uniform(-np.pi / 2, np.pi / 2, size=24),
        "cross_rot": rng.uniform(-np.pi / 2, np.pi / 2, size=12),
        "q_crx": rng.normal(size=8) * 0.1,
        "k_crx": rng.normal(size=8) * 0.1,
        "v_crx": rng.normal(size=8) * 0.1,
        "cross_crx": rng.normal(size=8) * 0.1,
    }

    key = jax.random.PRNGKey(0)
    k1, k2 = jax.random.split(key)
    x1 = jax.random.normal(k1, (Bsz, in_embed), dtype=jnp.float32)
    x2 = jax.random.normal(k2, (Bsz, in_embed), dtype=jnp.float32)

    forward = make_quantum_attention(params)
    out = jax.block_until_ready(forward(x1, x2))

    ref = reference_forward(np.asarray(x1, np.float64), np.asarray(x2, np.float64), params)
    np.testing.assert_allclose(np.asarray(out), ref, rtol=0.0, atol=2e-3)

    print("KERNEL_OK")
</pallas_src>

<mosaic_0001>
module attributes {stable_mosaic.version = 11 : i64} {
  func.func @quantum_attention_kernel(%arg0: i32, %arg1: memref<96x128xf32, #tpu.memory_space<vmem>>, %arg2: memref<96x128xf32, #tpu.memory_space<vmem>>, %arg3: memref<4x96xf32, #tpu.memory_space<vmem>>, %arg4: memref<4x1xf32, #tpu.memory_space<vmem>>, %arg5: memref<4x32x32xf32, #tpu.memory_space<vmem>>, %arg6: memref<32x32xf32, #tpu.memory_space<vmem>>, %arg7: memref<32x32xf32, #tpu.memory_space<vmem>>, %arg8: memref<256x32xf32, #tpu.memory_space<vmem>>, %arg9: memref<256x32xf32, #tpu.memory_space<vmem>>, %arg10: memref<8x128xf32, #tpu.memory_space<vmem>>) attributes {dimension_semantics = [#tpu.dimension_semantics<parallel>], iteration_bounds = array<i64: 1>, scalar_prefetch = 0 : i64, scratch_operands = 0 : i64, tpu.core_type = #tpu.core_type<tc>, window_params = [{transform_indices = @transform_0, window_bounds = array<i64: 96, 128>}, {transform_indices = @transform_1, window_bounds = array<i64: 96, 128>}, {pipeline_mode = #tpu.pipeline_mode<synchronous>, transform_indices = @transform_2, window_bounds = array<i64: 4, 96>}, {pipeline_mode = #tpu.pipeline_mode<synchronous>, transform_indices = @transform_3, window_bounds = array<i64: 4, 1>}, {pipeline_mode = #tpu.pipeline_mode<synchronous>, transform_indices = @transform_4, window_bounds = array<i64: 4, 32, 32>}, {pipeline_mode = #tpu.pipeline_mode<synchronous>, transform_indices = @transform_5, window_bounds = array<i64: 32, 32>}, {pipeline_mode = #tpu.pipeline_mode<synchronous>, transform_indices = @transform_6, window_bounds = array<i64: 32, 32>}, {pipeline_mode = #tpu.pipeline_mode<synchronous>, transform_indices = @transform_7, window_bounds = array<i64: 256, 32>}, {pipeline_mode = #tpu.pipeline_mode<synchronous>, transform_indices = @transform_8, window_bounds = array<i64: 256, 32>}, {transform_indices = @transform_9, window_bounds = array<i64: 8, 128>}]} {
    %c0 = arith.constant 0 : index
    %c0_0 = arith.constant 0 : index
    %0 = vector.load %arg1[%c0, %c0_0] : memref<96x128xf32, #tpu.memory_space<vmem>>, vector<96x128xf32>
    %c0_1 = arith.constant 0 : index
    %c0_2 = arith.constant 0 : index
    %1 = vector.load %arg2[%c0_1, %c0_2] : memref<96x128xf32, #tpu.memory_space<vmem>>, vector<96x128xf32>
    %2 = tpu.concatenate %0, %1 in 1 : vector<96x128xf32>, vector<96x128xf32> -> vector<96x256xf32>
    %c0_3 = arith.constant 0 : index
    %c0_4 = arith.constant 0 : index
    %3 = vector.load %arg3[%c0_3, %c0_4] : memref<4x96xf32, #tpu.memory_space<vmem>>, vector<4x96xf32>
    %cst = arith.constant dense<0.000000e+00> : vector<4x256xf32>
    %4 = tpu.matmul %3, %2, %cst {dimension_numbers = #tpu.dot_dimension_numbers<[1], [0], [0], [1], [0, 0, 1, 1], [], []>} : vector<4x96xf32>, vector<96x256xf32>, vector<4x256xf32> -> vector<4x256xf32>
    %c0_5 = arith.constant 0 : index
    %c0_6 = arith.constant 0 : index
    %5 = vector.load %arg4[%c0_5, %c0_6] : memref<4x1xf32, #tpu.memory_space<vmem>>, vector<4x1xf32>
    %6 = vector.broadcast %5 : vector<4x1xf32> to vector<4x256xf32>
    %7 = arith.addf %4, %6 : vector<4x256xf32>
    %8 = vector.extract_strided_slice %7 {offsets = [0, 0], sizes = [1, 128], strides = [1, 1]} : vector<4x256xf32> to vector<1x128xf32>
    %9 = vector.extract_strided_slice %7 {offsets = [1, 0], sizes = [1, 128], strides = [1, 1]} : vector<4x256xf32> to vector<1x128xf32>
    %10 = vector.extract_strided_slice %7 {offsets = [2, 0], sizes = [1, 128], strides = [1, 1]} : vector<4x256xf32> to vector<1x128xf32>
    %11 = vector.extract_strided_slice %7 {offsets = [3, 0], sizes = [1, 128], strides = [1, 1]} : vector<4x256xf32> to vector<1x128xf32>
    %12 = vector.extract_strided_slice %7 {offsets = [0, 128], sizes = [1, 128], strides = [1, 1]} : vector<4x256xf32> to vector<1x128xf32>
    %13 = vector.extract_strided_slice %7 {offsets = [1, 128], sizes = [1, 128], strides = [1, 1]} : vector<4x256xf32> to vector<1x128xf32>
    %14 = vector.extract_strided_slice %7 {offsets = [2, 128], sizes = [1, 128], strides = [1, 1]} : vector<4x256xf32> to vector<1x128xf32>
    %15 = vector.extract_strided_slice %7 {offsets = [3, 128], sizes = [1, 128], strides = [1, 1]} : vector<4x256xf32> to vector<1x128xf32>
    %16 = tpu.iota {dimensions = array<i32: 0>} : vector<32x128xi32>
    %c0_i32 = arith.constant 0 : i32
    %17 = vector.broadcast %c0_i32 : i32 to vector<32x128xi32>
    %18 = arith.cmpi eq, %16, %17 : vector<32x128xi32>
    %cst_7 = arith.constant 1.000000e+00 : f32
    %cst_8 = arith.constant 0.000000e+00 : f32
    %19 = vector.broadcast %cst_7 : f32 to vector<32x128xf32>
    %20 = vector.broadcast %cst_8 : f32 to vector<32x128xf32>
    %21 = arith.select %18, %19, %20 : vector<32x128xi1>, vector<32x128xf32>
    %cst_9 = arith.constant 5.000000e-01 : f32
    %22 = vector.broadcast %cst_9 : f32 to vector<1x128xf32>
    %23 = arith.mulf %22, %8 : vector<1x128xf32>
    %24 = math.cos %23 : vector<1x128xf32>
    %cst_10 = arith.constant 5.000000e-01 : f32
    %25 = vector.broadcast %cst_10 : f32 to vector<1x128xf32>
    %26 = arith.mulf %25, %8 : vector<1x128xf32>
    %27 = math.sin %26 : vector<1x128xf32>
    %c0_11 = arith.constant 0 : index
    %c0_12 = arith.constant 0 : index
    %c0_13 = arith.constant 0 : index
    %28 = vector.load %arg5[%c0_11, %c0_12, %c0_13] : memref<4x32x32xf32, #tpu.memory_space<vmem>>, vector<1x32x32xf32>
    %29 = vector.shape_cast %28 : vector<1x32x32xf32> to vector<32x32xf32>
    %cst_14 = arith.constant dense<0.000000e+00> : vector<32x128xf32>
    %30 = tpu.matmul %29, %21, %cst_14 {dimension_numbers = #tpu.dot_dimension_numbers<[1], [0], [0], [1], [0, 0, 1, 1], [], []>} : vector<32x32xf32>, vector<32x128xf32>, vector<32x128xf32> -> vector<32x128xf32>
    %31 = vector.broadcast %24 : vector<1x128xf32> to vector<32x128xf32>
    %32 = arith.mulf %31, %21 : vector<32x128xf32>
    %33 = vector.broadcast %27 : vector<1x128xf32> to vector<32x128xf32>
    %34 = arith.mulf %33, %30 : vector<32x128xf32>
    %35 = arith.addf %32, %34 : vector<32x128xf32>
    %cst_15 = arith.constant 5.000000e-01 : f32
    %36 = vector.broadcast %cst_15 : f32 to vector<1x128xf32>
    %37 = arith.mulf %36, %9 : vector<1x128xf32>
    %38 = math.cos %37 : vector<1x128xf32>
    %cst_16 = arith.constant 5.000000e-01 : f32
    %39 = vector.broadcast %cst_16 : f32 to vector<1x128xf32>
    %40 = arith.mulf %39, %9 : vector<1x128xf32>
    %41 = math.sin %40 : vector<1x128xf32>
    %c1 = arith.constant 1 : index
    %c0_17 = arith.constant 0 : index
    %c0_18 = arith.constant 0 : index
    %42 = vector.load %arg5[%c1, %c0_17, %c0_18] : memref<4x32x32xf32, #tpu.memory_space<vmem>>, vector<1x32x32xf32>
    %43 = vector.shape_cast %42 : vector<1x32x32xf32> to vector<32x32xf32>
    %cst_19 = arith.constant dense<0.000000e+00> : vector<32x128xf32>
    %44 = tpu.matmul %43, %35, %cst_19 {dimension_numbers = #tpu.dot_dimension_numbers<[1], [0], [0], [1], [0, 0, 1, 1], [], []>} : vector<32x32xf32>, vector<32x128xf32>, vector<32x128xf32> -> vector<32x128xf32>
    %45 = vector.broadcast %38 : vector<1x128xf32> to vector<32x128xf32>
    %46 = arith.mulf %45, %35 : vector<32x128xf32>
    %47 = vector.broadcast %41 : vector<1x128xf32> to vector<32x128xf32>
    %48 = arith.mulf %47, %44 : vector<32x128xf32>
    %49 = arith.addf %46, %48 : vector<32x128xf32>
    %cst_20 = arith.constant 5.000000e-01 : f32
    %50 = vector.broadcast %cst_20 : f32 to vector<1x128xf32>
    %51 = arith.mulf %50, %10 : vector<1x128xf32>
    %52 = math.cos %51 : vector<1x128xf32>
    %cst_21 = arith.constant 5.000000e-01 : f32
    %53 = vector.broadcast %cst_21 : f32 to vector<1x128xf32>
    %54 = arith.mulf %53, %10 : vector<1x128xf32>
    %55 = math.sin %54 : vector<1x128xf32>
    %c2 = arith.constant 2 : index
    %c0_22 = arith.constant 0 : index
    %c0_23 = arith.constant 0 : index
    %56 = vector.load %arg5[%c2, %c0_22, %c0_23] : memref<4x32x32xf32, #tpu.memory_space<vmem>>, vector<1x32x32xf32>
    %57 = vector.shape_cast %56 : vector<1x32x32xf32> to vector<32x32xf32>
    %cst_24 = arith.constant dense<0.000000e+00> : vector<32x128xf32>
    %58 = tpu.matmul %57, %49, %cst_24 {dimension_numbers = #tpu.dot_dimension_numbers<[1], [0], [0], [1], [0, 0, 1, 1], [], []>} : vector<32x32xf32>, vector<32x128xf32>, vector<32x128xf32> -> vector<32x128xf32>
    %59 = vector.broadcast %52 : vector<1x128xf32> to vector<32x128xf32>
    %60 = arith.mulf %59, %49 : vector<32x128xf32>
    %61 = vector.broadcast %55 : vector<1x128xf32> to vector<32x128xf32>
    %62 = arith.mulf %61, %58 : vector<32x128xf32>
    %63 = arith.addf %60, %62 : vector<32x128xf32>
    %cst_25 = arith.constant 5.000000e-01 : f32
    %64 = vector.broadcast %cst_25 : f32 to vector<1x128xf32>
    %65 = arith.mulf %64, %11 : vector<1x128xf32>
    %66 = math.cos %65 : vector<1x128xf32>
    %cst_26 = arith.constant 5.000000e-01 : f32
    %67 = vector.broadcast %cst_26 : f32 to vector<1x128xf32>
    %68 = arith.mulf %67, %11 : vector<1x128xf32>
    %69 = math.sin %68 : vector<1x128xf32>
    %c3 = arith.constant 3 : index
    %c0_27 = arith.constant 0 : index
    %c0_28 = arith.constant 0 : index
    %70 = vector.load %arg5[%c3, %c0_27, %c0_28] : memref<4x32x32xf32, #tpu.memory_space<vmem>>, vector<1x32x32xf32>
    %71 = vector.shape_cast %70 : vector<1x32x32xf32> to vector<32x32xf32>
    %cst_29 = arith.constant dense<0.000000e+00> : vector<32x128xf32>
    %72 = tpu.matmul %71, %63, %cst_29 {dimension_numbers = #tpu.dot_dimension_numbers<[1], [0], [0], [1], [0, 0, 1, 1], [], []>} : vector<32x32xf32>, vector<32x128xf32>, vector<32x128xf32> -> vector<32x128xf32>
    %73 = vector.broadcast %66 : vector<1x128xf32> to vector<32x128xf32>
    %74 = arith.mulf %73, %63 : vector<32x128xf32>
    %75 = vector.broadcast %69 : vector<1x128xf32> to vector<32x128xf32>
    %76 = arith.mulf %75, %72 : vector<32x128xf32>
    %77 = arith.addf %74, %76 : vector<32x128xf32>
    %c0_30 = arith.constant 0 : index
    %c0_31 = arith.constant 0 : index
    %78 = vector.load %arg6[%c0_30, %c0_31] : memref<32x32xf32, #tpu.memory_space<vmem>>, vector<32x32xf32>
    %cst_32 = arith.constant dense<0.000000e+00> : vector<32x128xf32>
    %79 = tpu.matmul %78, %77, %cst_32 {dimension_numbers = #tpu.dot_dimension_numbers<[1], [0], [0], [1], [0, 0, 1, 1], [], []>} : vector<32x32xf32>, vector<32x128xf32>, vector<32x128xf32> -> vector<32x128xf32>
    %cst_33 = arith.constant 5.000000e-01 : f32
    %80 = vector.broadcast %cst_33 : f32 to vector<1x128xf32>
    %81 = arith.mulf %80, %12 : vector<1x128xf32>
    %82 = math.cos %81 : vector<1x128xf32>
    %cst_34 = arith.constant 5.000000e-01 : f32
    %83 = vector.broadcast %cst_34 : f32 to vector<1x128xf32>
    %84 = arith.mulf %83, %12 : vector<1x128xf32>
    %85 = math.sin %84 : vector<1x128xf32>
    %c0_35 = arith.constant 0 : index
    %c0_36 = arith.constant 0 : index
    %c0_37 = arith.constant 0 : index
    %86 = vector.load %arg5[%c0_35, %c0_36, %c0_37] : memref<4x32x32xf32, #tpu.memory_space<vmem>>, vector<1x32x32xf32>
    %87 = vector.shape_cast %86 : vector<1x32x32xf32> to vector<32x32xf32>
    %cst_38 = arith.constant dense<0.000000e+00> : vector<32x128xf32>
    %88 = tpu.matmul %87, %79, %cst_38 {dimension_numbers = #tpu.dot_dimension_numbers<[1], [0], [0], [1], [0, 0, 1, 1], [], []>} : vector<32x32xf32>, vector<32x128xf32>, vector<32x128xf32> -> vector<32x128xf32>
    %89 = vector.broadcast %82 : vector<1x128xf32> to vector<32x128xf32>
    %90 = arith.mulf %89, %79 : vector<32x128xf32>
    %91 = vector.broadcast %85 : vector<1x128xf32> to vector<32x128xf32>
    %92 = arith.mulf %91, %88 : vector<32x128xf32>
    %93 = arith.addf %90, %92 : vector<32x128xf32>
    %cst_39 = arith.constant 5.000000e-01 : f32
    %94 = vector.broadcast %cst_39 : f32 to vector<1x128xf32>
    %95 = arith.mulf %94, %13 : vector<1x128xf32>
    %96 = math.cos %95 : vector<1x128xf32>
    %cst_40 = arith.constant 5.000000e-01 : f32
    %97 = vector.broadcast %cst_40 : f32 to vector<1x128xf32>
    %98 = arith.mulf %97, %13 : vector<1x128xf32>
    %99 = math.sin %98 : vector<1x128xf32>
    %c1_41 = arith.constant 1 : index
    %c0_42 = arith.constant 0 : index
    %c0_43 = arith.constant 0 : index
    %100 = vector.load %arg5[%c1_41, %c0_42, %c0_43] : memref<4x32x32xf32, #tpu.memory_space<vmem>>, vector<1x32x32xf32>
    %101 = vector.shape_cast %100 : vector<1x32x32xf32> to vector<32x32xf32>
    %cst_44 = arith.constant dense<0.000000e+00> : vector<32x128xf32>
    %102 = tpu.matmul %101, %93, %cst_44 {dimension_numbers = #tpu.dot_dimension_numbers<[1], [0], [0], [1], [0, 0, 1, 1], [], []>} : vector<32x32xf32>, vector<32x128xf32>, vector<32x128xf32> -> vector<32x128xf32>
    %103 = vector.broadcast %96 : vector<1x128xf32> to vector<32x128xf32>
    %104 = arith.mulf %103, %93 : vector<32x128xf32>
    %105 = vector.broadcast %99 : vector<1x128xf32> to vector<32x128xf32>
    %106 = arith.mulf %105, %102 : vector<32x128xf32>
    %107 = arith.addf %104, %106 : vector<32x128xf32>
    %cst_45 = arith.constant 5.000000e-01 : f32
    %108 = vector.broadcast %cst_45 : f32 to vector<1x128xf32>
    %109 = arith.mulf %108, %14 : vector<1x128xf32>
    %110 = math.cos %109 : vector<1x128xf32>
    %cst_46 = arith.constant 5.000000e-01 : f32
    %111 = vector.broadcast %cst_46 : f32 to vector<1x128xf32>
    %112 = arith.mulf %111, %14 : vector<1x128xf32>
    %113 = math.sin %112 : vector<1x128xf32>
    %c2_47 = arith.constant 2 : index
    %c0_48 = arith.constant 0 : index
    %c0_49 = arith.constant 0 : index
    %114 = vector.load %arg5[%c2_47, %c0_48, %c0_49] : memref<4x32x32xf32, #tpu.memory_space<vmem>>, vector<1x32x32xf32>
    %115 = vector.shape_cast %114 : vector<1x32x32xf32> to vector<32x32xf32>
    %cst_50 = arith.constant dense<0.000000e+00> : vector<32x128xf32>
    %116 = tpu.matmul %115, %107, %cst_50 {dimension_numbers = #tpu.dot_dimension_numbers<[1], [0], [0], [1], [0, 0, 1, 1], [], []>} : vector<32x32xf32>, vector<32x128xf32>, vector<32x128xf32> -> vector<32x128xf32>
    %117 = vector.broadcast %110 : vector<1x128xf32> to vector<32x128xf32>
    %118 = arith.mulf %117, %107 : vector<32x128xf32>
    %119 = vector.broadcast %113 : vector<1x128xf32> to vector<32x128xf32>
    %120 = arith.mulf %119, %116 : vector<32x128xf32>
    %121 = arith.addf %118, %120 : vector<32x128xf32>
    %cst_51 = arith.constant 5.000000e-01 : f32
    %122 = vector.broadcast %cst_51 : f32 to vector<1x128xf32>
    %123 = arith.mulf %122, %15 : vector<1x128xf32>
    %124 = math.cos %123 : vector<1x128xf32>
    %cst_52 = arith.constant 5.000000e-01 : f32
    %125 = vector.broadcast %cst_52 : f32 to vector<1x128xf32>
    %126 = arith.mulf %125, %15 : vector<1x128xf32>
    %127 = math.sin %126 : vector<1x128xf32>
    %c3_53 = arith.constant 3 : index
    %c0_54 = arith.constant 0 : index
    %c0_55 = arith.constant 0 : index
    %128 = vector.load %arg5[%c3_53, %c0_54, %c0_55] : memref<4x32x32xf32, #tpu.memory_space<vmem>>, vector<1x32x32xf32>
    %129 = vector.shape_cast %128 : vector<1x32x32xf32> to vector<32x32xf32>
    %cst_56 = arith.constant dense<0.000000e+00> : vector<32x128xf32>
    %130 = tpu.matmul %129, %121, %cst_56 {dimension_numbers = #tpu.dot_dimension_numbers<[1], [0], [0], [1], [0, 0, 1, 1], [], []>} : vector<32x32xf32>, vector<32x128xf32>, vector<32x128xf32> -> vector<32x128xf32>
    %131 = vector.broadcast %124 : vector<1x128xf32> to vector<32x128xf32>
    %132 = arith.mulf %131, %121 : vector<32x128xf32>
    %133 = vector.broadcast %127 : vector<1x128xf32> to vector<32x128xf32>
    %134 = arith.mulf %133, %130 : vector<32x128xf32>
    %135 = arith.addf %132, %134 : vector<32x128xf32>
    %c0_57 = arith.constant 0 : index
    %c0_58 = arith.constant 0 : index
    %136 = vector.load %arg8[%c0_57, %c0_58] : memref<256x32xf32, #tpu.memory_space<vmem>>, vector<256x32xf32>
    %cst_59 = arith.constant dense<0.000000e+00> : vector<256x128xf32>
    %137 = tpu.matmul %136, %135, %cst_59 {dimension_numbers = #tpu.dot_dimension_numbers<[1], [0], [0], [1], [0, 0, 1, 1], [], []>} : vector<256x32xf32>, vector<32x128xf32>, vector<256x128xf32> -> vector<256x128xf32>
    %138 = vector.extract_strided_slice %137 {offsets = [0, 0], sizes = [32, 128], strides = [1, 1]} : vector<256x128xf32> to vector<32x128xf32>
    %139 = arith.mulf %135, %138 : vector<32x128xf32>
    %cst_60 = arith.constant dense<0.000000e+00> : vector<128xf32>
    %140 = vector.multi_reduction <add>, %139, %cst_60 [0] : vector<32x128xf32> to vector<128xf32>
    %141 = vector.shape_cast %140 : vector<128xf32> to vector<1x128xf32>
    %142 = vector.extract_strided_slice %137 {offsets = [32, 0], sizes = [32, 128], strides = [1, 1]} : vector<256x128xf32> to vector<32x128xf32>
    %143 = arith.mulf %135, %142 : vector<32x128xf32>
    %cst_61 = arith.constant dense<0.000000e+00> : vector<128xf32>
    %144 = vector.multi_reduction <add>, %143, %cst_61 [0] : vector<32x128xf32> to vector<128xf32>
    %145 = vector.shape_cast %144 : vector<128xf32> to vector<1x128xf32>
    %146 = vector.extract_strided_slice %137 {offsets = [64, 0], sizes = [32, 128], strides = [1, 1]} : vector<256x128xf32> to vector<32x128xf32>
    %147 = arith.mulf %135, %146 : vector<32x128xf32>
    %cst_62 = arith.constant dense<0.000000e+00> : vector<128xf32>
    %148 = vector.multi_reduction <add>, %147, %cst_62 [0] : vector<32x128xf32> to vector<128xf32>
    %149 = vector.shape_cast %148 : vector<128xf32> to vector<1x128xf32>
    %150 = vector.extract_strided_slice %137 {offsets = [96, 0], sizes = [32, 128], strides = [1, 1]} : vector<256x128xf32> to vector<32x128xf32>
    %151 = arith.mulf %135, %150 : vector<32x128xf32>
    %cst_63 = arith.constant dense<0.000000e+00> : vector<128xf32>
    %152 = vector.multi_reduction <add>, %151, %cst_63 [0] : vector<32x128xf32> to vector<128xf32>
    %153 = vector.shape_cast %152 : vector<128xf32> to vector<1x128xf32>
    %154 = vector.extract_strided_slice %137 {offsets = [128, 0], sizes = [32, 128], strides = [1, 1]} : vector<256x128xf32> to vector<32x128xf32>
    %155 = arith.mulf %135, %154 : vector<32x128xf32>
    %cst_64 = arith.constant dense<0.000000e+00> : vector<128xf32>
    %156 = vector.multi_reduction <add>, %155, %cst_64 [0] : vector<32x128xf32> to vector<128xf32>
    %157 = vector.shape_cast %156 : vector<128xf32> to vector<1x128xf32>
    %158 = vector.extract_strided_slice %137 {offsets = [160, 0], sizes = [32, 128], strides = [1, 1]} : vector<256x128xf32> to vector<32x128xf32>
    %159 = arith.mulf %135, %158 : vector<32x128xf32>
    %cst_65 = arith.constant dense<0.000000e+00> : vector<128xf32>
    %160 = vector.multi_reduction <add>, %159, %cst_65 [0] : vector<32x128xf32> to vector<128xf32>
    %161 = vector.shape_cast %160 : vector<128xf32> to vector<1x128xf32>
    %162 = vector.extract_strided_slice %137 {offsets = [192, 0], sizes = [32, 128], strides = [1, 1]} : vector<256x128xf32> to vector<32x128xf32>
    %163 = arith.mulf %135, %162 : vector<32x128xf32>
    %cst_66 = arith.constant dense<0.000000e+00> : vector<128xf32>
    %164 = vector.multi_reduction <add>, %163, %cst_66 [0] : vector<32x128xf32> to vector<128xf32>
    %165 = vector.shape_cast %164 : vector<128xf32> to vector<1x128xf32>
    %166 = vector.extract_strided_slice %137 {offsets = [224, 0], sizes = [32, 128], strides = [1, 1]} : vector<256x128xf32> to vector<32x128xf32>
    %167 = arith.mulf %135, %166 : vector<32x128xf32>
    %cst_67 = arith.constant dense<0.000000e+00> : vector<128xf32>
    %168 = vector.multi_reduction <add>, %167, %cst_67 [0] : vector<32x128xf32> to vector<128xf32>
    %169 = vector.shape_cast %168 : vector<128xf32> to vector<1x128xf32>
    %170 = arith.mulf %141, %141 : vector<1x128xf32>
    %171 = arith.mulf %157, %157 : vector<1x128xf32>
    %172 = arith.addf %170, %171 : vector<1x128xf32>
    %173 = math.sqrt %172 : vector<1x128xf32>
    %174 = math.tanh %173 : vector<1x128xf32>
    %cst_68 = arith.constant 3.14159274 : f32
    %175 = vector.broadcast %cst_68 : f32 to vector<1x128xf32>
    %176 = arith.mulf %174, %175 : vector<1x128xf32>
    %177 = arith.mulf %145, %145 : vector<1x128xf32>
    %178 = arith.mulf %161, %161 : vector<1x128xf32>
    %179 = arith.addf %177, %178 : vector<1x128xf32>
    %180 = math.sqrt %179 : vector<1x128xf32>
    %181 = math.tanh %180 : vector<1x128xf32>
    %cst_69 = arith.constant 3.14159274 : f32
    %182 = vector.broadcast %cst_69 : f32 to vector<1x128xf32>
    %183 = arith.mulf %181, %182 : vector<1x128xf32>
    %184 = arith.mulf %149, %149 : vector<1x128xf32>
    %185 = arith.mulf %165, %165 : vector<1x128xf32>
    %186 = arith.addf %184, %185 : vector<1x128xf32>
    %187 = math.sqrt %186 : vector<1x128xf32>
    %188 = math.tanh %187 : vector<1x128xf32>
    %cst_70 = arith.constant 3.14159274 : f32
    %189 = vector.broadcast %cst_70 : f32 to vector<1x128xf32>
    %190 = arith.mulf %188, %189 : vector<1x128xf32>
    %191 = arith.mulf %153, %153 : vector<1x128xf32>
    %192 = arith.mulf %169, %169 : vector<1x128xf32>
    %193 = arith.addf %191, %192 : vector<1x128xf32>
    %194 = math.sqrt %193 : vector<1x128xf32>
    %195 = math.tanh %194 : vector<1x128xf32>
    %cst_71 = arith.constant 3.14159274 : f32
    %196 = vector.broadcast %cst_71 : f32 to vector<1x128xf32>
    %197 = arith.mulf %195, %196 : vector<1x128xf32>
    %cst_72 = arith.constant 5.000000e-01 : f32
    %198 = vector.broadcast %cst_72 : f32 to vector<1x128xf32>
    %199 = arith.mulf %198, %12 : vector<1x128xf32>
    %200 = math.cos %199 : vector<1x128xf32>
    %cst_73 = arith.constant 5.000000e-01 : f32
    %201 = vector.broadcast %cst_73 : f32 to vector<1x128xf32>
    %202 = arith.mulf %201, %12 : vector<1x128xf32>
    %203 = math.sin %202 : vector<1x128xf32>
    %c0_74 = arith.constant 0 : index
    %c0_75 = arith.constant 0 : index
    %c0_76 = arith.constant 0 : index
    %204 = vector.load %arg5[%c0_74, %c0_75, %c0_76] : memref<4x32x32xf32, #tpu.memory_space<vmem>>, vector<1x32x32xf32>
    %205 = vector.shape_cast %204 : vector<1x32x32xf32> to vector<32x32xf32>
    %cst_77 = arith.constant dense<0.000000e+00> : vector<32x128xf32>
    %206 = tpu.matmul %205, %21, %cst_77 {dimension_numbers = #tpu.dot_dimension_numbers<[1], [0], [0], [1], [0, 0, 1, 1], [], []>} : vector<32x32xf32>, vector<32x128xf32>, vector<32x128xf32> -> vector<32x128xf32>
    %207 = vector.broadcast %200 : vector<1x128xf32> to vector<32x128xf32>
    %208 = arith.mulf %207, %21 : vector<32x128xf32>
    %209 = vector.broadcast %203 : vector<1x128xf32> to vector<32x128xf32>
    %210 = arith.mulf %209, %206 : vector<32x128xf32>
    %211 = arith.addf %208, %210 : vector<32x128xf32>
    %cst_78 = arith.constant 5.000000e-01 : f32
    %212 = vector.broadcast %cst_78 : f32 to vector<1x128xf32>
    %213 = arith.mulf %212, %13 : vector<1x128xf32>
    %214 = math.cos %213 : vector<1x128xf32>
    %cst_79 = arith.constant 5.000000e-01 : f32
    %215 = vector.broadcast %cst_79 : f32 to vector<1x128xf32>
    %216 = arith.mulf %215, %13 : vector<1x128xf32>
    %217 = math.sin %216 : vector<1x128xf32>
    %c1_80 = arith.constant 1 : index
    %c0_81 = arith.constant 0 : index
    %c0_82 = arith.constant 0 : index
    %218 = vector.load %arg5[%c1_80, %c0_81, %c0_82] : memref<4x32x32xf32, #tpu.memory_space<vmem>>, vector<1x32x32xf32>
    %219 = vector.shape_cast %218 : vector<1x32x32xf32> to vector<32x32xf32>
    %cst_83 = arith.constant dense<0.000000e+00> : vector<32x128xf32>
    %220 = tpu.matmul %219, %211, %cst_83 {dimension_numbers = #tpu.dot_dimension_numbers<[1], [0], [0], [1], [0, 0, 1, 1], [], []>} : vector<32x32xf32>, vector<32x128xf32>, vector<32x128xf32> -> vector<32x128xf32>
    %221 = vector.broadcast %214 : vector<1x128xf32> to vector<32x128xf32>
    %222 = arith.mulf %221, %211 : vector<32x128xf32>
    %223 = vector.broadcast %217 : vector<1x128xf32> to vector<32x128xf32>
    %224 = arith.mulf %223, %220 : vector<32x128xf32>
    %225 = arith.addf %222, %224 : vector<32x128xf32>
    %cst_84 = arith.constant 5.000000e-01 : f32
    %226 = vector.broadcast %cst_84 : f32 to vector<1x128xf32>
    %227 = arith.mulf %226, %14 : vector<1x128xf32>
    %228 = math.cos %227 : vector<1x128xf32>
    %cst_85 = arith.constant 5.000000e-01 : f32
    %229 = vector.broadcast %cst_85 : f32 to vector<1x128xf32>
    %230 = arith.mulf %229, %14 : vector<1x128xf32>
    %231 = math.sin %230 : vector<1x128xf32>
    %c2_86 = arith.constant 2 : index
    %c0_87 = arith.constant 0 : index
    %c0_88 = arith.constant 0 : index
    %232 = vector.load %arg5[%c2_86, %c0_87, %c0_88] : memref<4x32x32xf32, #tpu.memory_space<vmem>>, vector<1x32x32xf32>
    %233 = vector.shape_cast %232 : vector<1x32x32xf32> to vector<32x32xf32>
    %cst_89 = arith.constant dense<0.000000e+00> : vector<32x128xf32>
    %234 = tpu.matmul %233, %225, %cst_89 {dimension_numbers = #tpu.dot_dimension_numbers<[1], [0], [0], [1], [0, 0, 1, 1], [], []>} : vector<32x32xf32>, vector<32x128xf32>, vector<32x128xf32> -> vector<32x128xf32>
    %235 = vector.broadcast %228 : vector<1x128xf32> to vector<32x128xf32>
    %236 = arith.mulf %235, %225 : vector<32x128xf32>
    %237 = vector.broadcast %231 : vector<1x128xf32> to vector<32x128xf32>
    %238 = arith.mulf %237, %234 : vector<32x128xf32>
    %239 = arith.addf %236, %238 : vector<32x128xf32>
    %cst_90 = arith.constant 5.000000e-01 : f32
    %240 = vector.broadcast %cst_90 : f32 to vector<1x128xf32>
    %241 = arith.mulf %240, %15 : vector<1x128xf32>
    %242 = math.cos %241 : vector<1x128xf32>
    %cst_91 = arith.constant 5.000000e-01 : f32
    %243 = vector.broadcast %cst_91 : f32 to vector<1x128xf32>
    %244 = arith.mulf %243, %15 : vector<1x128xf32>
    %245 = math.sin %244 : vector<1x128xf32>
    %c3_92 = arith.constant 3 : index
    %c0_93 = arith.constant 0 : index
    %c0_94 = arith.constant 0 : index
    %246 = vector.load %arg5[%c3_92, %c0_93, %c0_94] : memref<4x32x32xf32, #tpu.memory_space<vmem>>, vector<1x32x32xf32>
    %247 = vector.shape_cast %246 : vector<1x32x32xf32> to vector<32x32xf32>
    %cst_95 = arith.constant dense<0.000000e+00> : vector<32x128xf32>
    %248 = tpu.matmul %247, %239, %cst_95 {dimension_numbers = #tpu.dot_dimension_numbers<[1], [0], [0], [1], [0, 0, 1, 1], [], []>} : vector<32x32xf32>, vector<32x128xf32>, vector<32x128xf32> -> vector<32x128xf32>
    %249 = vector.broadcast %242 : vector<1x128xf32> to vector<32x128xf32>
    %250 = arith.mulf %249, %239 : vector<32x128xf32>
    %251 = vector.broadcast %245 : vector<1x128xf32> to vector<32x128xf32>
    %252 = arith.mulf %251, %248 : vector<32x128xf32>
    %253 = arith.addf %250, %252 : vector<32x128xf32>
    %c0_96 = arith.constant 0 : index
    %c0_97 = arith.constant 0 : index
    %254 = vector.load %arg7[%c0_96, %c0_97] : memref<32x32xf32, #tpu.memory_space<vmem>>, vector<32x32xf32>
    %cst_98 = arith.constant dense<0.000000e+00> : vector<32x128xf32>
    %255 = tpu.matmul %254, %253, %cst_98 {dimension_numbers = #tpu.dot_dimension_numbers<[1], [0], [0], [1], [0, 0, 1, 1], [], []>} : vector<32x32xf32>, vector<32x128xf32>, vector<32x128xf32> -> vector<32x128xf32>
    %cst_99 = arith.constant 5.000000e-01 : f32
    %256 = vector.broadcast %cst_99 : f32 to vector<1x128xf32>
    %257 = arith.mulf %256, %176 : vector<1x128xf32>
    %258 = math.cos %257 : vector<1x128xf32>
    %cst_100 = arith.constant 5.000000e-01 : f32
    %259 = vector.broadcast %cst_100 : f32 to vector<1x128xf32>
    %260 = arith.mulf %259, %176 : vector<1x128xf32>
    %261 = math.sin %260 : vector<1x128xf32>
    %c0_101 = arith.constant 0 : index
    %c0_102 = arith.constant 0 : index
    %c0_103 = arith.constant 0 : index
    %262 = vector.load %arg5[%c0_101, %c0_102, %c0_103] : memref<4x32x32xf32, #tpu.memory_space<vmem>>, vector<1x32x32xf32>
    %263 = vector.shape_cast %262 : vector<1x32x32xf32> to vector<32x32xf32>
    %cst_104 = arith.constant dense<0.000000e+00> : vector<32x128xf32>
    %264 = tpu.matmul %263, %255, %cst_104 {dimension_numbers = #tpu.dot_dimension_numbers<[1], [0], [0], [1], [0, 0, 1, 1], [], []>} : vector<32x32xf32>, vector<32x128xf32>, vector<32x128xf32> -> vector<32x128xf32>
    %265 = vector.broadcast %258 : vector<1x128xf32> to vector<32x128xf32>
    %266 = arith.mulf %265, %255 : vector<32x128xf32>
    %267 = vector.broadcast %261 : vector<1x128xf32> to vector<32x128xf32>
    %268 = arith.mulf %267, %264 : vector<32x128xf32>
    %269 = arith.addf %266, %268 : vector<32x128xf32>
    %cst_105 = arith.constant 5.000000e-01 : f32
    %270 = vector.broadcast %cst_105 : f32 to vector<1x128xf32>
    %271 = arith.mulf %270, %183 : vector<1x128xf32>
    %272 = math.cos %271 : vector<1x128xf32>
    %cst_106 = arith.constant 5.000000e-01 : f32
    %273 = vector.broadcast %cst_106 : f32 to vector<1x128xf32>
    %274 = arith.mulf %273, %183 : vector<1x128xf32>
    %275 = math.sin %274 : vector<1x128xf32>
    %c1_107 = arith.constant 1 : index
    %c0_108 = arith.constant 0 : index
    %c0_109 = arith.constant 0 : index
    %276 = vector.load %arg5[%c1_107, %c0_108, %c0_109] : memref<4x32x32xf32, #tpu.memory_space<vmem>>, vector<1x32x32xf32>
    %277 = vector.shape_cast %276 : vector<1x32x32xf32> to vector<32x32xf32>
    %cst_110 = arith.constant dense<0.000000e+00> : vector<32x128xf32>
    %278 = tpu.matmul %277, %269, %cst_110 {dimension_numbers = #tpu.dot_dimension_numbers<[1], [0], [0], [1], [0, 0, 1, 1], [], []>} : vector<32x32xf32>, vector<32x128xf32>, vector<32x128xf32> -> vector<32x128xf32>
    %279 = vector.broadcast %272 : vector<1x128xf32> to vector<32x128xf32>
    %280 = arith.mulf %279, %269 : vector<32x128xf32>
    %281 = vector.broadcast %275 : vector<1x128xf32> to vector<32x128xf32>
    %282 = arith.mulf %281, %278 : vector<32x128xf32>
    %283 = arith.addf %280, %282 : vector<32x128xf32>
    %cst_111 = arith.constant 5.000000e-01 : f32
    %284 = vector.broadcast %cst_111 : f32 to vector<1x128xf32>
    %285 = arith.mulf %284, %190 : vector<1x128xf32>
    %286 = math.cos %285 : vector<1x128xf32>
    %cst_112 = arith.constant 5.000000e-01 : f32
    %287 = vector.broadcast %cst_112 : f32 to vector<1x128xf32>
    %288 = arith.mulf %287, %190 : vector<1x128xf32>
    %289 = math.sin %288 : vector<1x128xf32>
    %c2_113 = arith.constant 2 : index
    %c0_114 = arith.constant 0 : index
    %c0_115 = arith.constant 0 : index
    %290 = vector.load %arg5[%c2_113, %c0_114, %c0_115] : memref<4x32x32xf32, #tpu.memory_space<vmem>>, vector<1x32x32xf32>
    %291 = vector.shape_cast %290 : vector<1x32x32xf32> to vector<32x32xf32>
    %cst_116 = arith.constant dense<0.000000e+00> : vector<32x128xf32>
    %292 = tpu.matmul %291, %283, %cst_116 {dimension_numbers = #tpu.dot_dimension_numbers<[1], [0], [0], [1], [0, 0, 1, 1], [], []>} : vector<32x32xf32>, vector<32x128xf32>, vector<32x128xf32> -> vector<32x128xf32>
    %293 = vector.broadcast %286 : vector<1x128xf32> to vector<32x128xf32>
    %294 = arith.mulf %293, %283 : vector<32x128xf32>
    %295 = vector.broadcast %289 : vector<1x128xf32> to vector<32x128xf32>
    %296 = arith.mulf %295, %292 : vector<32x128xf32>
    %297 = arith.addf %294, %296 : vector<32x128xf32>
    %cst_117 = arith.constant 5.000000e-01 : f32
    %298 = vector.broadcast %cst_117 : f32 to vector<1x128xf32>
    %299 = arith.mulf %298, %197 : vector<1x128xf32>
    %300 = math.cos %299 : vector<1x128xf32>
    %cst_118 = arith.constant 5.000000e-01 : f32
    %301 = vector.broadcast %cst_118 : f32 to vector<1x128xf32>
    %302 = arith.mulf %301, %197 : vector<1x128xf32>
    %303 = math.sin %302 : vector<1x128xf32>
    %c3_119 = arith.constant 3 : index
    %c0_120 = arith.constant 0 : index
    %c0_121 = arith.constant 0 : index
    %304 = vector.load %arg5[%c3_119, %c0_120, %c0_121] : memref<4x32x32xf32, #tpu.memory_space<vmem>>, vector<1x32x32xf32>
    %305 = vector.shape_cast %304 : vector<1x32x32xf32> to vector<32x32xf32>
    %cst_122 = arith.constant dense<0.000000e+00> : vector<32x128xf32>
    %306 = tpu.matmul %305, %297, %cst_122 {dimension_numbers = #tpu.dot_dimension_numbers<[1], [0], [0], [1], [0, 0, 1, 1], [], []>} : vector<32x32xf32>, vector<32x128xf32>, vector<32x128xf32> -> vector<32x128xf32>
    %307 = vector.broadcast %300 : vector<1x128xf32> to vector<32x128xf32>
    %308 = arith.mulf %307, %297 : vector<32x128xf32>
    %309 = vector.broadcast %303 : vector<1x128xf32> to vector<32x128xf32>
    %310 = arith.mulf %309, %306 : vector<32x128xf32>
    %311 = arith.addf %308, %310 : vector<32x128xf32>
    %c0_123 = arith.constant 0 : index
    %c0_124 = arith.constant 0 : index
    %312 = vector.load %arg9[%c0_123, %c0_124] : memref<256x32xf32, #tpu.memory_space<vmem>>, vector<256x32xf32>
    %cst_125 = arith.constant dense<0.000000e+00> : vector<256x128xf32>
    %313 = tpu.matmul %312, %311, %cst_125 {dimension_numbers = #tpu.dot_dimension_numbers<[1], [0], [0], [1], [0, 0, 1, 1], [], []>} : vector<256x32xf32>, vector<32x128xf32>, vector<256x128xf32> -> vector<256x128xf32>
    %314 = vector.extract_strided_slice %313 {offsets = [0, 0], sizes = [32, 128], strides = [1, 1]} : vector<256x128xf32> to vector<32x128xf32>
    %315 = arith.mulf %311, %314 : vector<32x128xf32>
    %cst_126 = arith.constant dense<0.000000e+00> : vector<128xf32>
    %316 = vector.multi_reduction <add>, %315, %cst_126 [0] : vector<32x128xf32> to vector<128xf32>
    %317 = vector.shape_cast %316 : vector<128xf32> to vector<1x128xf32>
    %318 = vector.extract_strided_slice %313 {offsets = [32, 0], sizes = [32, 128], strides = [1, 1]} : vector<256x128xf32> to vector<32x128xf32>
    %319 = arith.mulf %311, %318 : vector<32x128xf32>
    %cst_127 = arith.constant dense<0.000000e+00> : vector<128xf32>
    %320 = vector.multi_reduction <add>, %319, %cst_127 [0] : vector<32x128xf32> to vector<128xf32>
    %321 = vector.shape_cast %320 : vector<128xf32> to vector<1x128xf32>
    %322 = vector.extract_strided_slice %313 {offsets = [64, 0], sizes = [32, 128], strides = [1, 1]} : vector<256x128xf32> to vector<32x128xf32>
    %323 = arith.mulf %311, %322 : vector<32x128xf32>
    %cst_128 = arith.constant dense<0.000000e+00> : vector<128xf32>
    %324 = vector.multi_reduction <add>, %323, %cst_128 [0] : vector<32x128xf32> to vector<128xf32>
    %325 = vector.shape_cast %324 : vector<128xf32> to vector<1x128xf32>
    %326 = vector.extract_strided_slice %313 {offsets = [96, 0], sizes = [32, 128], strides = [1, 1]} : vector<256x128xf32> to vector<32x128xf32>
    %327 = arith.mulf %311, %326 : vector<32x128xf32>
    %cst_129 = arith.constant dense<0.000000e+00> : vector<128xf32>
    %328 = vector.multi_reduction <add>, %327, %cst_129 [0] : vector<32x128xf32> to vector<128xf32>
    %329 = vector.shape_cast %328 : vector<128xf32> to vector<1x128xf32>
    %330 = vector.extract_strided_slice %313 {offsets = [128, 0], sizes = [32, 128], strides = [1, 1]} : vector<256x128xf32> to vector<32x128xf32>
    %331 = arith.mulf %311, %330 : vector<32x128xf32>
    %cst_130 = arith.constant dense<0.000000e+00> : vector<128xf32>
    %332 = vector.multi_reduction <add>, %331, %cst_130 [0] : vector<32x128xf32> to vector<128xf32>
    %333 = vector.shape_cast %332 : vector<128xf32> to vector<1x128xf32>
    %334 = vector.extract_strided_slice %313 {offsets = [160, 0], sizes = [32, 128], strides = [1, 1]} : vector<256x128xf32> to vector<32x128xf32>
    %335 = arith.mulf %311, %334 : vector<32x128xf32>
    %cst_131 = arith.constant dense<0.000000e+00> : vector<128xf32>
    %336 = vector.multi_reduction <add>, %335, %cst_131 [0] : vector<32x128xf32> to vector<128xf32>
    %337 = vector.shape_cast %336 : vector<128xf32> to vector<1x128xf32>
    %338 = vector.extract_strided_slice %313 {offsets = [192, 0], sizes = [32, 128], strides = [1, 1]} : vector<256x128xf32> to vector<32x128xf32>
    %339 = arith.mulf %311, %338 : vector<32x128xf32>
    %cst_132 = arith.constant dense<0.000000e+00> : vector<128xf32>
    %340 = vector.multi_reduction <add>, %339, %cst_132 [0] : vector<32x128xf32> to vector<128xf32>
    %341 = vector.shape_cast %340 : vector<128xf32> to vector<1x128xf32>
    %342 = vector.extract_strided_slice %313 {offsets = [224, 0], sizes = [32, 128], strides = [1, 1]} : vector<256x128xf32> to vector<32x128xf32>
    %343 = arith.mulf %311, %342 : vector<32x128xf32>
    %cst_133 = arith.constant dense<0.000000e+00> : vector<128xf32>
    %344 = vector.multi_reduction <add>, %343, %cst_133 [0] : vector<32x128xf32> to vector<128xf32>
    %345 = vector.shape_cast %344 : vector<128xf32> to vector<1x128xf32>
    %346 = tpu.concatenate %317, %321, %325, %329, %333, %337, %341, %345 in 0 : vector<1x128xf32>, vector<1x128xf32>, vector<1x128xf32>, vector<1x128xf32>, vector<1x128xf32>, vector<1x128xf32>, vector<1x128xf32>, vector<1x128xf32> -> vector<8x128xf32>
    %c0_134 = arith.constant 0 : index
    %c0_135 = arith.constant 0 : index
    %347 = vector.load %arg10[%c0_134, %c0_135] : memref<8x128xf32, #tpu.memory_space<vmem>>, vector<8x128xf32>
    tpu.vector_store %arg10[%c0_134, %c0_135], %346 {strides = array<i32>} : memref<8x128xf32, #tpu.memory_space<vmem>>, vector<8x128xf32>,
    return
  }
  func.func @transform_0(%arg0: i32) -> (i32, i32) {
    %c0_i32 = arith.constant 0 : i32
    %c0_i32_0 = arith.constant 0 : i32
    return %c0_i32, %arg0 : i32, i32
  }
  func.func @transform_1(%arg0: i32) -> (i32, i32) {
    %c0_i32 = arith.constant 0 : i32
    %c0_i32_0 = arith.constant 0 : i32
    return %c0_i32, %arg0 : i32, i32
  }
  func.func @transform_2(%arg0: i32) -> (i32, i32) {
    %c0_i32 = arith.constant 0 : i32
    %c0_i32_0 = arith.constant 0 : i32
    %c0_i32_1 = arith.constant 0 : i32
    return %c0_i32, %c0_i32_0 : i32, i32
  }
  func.func @transform_3(%arg0: i32) -> (i32, i32) {
    %c0_i32 = arith.constant 0 : i32
    %c0_i32_0 = arith.constant 0 : i32
    %c0_i32_1 = arith.constant 0 : i32
    return %c0_i32, %c0_i32_0 : i32, i32
  }
  func.func @transform_4(%arg0: i32) -> (i32, i32, i32) {
    %c0_i32 = arith.constant 0 : i32
    %c0_i32_0 = arith.constant 0 : i32
    %c0_i32_1 = arith.constant 0 : i32
    %c0_i32_2 = arith.constant 0 : i32
    return %c0_i32, %c0_i32_0, %c0_i32_1 : i32, i32, i32
  }
  func.func @transform_5(%arg0: i32) -> (i32, i32) {
    %c0_i32 = arith.constant 0 : i32
    %c0_i32_0 = arith.constant 0 : i32
    %c0_i32_1 = arith.constant 0 : i32
    return %c0_i32, %c0_i32_0 : i32, i32
  }
  func.func @transform_6(%arg0: i32) -> (i32, i32) {
    %c0_i32 = arith.constant 0 : i32
    %c0_i32_0 = arith.constant 0 : i32
    %c0_i32_1 = arith.constant 0 : i32
    return %c0_i32, %c0_i32_0 : i32, i32
  }
  func.func @transform_7(%arg0: i32) -> (i32, i32) {
    %c0_i32 = arith.constant 0 : i32
    %c0_i32_0 = arith.constant 0 : i32
    %c0_i32_1 = arith.constant 0 : i32
    return %c0_i32, %c0_i32_0 : i32, i32
  }
  func.func @transform_8(%arg0: i32) -> (i32, i32) {
    %c0_i32 = arith.constant 0 : i32
    %c0_i32_0 = arith.constant 0 : i32
    %c0_i32_1 = arith.constant 0 : i32
    return %c0_i32, %c0_i32_0 : i32, i32
  }
  func.func @transform_9(%arg0: i32) -> (i32, i32) {
    %c0_i32 = arith.constant 0 : i32
    %c0_i32_0 = arith.constant 0 : i32
    return %c0_i32, %arg0 : i32, i32
  }
}

</mosaic_0001>

<bundles_post_ra>
// kernel: forward.1
= control target key start
LH: loop header
LB: loop body
LE: loop exit
PB: predicated region body
PF: predicated region fallthrough
CT: control target
= control target key end

     0   :  { %14 = vsyncpa [#allocation3], 0  ;;  %s5216_s30 = smov [#allocation2]   ;;  %s6429_s0 = inlined_call_operand.vmem [shape: f32[96,128], index: 0, kind: input, shape index: {}]   ;;  %s6430_s1 = inlined_call_operand.vmem [shape: f32[96,128], index: 1, kind: input, shape index: {}]   ;;  %s6431_s2 = inlined_call_operand.vmem [shape: f32[4,96], index: 2, kind: input, shape index: {}]   ;;  %s6432_s3 = inlined_call_operand.vmem [shape: f32[4,1], index: 3, kind: input, shape index: {}]   ;;  %s6433_s4 = inlined_call_operand.hbm [shape: f32[4,32,32], index: 4, kind: input, shape index: {}]   ;;  %s6434_s5 = inlined_call_operand.vmem [shape: f32[32,32], index: 5, kind: input, shape index: {}]   ;;  %s6435_s6 = inlined_call_operand.vmem [shape: f32[32,32], index: 6, kind: input, shape index: {}]   ;;  %s6436_s7 = inlined_call_operand.vmem [shape: f32[256,32], index: 7, kind: input, shape index: {}]   ;;  %s6437_s8 = inlined_call_operand.vmem [shape: f32[256,32], index: 8, kind: input, shape index: {}]   ;;  %s6438_s9 = inlined_call_operand.vmem [shape: f32[8,128], index: 9, kind: output, shape index: {}]  }
   0x1   :  { %s28_s10 = sshll.u32 %s5216_s30, 4  ;;  %s5192_s13 = scalar_lea.hbm %s6433_s4, 2048  ;;  %s29_s10 = int_to_ptr.vmem [resolvable:$true] %s28_s10 }
   0x2   :  { %p5193_p0 = scmp.ne.s32.totalorder %s6433_s4, %s5192_s13  ;;  %p5196_p1 = scmp.lt.u32.totalorder %s5192_s13, %s6433_s4 }
   0x4   :  { %p5198_p2 = pnand %p5196_p1, %p5193_p0 }
   0x6   :  { %5201 = shalt.err (!%p5198_p2)
}
   0x7   :  { %s5202_s18 = scalar_lea.vmem %s29_s10, 2048  ;;  %p5207_p4 = scmp.lt.s32.totalorder %s29_s10, %s29_s10 }
   0x8   :  { %p5203_p3 = scmp.ne.s32.totalorder %s29_s10, %s5202_s18  ;;  %p5208_p5 = scmp.lt.s32.totalorder %s5202_s18, %s5202_s18 }
   0xa   :  { %p5209_p6 = por %p5208_p5, %p5207_p4 }
   0xc   :  { %p5210_p7 = pnand %p5209_p6, %p5203_p3 }
   0xe   :  { %5213 = shalt.err (!%p5210_p7)
}
   0xf   :  { %s5217_s19 = smov 128   ;;  %s5218_s20 = smov 8  }
  0x10   :  { %34 = dma.hbm_to_vmem [thread:$0]  %s6433_s4, 2048, %s29_s10, [#allocation3], %s5217_s19, %s5217_s19, %s5218_s20  }
  0x11   :  { %5214 = dma.done.wait [#allocation3], 2048  }
  0x12   :  { %5215 = vsyncadd [#allocation3], 4294965248  ;;  %v152_v0 = vlaneseq  ;;  %v5219_v1 = vmov 0.0   ;;  %v5220_v3 = vmov 0   ;;  %v5221_v5 = vmov 1.0   ;;  %v58_v6 = vld [vmem:[%s6430_s1] sm:$0xff] }
  0x13   :  { %145 = vmatprep.mubr.f32.mxu0 %v5219_v1  ;;  %5135 = vset.pattern.permute.xlu0 %v5220_v3  ;;  %v59_v7 = vld [vmem:[%s6430_s1 + $0x8] sm:$0xff]  ;;  %v46_v8 = vld [vmem:[%s6429_s0] sm:$0xff]  ;;  %v60_v11 = vld [vmem:[%s6430_s1 + $0x10] sm:$0xff]  ;;  %vm377_vm1 = vcmask 261120   ;;  %vm77_vm2 = vcmask 785408  }
  0x14   :  { %v5290_v2 = vshrl.u32 %v152_v0, 7  ;;  %v4927_v9 = vpack.c.bf16 %v59_v7, %v58_v6  ;;  %v47_v10 = vld [vmem:[%s6429_s0 + $0x8] sm:$0xff]  ;;  %v61_v12 = vld [vmem:[%s6430_s1 + $0x18] sm:$0xff]  ;;  %v48_v15 = vld [vmem:[%s6429_s0 + $0x10] sm:$0xff] }
  0x15   :  { %v4929_v13 = vpack.c.bf16 %v47_v10, %v46_v8  ;;  %v4931_v14 = vpack.c.bf16 %v61_v12, %v60_v11  ;;  %v49_v16 = vld [vmem:[%s6429_s0 + $0x18] sm:$0xff]  ;;  %v62_v17 = vld [vmem:[%s6430_s1 + $0x20] sm:$0xff]  ;;  %v63_v18 = vld [vmem:[%s6430_s1 + $0x28] sm:$0xff] }
  0x16   :  { %vm157_vm0 = vcmp.eq.s32.totalorder %v5290_v2, 0  ;;  %4928 = vmatprep.subr.bf16.mxu0 %v4927_v9  ;;  %v4933_v19 = vpack.c.bf16 %v49_v16, %v48_v15  ;;  %v4935_v20 = vpack.c.bf16 %v63_v18, %v62_v17  ;;  %v50_v21 = vld [vmem:[%s6429_s0 + $0x20] sm:$0xff]  ;;  %v51_v22 = vld [vmem:[%s6429_s0 + $0x28] sm:$0xff]  ;;  %v64_v23 = vld [vmem:[%s6430_s1 + $0x30] sm:$0xff]  ;;  %v5222_v18 = vmov 683565275  }
  0x17   :  { %v5293_v4 = vsel %vm157_vm0, 1.0, %v5219_v1  ;;  %4583 = vmatprep.subr.msk.mxu1 %vm157_vm0, %v5221_v5  ;;  %4930 = vmatpush1.bf16.msra.mxu0 %v4929_v13  ;;  %v65_v24 = vld [vmem:[%s6430_s1 + $0x38] sm:$0xff]  ;;  %v4937_v25 = vpack.c.bf16 %v51_v22, %v50_v21  ;;  %v52_v26 = vld [vmem:[%s6429_s0 + $0x30] sm:$0xff]  ;;  %v5340_v27 = vld [vmem:[#allocation2] sm:$0xff]  ;;  %v5223_v22 = vmov 2475754826  }
  0x18   :  { %4584 = vmatpush3.msk.msra.mxu1 %vm157_vm0, %v5221_v5  ;;  %4932 = vmatprep.subr.bf16.mxu0 %v4931_v14  ;;  %v5342_v28 = vld [vmem:[#allocation2 + $0x8] sm:$0xff]  ;;  %v4939_v29 = vpack.c.bf16 %v65_v24, %v64_v23  ;;  %v53_v30 = vld [vmem:[%s6429_s0 + $0x38] sm:$0xff]  ;;  %v5349_v31 = vld [vmem:[#allocation2 + $0x10] sm:$0xff]  ;;  %v5224_v24 = vmov 2131351028  }
  0x19   :  { %4585 = vmatprep.mubr.msk.f32.mxu1 %vm377_vm1, %v5340_v27  ;;  %v71_v32 = vld [vmem:[%s6432_s3] sm:$0xf]  ;;  %v67_v34 = vld [vmem:[%s6430_s1 + $0x48] sm:$0xff]  ;;  %v5364_v35 = vld [vmem:[#allocation2 + $0x18] sm:$0xff]  ;;  %v4941_v36 = vpack.c.bf16 %v53_v30, %v52_v26  ;;  %v5225_v26 = vmov 2102212464  }
  0x1a   :  { %v66_v33 = vld [vmem:[%s6430_s1 + $0x40] sm:$0xff]  ;;  %4586 = vmatmul.mubr.msk.f32.vlgmr.msra.gmra.mrb[0].mxu1 %vm377_vm1, %v5342_v28  ;;  %74 = vperm.xlu0 %5135, %v71_v32   ;;  %v55_v39 = vld [vmem:[%s6429_s0 + $0x48] sm:$0xff]  ;;  %v68_v40 = vld [vmem:[%s6430_s1 + $0x50] sm:$0xff]  ;;  %v5226_v30 = vmov 920167782  }
  0x1b   :  { %4934 = vmatpush1.bf16.msra.mxu0 %v4933_v19  ;;  %4588 = vmatprep.mubr.msk.f32.mxu1 %vm377_vm1, %v5349_v31  ;;  %v4943_v37 = vpack.c.bf16 %v67_v34, %v66_v33  ;;  %v54_v38 = vld [vmem:[%s6429_s0 + $0x40] sm:$0xff]  ;;  %v69_v41 = vld [vmem:[%s6430_s1 + $0x58] sm:$0xff]  ;;  %v56_v44 = vld [vmem:[%s6429_s0 + $0x50] sm:$0xff] }
  0x1c   :  { %4936 = vmatprep.subr.bf16.mxu0 %v4935_v20  ;;  %v4945_v42 = vpack.c.bf16 %v55_v39, %v54_v38  ;;  %v4947_v43 = vpack.c.bf16 %v69_v41, %v68_v40  ;;  %v57_v45 = vld [vmem:[%s6429_s0 + $0x58] sm:$0xff]  ;;  %v70_v47 = vld [vmem:[%s6431_s2] sm:$0xf]  ;;  %v5227_v39 = vmov 1326507024  }
  0x1d   :  { %v4949_v46 = vpack.c.bf16 %v57_v45, %v56_v44  ;;  %v5389_v48 = vld [vmem:[#allocation2 + $0x20] sm:$0xff] }
  0x1e   :  { %4589 = vmatmul.mubr.msk.f32.gmra.mrb[2].mxu1 %vm377_vm1, %v5364_v35 }
  0x1f   :  { %4938 = vmatpush1.bf16.msra.mxu0 %v4937_v25  ;;  %4599 = vmatprep.mubr.msk.f32.mxu1 %vm377_vm1, %v5389_v48 }
  0x20   :  { %4940 = vmatprep.subr.bf16.mxu0 %v4939_v29 }
  0x23   :  { %4942 = vmatpush1.bf16.msra.mxu0 %v4941_v36 }
  0x24   :  { %4944 = vmatprep.subr.bf16.mxu0 %v4943_v37 }
  0x27   :  { %4946 = vmatpush1.bf16.msra.mxu0 %v4945_v42 }
  0x28   :  { %4948 = vmatprep.subr.bf16.mxu0 %v4947_v43 }
  0x2b   :  { %4950 = vmatpush1.bf16.msra.mxu0 %v4949_v46 }
  0x2e   :  { %4196 = vmatmul.mubr.msk.f32.vlgmr.msra.gmra.mrb[0].mxu0 %vm77_vm2, %v70_v47 }
  0x99   :  { %v75_v53 = vpop.permute.xlu0 %74 }
  0xed   :  { %v5393_v49 = vpop.f32.mrb[0].mxu1 }
  0xee   :  { %v5395_v50 = vpop.f32.mrb[1].mxu1 }
  0xf1   :  { %v5397_v51 = vpop.f32.mrb[2].mxu1 }
  0xf2   :  { %v5399_v52 = vpop.f32.mrb[3].mxu1 }
 0x101   :  { %v147_v54 = vpop.f32.mrb[0].mxu0 }
 0x102   :  { %v148_v55 = vadd.f32 %v147_v54, %v75_v53  ;;  %v149_v56 = vpop.f32.mrb[1].mxu0 }
 0x103   :  { %v150_v57 = vadd.f32 %v149_v56, %v75_v53 }
 0x104   :  { %v5401_v58 = vmul.f32 0.5, %v148_v55 }
 0x105   :  { %v5403_v59 = vmul.f32 0.5, %v150_v57 }
 0x106   :  { %v166_v60 = vand.u32 2147483647, %v5401_v58  ;;  %v169_v61 = vand.u32 2139095040, %v5401_v58  ;;  %vm168_vm2 = vcmp.lt.s32.totalorder %v5401_v58, 0 }
 0x107   :  { %v966_v62 = vand.u32 2139095040, %v5403_v59  ;;  %v963_v1 = vand.u32 2147483647, %v5403_v59 }
 0x108   :  { %v170_v63 = vshrl.u32 %v169_v61, 23  ;;  %v173_v0 = vand.u32 8388607, %v166_v60 }
 0x109   :  { %v967_v3 = vshrl.u32 %v966_v62, 23  ;;  %v5413_v9 = vand.u32 8388607, %v963_v1 }
 0x10a   :  { %v4197_v5 = vadd.s32 4294967169, %v170_v63  ;;  %v174_v8 = vor.u32 8388608, %v173_v0 }
 0x10b   :  { %v4226_v6 = vadd.s32 4294967169, %v967_v3  ;;  %v971_v16 = vor.u32 8388608, %v5413_v9 }
 0x10c   :  { %v176_v7 = vadd.s32 1, %v4197_v5  ;;  %v5415_v15 = vshll.u32 %v174_v8, 8 }
 0x10d   :  { %v973_v10 = vadd.s32 1, %v4226_v6 }
 0x10e   :  { %vm177_vm3 = vcmp.gt.s32.totalorder %v176_v7, 0 }
 0x10f   :  { %v178_v11 = vsel %vm177_vm3, %v176_v7, 0  ;;  %vm974_vm4 = vcmp.gt.s32.totalorder %v973_v10, 0  ;;  %vm167_vm3 = vcmp.le.f32.partialorder %v166_v60, 0.7853982 }
 0x110   :  { %v179_v12 = vshrl.u32 %v178_v11, 5  ;;  %v180_v13 = vand.u32 31, %v178_v11  ;;  %v975_v14 = vsel %vm974_vm4, %v973_v10, 0  ;;  %vm965_vm4 = vcmp.lt.s32.totalorder %v5403_v59, 0 }
 0x111   :  { %v5419_v20 = vshrl.u32 %v975_v14, 5  ;;  %v977_v21 = vand.u32 31, %v975_v14 }
 0x112   :  { %v181_v17 = vsub.s32 32, %v180_v13  ;;  %v183_v19 = vshll.u32 %v5222_v18, %v180_v13  ;;  %v186_v23 = vshll.u32 %v5223_v22, %v180_v13  ;;  %v189_v25 = vshll.u32 %v5224_v24, %v180_v13 }
 0x113   :  { %v192_v29 = vshll.u32 %v5225_v26, %v180_v13  ;;  %v195_v32 = vshll.u32 %v5226_v30, %v180_v13  ;;  %vm198_vm5 = vcmp.lt.s32.totalorder %v179_v12, 1  ;;  %vm199_vm6 = vcmp.lt.s32.totalorder %v179_v12, 2 }
 0x114   :  { %v184_v33 = vshrl.u32 %v5223_v22, %v181_v17  ;;  %v187_v34 = vshrl.u32 %v5224_v24, %v181_v17  ;;  %v190_v36 = vshrl.u32 %v5225_v26, %v181_v17  ;;  %v182_v37 = vshrl.u32 %v5222_v18, %v181_v17 }
 0x115   :  { %v193_v38 = vshrl.u32 %v5226_v30, %v181_v17  ;;  %v196_v40 = vshrl.u32 %v5227_v39, %v181_v17  ;;  %v978_v44 = vsub.s32 32, %v977_v21  ;;  %vm200_vm7 = vcmp.lt.s32.totalorder %v179_v12, 3 }
 0x116   :  { %v185_v41 = vor.u32 %v184_v33, %v183_v19  ;;  %v188_v42 = vor.u32 %v187_v34, %v186_v23  ;;  %v191_v43 = vor.u32 %v190_v36, %v189_v25  ;;  %vm201_vm8 = vcmp.lt.s32.totalorder %v179_v12, 4 }
 0x117   :  { %v194_v45 = vor.u32 %v193_v38, %v192_v29  ;;  %v197_v46 = vor.u32 %v196_v40, %v195_v32  ;;  %v980_v62 = vshll.u32 %v5222_v18, %v977_v21  ;;  %v981_v3 = vshrl.u32 %v5223_v22, %v978_v44 }
 0x118   :  { %v202_v47 = vsel %vm198_vm5, %v182_v37, %v185_v41  ;;  %v203_v53 = vsel %vm201_vm8, %v191_v43, 2102212464  ;;  %v206_v54 = vsel %vm198_vm5, %v185_v41, %v188_v42  ;;  %v210_v55 = vsel %vm198_vm5, %v188_v42, %v191_v43 }
 0x119   :  { %v204_v56 = vsel %vm200_vm7, %v188_v42, %v203_v53  ;;  %v207_v57 = vsel %vm201_vm8, %v194_v45, 920167782  ;;  %v211_v61 = vsel %vm201_vm8, %v197_v46, 1326507024  ;;  %v983_v5 = vshll.u32 %v5223_v22, %v977_v21 }
 0x11a   :  { %v208_v63 = vsel %vm200_vm7, %v191_v43, %v207_v57  ;;  %v212_v0 = vsel %vm200_vm7, %v194_v45, %v211_v61  ;;  %v205_v6 = vsel %vm199_vm6, %v202_v47, %v204_v56  ;;  %v984_v9 = vshrl.u32 %v5224_v24, %v978_v44 }
 0x11b   :  { %v209_v7 = vsel %vm199_vm6, %v206_v54, %v208_v63  ;;  %v213_v8 = vsel %vm199_vm6, %v210_v55, %v212_v0  ;;  %v982_v17 = vor.u32 %v981_v3, %v980_v62  ;;  %v986_v23 = vshll.u32 %v5224_v24, %v977_v21 }
 0x11c   :  { %v5442_v10 = vmul.u32.u64.low %v5415_v15, %v213_v8  ;;  %v5443_v11 = vmul.u32.u64.high %v5415_v15, %v213_v8, %v5442_v10  ;;  %v5446_v13 = vmul.u32.u64.low %v5415_v15, %v209_v7  ;;  %v5447_v14 = vmul.u32.u64.high %v5415_v15, %v209_v7, %v5446_v13 }
 0x11d   :  { %v985_v19 = vor.u32 %v984_v9, %v983_v5  ;;  %v987_v25 = vshrl.u32 %v5225_v26, %v978_v44  ;;  %v989_v29 = vshll.u32 %v5225_v26, %v977_v21  ;;  %v990_v12 = vshrl.u32 %v5226_v30, %v978_v44 }
 0x11e   :  { %v993_v32 = vshrl.u32 %v5227_v39, %v978_v44  ;;  %v1011_v33 = vshll.u32 %v971_v16, 8  ;;  %v221_v34 = vmul.u32 %v5415_v15, %v205_v6  ;;  %v979_v36 = vshrl.u32 %v5222_v18, %v978_v44 }
 0x11f   :  { %v988_v37 = vor.u32 %v987_v25, %v986_v23  ;;  %v992_v38 = vshll.u32 %v5226_v30, %v977_v21  ;;  %vm223_vm9 = vc.u32 %v5443_v11, %v5446_v13  ;;  %v224_v40 = vadd.s32 1, %v5447_v14 }
 0x120   :  { %v991_v41 = vor.u32 %v990_v12, %v989_v29  ;;  %vm995_vm10 = vcmp.lt.s32.totalorder %v5419_v20, 1  ;;  %vm997_vm11 = vcmp.lt.s32.totalorder %v5419_v20, 3  ;;  %vm998_vm12 = vcmp.lt.s32.totalorder %v5419_v20, 4 }
 0x121   :  { %v994_v42 = vor.u32 %v993_v32, %v992_v38  ;;  %v1003_v16 = vsel %vm995_vm10, %v982_v17, %v985_v19  ;;  %v225_v15 = vsel %vm223_vm9, %v224_v40, %v5447_v14  ;;  %v1000_v43 = vsel %vm998_vm12, %v988_v37, 2102212464 }
 0x122   :  { %v1004_v44 = vsel %vm998_vm12, %v991_v41, 920167782  ;;  %v1007_v45 = vsel %vm995_vm10, %v985_v19, %v988_v37  ;;  %v226_v46 = vadd.s32 %v225_v15, %v221_v34  ;;  %vm996_vm13 = vcmp.lt.s32.totalorder %v5419_v20, 2 }
 0x123   :  { %v1005_v21 = vsel %vm997_vm11, %v988_v37, %v1004_v44  ;;  %v1008_v47 = vsel %vm998_vm12, %v994_v42, 1326507024  ;;  %v999_v53 = vsel %vm995_vm10, %v979_v36, %v982_v17  ;;  %v1001_v54 = vsel %vm997_vm11, %v985_v19, %v1000_v43 }
 0x124   :  { %v1006_v55 = vsel %vm996_vm13, %v1003_v16, %v1005_v21  ;;  %v1009_v56 = vsel %vm997_vm11, %v991_v41, %v1008_v47  ;;  %v227_v57 = vadd.s32 536870912, %v226_v46  ;;  %v1002_v6 = vsel %vm996_vm13, %v999_v53, %v1001_v54 }
 0x125   :  { %v1010_v61 = vsel %vm996_vm13, %v1007_v45, %v1009_v56  ;;  %v5464_v62 = vmul.u32.u64.low %v1011_v33, %v1006_v55  ;;  %v5465_v63 = vmul.u32.u64.high %v1011_v33, %v1006_v55, %v5464_v62  ;;  %v1018_v20 = vmul.u32 %v1011_v33, %v1002_v6 }
 0x126   :  { %v5467_v0 = vmul.u32.u64.low %v1011_v33, %v1010_v61  ;;  %v5468_v3 = vmul.u32.u64.high %v1011_v33, %v1010_v61, %v5467_v0  ;;  %v228_v5 = vshrl.u32 %v227_v57, 30  ;;  %v222_v38 = vadd.s32 %v5446_v13, %v5443_v11 }
 0x127   :  { %v1021_v8 = vadd.s32 1, %v5465_v63  ;;  %vm964_vm5 = vcmp.le.f32.partialorder %v963_v1, 0.7853982  ;;  %vm258_vm12 = vweird.f32 %v5401_v58  ;;  %vm1055_vm13 = vweird.f32 %v5403_v59 }
 0x128   :  { %v229_v7 = vshll.u32 %v228_v5, 30  ;;  %vm1020_vm14 = vc.u32 %v5468_v3, %v5464_v62  ;;  %v1019_v55 = vadd.s32 %v5464_v62, %v5468_v3  ;;  %v252_v13 = vsub.s32 4, %v228_v5 }
 0x129   :  { %v1022_v10 = vsel %vm1020_vm14, %v1021_v8, %v5465_v63 }
 0x12a   :  { %v230_v9 = vsub.s32 %v226_v46, %v229_v7  ;;  %v1023_v14 = vadd.s32 %v1022_v10, %v1018_v20 }
 0x12c   :  { %v232_v17 = vsub.s32 0, %v230_v9  ;;  %v1024_v19 = vadd.s32 536870912, %v1023_v14 }
 0x12e   :  { %v4198_v23 = vmin.u32 %v232_v17, %v230_v9  ;;  %v1025_v25 = vshrl.u32 %v1024_v19, 30 }
 0x130   :  { %v234_v29 = vclz %v4198_v23  ;;  %v1026_v12 = vshll.u32 %v1025_v25, 30  ;;  %v1049_v3 = vsub.s32 4, %v1025_v25 }
 0x132   :  { %v4199_v32 = vadd.s32 4294967294, %v234_v29  ;;  %v1027_v34 = vsub.s32 %v1023_v14, %v1026_v12  ;;  %v1050_v12 = vsel %vm965_vm4, %v1049_v3, %v1025_v25 }
 0x134   :  { %vm4200_vm15 = vcmp.lt.s32.totalorder %v4199_v32, 0  ;;  %v1029_v37 = vsub.s32 0, %v1027_v34 }
 0x135   :  { %v237_v36 = vsel %vm4200_vm15, 0, %v4199_v32 }
 0x136   :  { %v238_v33 = vsub.s32 32, %v237_v36  ;;  %v242_v40 = vsub.s32 4294967266, %v237_v36  ;;  %v4227_v41 = vmin.u32 %v1029_v37, %v1027_v34  ;;  %v239_v42 = vshll.u32 %v230_v9, %v237_v36 }
 0x137   :  { %v253_v9 = vsel %vm168_vm2, %v252_v13, %v228_v5 }
 0x138   :  { %v240_v16 = vshrl.u32 %v222_v38, %v238_v33  ;;  %v243_v15 = vadd.s32 127, %v242_v40  ;;  %v1031_v43 = vclz %v4227_v41  ;;  %v255_v14 = vsel %vm167_vm3, 0, %v253_v9 }
 0x139   :  { %v362_v29 = vadd.s32 3, %v255_v14  ;;  %v259_v60 = vand.u32 3, %v255_v14 }
 0x13a   :  { %v241_v44 = vor.u32 %v240_v16, %v239_v42  ;;  %v244_v45 = vshll.u32 %v243_v15, 23  ;;  %v4228_v46 = vadd.s32 4294967294, %v1031_v43  ;;  %v477_v42 = vsub.s32 0, %v5290_v2 }
 0x13b   :  { %v363_v36 = vand.u32 3, %v362_v29  ;;  %vm260_vm6 = vcmp.lt.s32.totalorder %v259_v60, 2  ;;  %vm261_vm7 = vcmp.eq.s32.totalorder %v259_v60, 0  ;;  %vm264_vm8 = vcmp.eq.s32.totalorder %v259_v60, 2 }
 0x13c   :  { %v245_v21 = vor.u32 4788187, %v244_v45  ;;  %vm4229_vm0 = vcmp.lt.s32.totalorder %v4228_v46, 0  ;;  %v248_v53 = vcvt.s32.f32 %v241_v44 }
 0x13d   :  { %v1034_v54 = vsel %vm4229_vm0, 0, %v4228_v46  ;;  %vm368_vm9 = vcmp.eq.s32.totalorder %v363_v36, 2  ;;  %vm365_vm10 = vcmp.eq.s32.totalorder %v363_v36, 0  ;;  %vm364_vm11 = vcmp.lt.s32.totalorder %v363_v36, 2 }
 0x13e   :  { %v246_v47 = vand.u32 2147483647, %v245_v21  ;;  %v1035_v56 = vsub.s32 32, %v1034_v54  ;;  %v1039_v57 = vsub.s32 4294967266, %v1034_v54  ;;  %v1036_v61 = vshll.u32 %v1027_v34, %v1034_v54 }
 0x13f   :  { %v1052_v34 = vsel %vm964_vm5, 0, %v1050_v12 }
 0x140   :  { %v249_v11 = vmul.f32 %v248_v53, %v246_v47  ;;  %v1037_v63 = vshrl.u32 %v1019_v55, %v1035_v56  ;;  %v1040_v0 = vadd.s32 127, %v1039_v57  ;;  %v1159_v33 = vadd.s32 3, %v1052_v34 }
 0x141   :  { %v1056_v1 = vand.u32 3, %v1052_v34  ;;  %v5487_v47 = vsub.s32 1, %v5290_v2  ;;  %v5494_v55 = vsub.s32 2, %v5290_v2  ;;  %v5497_v56 = vsub.s32 3, %v5290_v2 }
 0x142   :  { %v250_v6 = vxor.u32 2147483648, %v249_v11  ;;  %v1038_v7 = vor.u32 %v1037_v63, %v1036_v61  ;;  %v1041_v8 = vshll.u32 %v1040_v0, 23  ;;  %v1160_v43 = vand.u32 3, %v1159_v33 }
 0x143   :  { %vm1057_vm14 = vcmp.lt.s32.totalorder %v1056_v1, 2  ;;  %vm1058_vm15 = vcmp.eq.s32.totalorder %v1056_v1, 0  ;;  %vm1061_vm0 = vcmp.eq.s32.totalorder %v1056_v1, 2 }
 0x144   :  { %v251_v20 = vsel %vm168_vm2, %v250_v6, %v249_v11  ;;  %v1042_v62 = vor.u32 4788187, %v1041_v8  ;;  %v1045_v19 = vcvt.s32.f32 %v1038_v7  ;;  %vm1161_vm2 = vcmp.lt.s32.totalorder %v1160_v43, 2 }
 0x145   :  { %v254_v10 = vsel %vm167_vm3, %v5401_v58, %v251_v20  ;;  %vm1162_vm3 = vcmp.eq.s32.totalorder %v1160_v43, 0 }
 0x146   :  { %5136 = vcosq.f32 %v254_v10  ;;  %v1043_v17 = vand.u32 2147483647, %v1042_v62 }
 0x147   :  { %5138 = vsinq.f32 %v254_v10 }
 0x148   :  { %v1046_v23 = vmul.f32 %v1045_v19, %v1043_v17 }
 0x14a   :  { %v1047_v32 = vxor.u32 2147483648, %v1046_v23 }
 0x14c   :  { %v1048_v5 = vsel %vm965_vm4, %v1047_v32, %v1046_v23  ;;  %vm1165_vm4 = vcmp.eq.s32.totalorder %v1160_v43, 2 }
 0x14d   :  { %v1051_v37 = vsel %vm964_vm5, %v5403_v59, %v1048_v5 }
 0x14e   :  { %5140 = vcosq.f32 %v1051_v37 }
 0x14f   :  { %5142 = vsinq.f32 %v1051_v37 }
 0x150   :  { %v5137_v38 = vpop.eup %5136 }
 0x151   :  { %v5139_v40 = vpop.eup %5138  ;;  %v265_v41 = vxor.u32 2147483648, %v5137_v38 }
 0x152   :  { %v262_v25 = vxor.u32 2147483648, %v5139_v40 }
 0x153   :  { %v266_v16 = vsel %vm264_vm8, %v265_v41, %v5139_v40  ;;  %v370_v15 = vsel %vm368_vm9, %v265_v41, %v5139_v40 }
 0x154   :  { %v263_v44 = vsel %vm261_vm7, %v5137_v38, %v262_v25  ;;  %v367_v45 = vsel %vm365_vm10, %v5137_v38, %v262_v25 }
 0x155   :  { %v267_v46 = vsel %vm260_vm6, %v263_v44, %v266_v16  ;;  %v371_v21 = vsel %vm364_vm11, %v367_v45, %v370_v15 }
 0x156   :  { %v5489_v53 = vsel %vm258_vm12, nan, %v267_v46  ;;  %v5491_v54 = vsel %vm258_vm12, nan, %v371_v21 }
 0x157   :  { %v478_v58 = vrot.slane %v5489_v53, %v477_v42  ;;  %v486_v57 = vrot.slane %v5491_v54, %v477_v42  ;;  %v600_v62 = vrot.slane %v5489_v53, %v5487_v47 }
 0x158   :  { %v5141_v11 = vpop.eup %5140 }
 0x159   :  { %v480_v13 = vmul.f32 0.0, %v478_v58  ;;  %v488_v61 = vmul.f32 %v5393_v49, %v486_v57  ;;  %v479_v63 = vmul.f32 %v478_v58, %v5293_v4  ;;  %v487_v2 = vmul.f32 %v486_v57, %v5395_v50  ;;  %v5143_v0 = vpop.eup %5142 }
 0x15a   :  { %v1062_v6 = vxor.u32 2147483648, %v5141_v11  ;;  %v490_v7 = vmul.f32 %v5397_v51, %v486_v57  ;;  %v489_v8 = vmul.f32 %v486_v57, %v5399_v52  ;;  %v1059_v20 = vxor.u32 2147483648, %v5143_v0 }
 0x15b   :  { %v492_v9 = vadd.f32 %v488_v61, %v480_v13  ;;  %v491_v10 = vadd.f32 %v487_v2, %v479_v63  ;;  %v5555_v61 = vld [vmem:[#allocation2 + $0x28] sm:$0xff]  ;;  %v5579_v2 = vld [vmem:[#allocation2 + $0x40] sm:$0xff] }
 0x15c   :  { %v1063_v3 = vsel %vm1061_vm0, %v1062_v6, %v5143_v0  ;;  %v1167_v14 = vsel %vm1165_vm4, %v1062_v6, %v5143_v0  ;;  %v494_v17 = vadd.f32 %v490_v7, %v480_v13  ;;  %v493_v19 = vadd.f32 %v489_v8, %v480_v13 }
 0x15d   :  { %v1060_v23 = vsel %vm1058_vm15, %v5141_v11, %v1059_v20  ;;  %v1164_v29 = vsel %vm1162_vm3, %v5141_v11, %v1059_v20  ;;  %v4951_v12 = vpack.c.bf16 %v492_v9, %v491_v10  ;;  %v602_v32 = vmul.f32 %v600_v62, %v492_v9 }
 0x15e   :  { %v1064_v60 = vsel %vm1057_vm14, %v1060_v23, %v1063_v3  ;;  %v1168_v5 = vsel %vm1161_vm2, %v1164_v29, %v1167_v14  ;;  %v4955_v34 = vpack.c.bf16 %v494_v17, %v493_v19  ;;  %v601_v36 = vmul.f32 %v600_v62, %v491_v10 }
 0x15f   :  { %v1065_v37 = vsel %vm1055_vm13, nan, %v1064_v60  ;;  %v1169_v38 = vsel %vm1055_vm13, nan, %v1168_v5  ;;  %4952 = vmatprep.subr.bf16.mxu1 %v4951_v12  ;;  %v604_v33 = vmul.f32 %v600_v62, %v494_v17  ;;  %v603_v40 = vmul.f32 %v600_v62, %v493_v19 }
 0x160   :  { %v5518_v41 = vrot.slane %v1065_v37, %v477_v42  ;;  %v5520_v25 = vrot.slane %v1169_v38, %v477_v42  ;;  %4954 = vmatpush3.bf16.msra.mxu1 %v4951_v12  ;;  %v5523_v1 = vrot.slane %v1065_v37, %v5487_v47  ;;  %v5526_v16 = vrot.slane %v1169_v38, %v5487_v47 }
 0x161   :  { %4956 = vmatprep.subr.bf16.mxu1 %v4955_v34  ;;  %v5529_v15 = vrot.slane %v1065_v37, %v5494_v55  ;;  %v5532_v59 = vrot.slane %v1169_v38, %v5494_v55  ;;  %v5535_v43 = vrot.slane %v1065_v37, %v5497_v56  ;;  %v5538_v42 = vrot.slane %v1169_v38, %v5497_v56  ;;  %v5589_v38 = vld [vmem:[#allocation2 + $0x50] sm:$0xff] }
 0x162   :  { %v2096_v44 = vmul.f32 0.0, %v5518_v41  ;;  %v2100_v45 = vmul.f32 %v5393_v49, %v5520_v25  ;;  %v2095_v46 = vmul.f32 %v5518_v41, %v5293_v4  ;;  %v2099_v21 = vmul.f32 %v5520_v25, %v5395_v50  ;;  %v5561_v4 = vld [vmem:[#allocation2 + $0x30] sm:$0xff] }
 0x163   :  { %v2102_v58 = vmul.f32 %v5397_v51, %v5520_v25  ;;  %v2101_v57 = vmul.f32 %v5520_v25, %v5399_v52  ;;  %v5575_v52 = vld [vmem:[#allocation2 + $0x38] sm:$0xff]  ;;  %v608_v0 = vrot.slane %v5491_v54, %v5487_v47  ;;  %v722_v10 = vrot.slane %v5489_v53, %v5494_v55 }
 0x164   :  { %v5551_v11 = vadd.f32 %v2100_v45, %v2096_v44  ;;  %v5553_v13 = vadd.f32 %v2099_v21, %v2095_v46  ;;  %4958 = vmatpush3.bf16.msra.mxu1 %v4955_v34 }
 0x165   :  { %v5557_v49 = vadd.f32 %v2102_v58, %v2096_v44  ;;  %v5559_v63 = vadd.f32 %v2101_v57, %v2096_v44  ;;  %v844_v57 = vrot.slane %v5489_v53, %v5497_v56  ;;  %v5609_v53 = vld [vmem:[#allocation2 + $0x70] sm:$0xff] }
 0x166   :  { %v5565_v50 = vpack.c.bf16 %v5551_v11, %v5553_v13 }
 0x167   :  { %4600 = vmatmul.mubr.msk.f32.vlgmr.msra.gmra.mrb[4].mxu1 %vm377_vm1, %v5555_v61  ;;  %v5571_v51 = vpack.c.bf16 %v5557_v49, %v5559_v63 }
 0x168   :  { %4602 = vmatprep.mubr.msk.f32.mxu1 %vm377_vm1, %v5561_v4 }
 0x16b   :  { %4603 = vmatmul.mubr.msk.f32.gmra.mrb[6].mxu1 %vm377_vm1, %v5575_v52 }
 0x16c   :  { %4613 = vmatprep.mubr.msk.f32.mxu1 %vm377_vm1, %v5579_v2 }
 0x23a   :  { %v4601_v6 = vpop.f32.mrb[4].mxu1 }
 0x23b   :  { %v610_v7 = vmul.f32 %v4601_v6, %v608_v0  ;;  %v578_v8 = vpop.f32.mrb[5].mxu1 }
 0x23c   :  { %v609_v20 = vmul.f32 %v608_v0, %v578_v8 }
 0x23d   :  { %v614_v9 = vadd.f32 %v610_v7, %v602_v32  ;;  %v5587_v32 = vld [vmem:[#allocation2 + $0x48] sm:$0xff] }
 0x23e   :  { %v613_v62 = vadd.f32 %v609_v20, %v601_v36  ;;  %v4604_v3 = vpop.f32.mrb[6].mxu1  ;;  %v5595_v36 = vld [vmem:[#allocation2 + $0x58] sm:$0xff] }
 0x23f   :  { %v612_v14 = vmul.f32 %v4604_v3, %v608_v0  ;;  %v588_v17 = vpop.f32.mrb[7].mxu1  ;;  %v724_v19 = vmul.f32 %v722_v10, %v614_v9 }
 0x240   :  { %v611_v23 = vmul.f32 %v608_v0, %v588_v17  ;;  %v4959_v29 = vpack.c.bf16 %v614_v9, %v613_v62  ;;  %v723_v12 = vmul.f32 %v722_v10, %v613_v62 }
 0x241   :  { %v616_v60 = vadd.f32 %v612_v14, %v604_v33  ;;  %v5599_v33 = vld [vmem:[#allocation2 + $0x60] sm:$0xff] }
 0x242   :  { %v615_v5 = vadd.f32 %v611_v23, %v603_v40  ;;  %4960 = vmatprep.subr.bf16.mxu1 %v4959_v29  ;;  %v730_v40 = vrot.slane %v5491_v54, %v5494_v55 }
 0x243   :  { %4962 = vmatpush3.bf16.msra.mxu1 %v4959_v29  ;;  %v726_v47 = vmul.f32 %v722_v10, %v616_v60  ;;  %v5615_v29 = vld [vmem:[#allocation2 + $0x78] sm:$0xff] }
 0x244   :  { %v4963_v34 = vpack.c.bf16 %v616_v60, %v615_v5  ;;  %v725_v37 = vmul.f32 %v722_v10, %v615_v5  ;;  %v852_v60 = vrot.slane %v5491_v54, %v5497_v56  ;;  %v862_v54 = vld [vmem:[%s6434_s5 + $0x8] sm:$0xff]  ;;  %v863_v56 = vld [vmem:[%s6434_s5 + $0x10] sm:$0xff] }
 0x246   :  { %4964 = vmatprep.subr.bf16.mxu1 %v4963_v34 }
 0x247   :  { %4966 = vmatpush3.bf16.msra.mxu1 %v4963_v34 }
 0x24a   :  { %4614 = vmatmul.mubr.msk.f32.vlgmr.msra.gmra.mrb[8].mxu1 %vm377_vm1, %v5587_v32 }
 0x24b   :  { %4616 = vmatprep.mubr.msk.f32.mxu1 %vm377_vm1, %v5589_v38 }
 0x24e   :  { %4617 = vmatmul.mubr.msk.f32.gmra.mrb[10].mxu1 %vm377_vm1, %v5595_v36 }
 0x24f   :  { %4627 = vmatprep.mubr.msk.f32.mxu1 %vm377_vm1, %v5599_v33 }
 0x31d   :  { %v4615_v44 = vpop.f32.mrb[8].mxu1 }
 0x31e   :  { %v732_v45 = vmul.f32 %v4615_v44, %v730_v40  ;;  %v700_v46 = vpop.f32.mrb[9].mxu1 }
 0x31f   :  { %v731_v21 = vmul.f32 %v730_v40, %v700_v46 }
 0x320   :  { %v736_v58 = vadd.f32 %v732_v45, %v724_v19  ;;  %v5607_v19 = vld [vmem:[#allocation2 + $0x68] sm:$0xff] }
 0x321   :  { %v735_v0 = vadd.f32 %v731_v21, %v723_v12  ;;  %v4618_v6 = vpop.f32.mrb[10].mxu1  ;;  %v861_v12 = vld [vmem:[%s6434_s5] sm:$0xff] }
 0x322   :  { %v734_v7 = vmul.f32 %v4618_v6, %v730_v40  ;;  %v710_v8 = vpop.f32.mrb[11].mxu1  ;;  %v846_v20 = vmul.f32 %v844_v57, %v736_v58  ;;  %4641 = vmatprep.mubr.msk.f32.mxu0 %vm377_vm1, %v861_v12 }
 0x323   :  { %v733_v9 = vmul.f32 %v730_v40, %v710_v8  ;;  %v4967_v10 = vpack.c.bf16 %v736_v58, %v735_v0  ;;  %v845_v62 = vmul.f32 %v844_v57, %v735_v0 }
 0x324   :  { %v738_v3 = vadd.f32 %v734_v7, %v726_v47  ;;  %v864_v7 = vld [vmem:[%s6434_s5 + $0x18] sm:$0xff] }
 0x325   :  { %v737_v14 = vadd.f32 %v733_v9, %v725_v37  ;;  %4968 = vmatprep.subr.bf16.mxu1 %v4967_v10 }
 0x326   :  { %4970 = vmatpush3.bf16.msra.mxu1 %v4967_v10  ;;  %v848_v55 = vmul.f32 %v844_v57, %v738_v3 }
 0x327   :  { %v4971_v17 = vpack.c.bf16 %v738_v3, %v737_v14  ;;  %v847_v23 = vmul.f32 %v844_v57, %v737_v14 }
 0x329   :  { %4972 = vmatprep.subr.bf16.mxu1 %v4971_v17 }
 0x32a   :  { %4974 = vmatpush3.bf16.msra.mxu1 %v4971_v17 }
 0x32d   :  { %4628 = vmatmul.mubr.msk.f32.vlgmr.msra.gmra.mrb[12].mxu1 %vm377_vm1, %v5607_v19 }
 0x32e   :  { %4630 = vmatprep.mubr.msk.f32.mxu1 %vm377_vm1, %v5609_v53 }
 0x331   :  { %4631 = vmatmul.mubr.msk.f32.gmra.mrb[14].mxu1 %vm377_vm1, %v5615_v29 }
 0x332   :  { %4655 = vmatprep.mubr.msk.f32.mxu1 %vm377_vm1, %v5340_v27 }
 0x400   :  { %v4629_v5 = vpop.f32.mrb[12].mxu1 }
 0x401   :  { %v854_v47 = vmul.f32 %v4629_v5, %v852_v60  ;;  %v822_v34 = vpop.f32.mrb[13].mxu1 }
 0x402   :  { %v853_v37 = vmul.f32 %v852_v60, %v822_v34 }
 0x403   :  { %v858_v40 = vadd.f32 %v854_v47, %v846_v20 }
 0x404   :  { %v857_v44 = vadd.f32 %v853_v37, %v845_v62  ;;  %v4632_v45 = vpop.f32.mrb[14].mxu1 }
 0x405   :  { %v856_v46 = vmul.f32 %v4632_v45, %v852_v60  ;;  %v832_v21 = vpop.f32.mrb[15].mxu1 }
 0x406   :  { %v855_v58 = vmul.f32 %v852_v60, %v832_v21  ;;  %v4975_v27 = vpack.c.bf16 %v858_v40, %v857_v44 }
 0x407   :  { %v860_v57 = vadd.f32 %v856_v46, %v848_v55 }
 0x408   :  { %v859_v0 = vadd.f32 %v855_v58, %v847_v23  ;;  %4976 = vmatprep.subr.bf16.mxu0 %v4975_v27 }
 0x409   :  { %4978 = vmatpush3.bf16.msra.mxu0 %v4975_v27 }
 0x40a   :  { %v4979_v6 = vpack.c.bf16 %v860_v57, %v859_v0 }
 0x40c   :  { %4980 = vmatprep.subr.bf16.mxu0 %v4979_v6 }
 0x40d   :  { %4982 = vmatpush3.bf16.msra.mxu0 %v4979_v6 }
 0x410   :  { %4642 = vmatmul.mubr.msk.f32.vlgmr.msra.gmra.mrb[2].mxu0 %vm377_vm1, %v862_v54 }
 0x411   :  { %4644 = vmatprep.mubr.msk.f32.mxu0 %vm377_vm1, %v863_v56 }
 0x414   :  { %4645 = vmatmul.mubr.msk.f32.gmra.mrb[4].mxu0 %vm377_vm1, %v864_v7 }
 0x415   :  { %4669 = vmatprep.mubr.msk.f32.mxu0 %vm377_vm1, %v5389_v48 }
 0x4e3   :  { %v4643_v8 = vpop.f32.mrb[2].mxu0 }
 0x4e4   :  { %v943_v20 = vpop.f32.mrb[3].mxu0  ;;  %v1260_v14 = vmul.f32 %v4643_v8, %v5518_v41 }
 0x4e5   :  { %v4983_v9 = vpack.c.bf16 %v4643_v8, %v943_v20  ;;  %v1259_v23 = vmul.f32 %v5518_v41, %v943_v20 }
 0x4e7   :  { %v4646_v10 = vpop.f32.mrb[4].mxu0  ;;  %4984 = vmatprep.subr.bf16.mxu1 %v4983_v9 }
 0x4e8   :  { %v953_v62 = vpop.f32.mrb[5].mxu0  ;;  %4986 = vmatpush3.bf16.msra.mxu1 %v4983_v9 }
 0x4e9   :  { %v4987_v3 = vpack.c.bf16 %v4646_v10, %v953_v62  ;;  %v1261_v34 = vmul.f32 %v5518_v41, %v953_v62 }
 0x4eb   :  { %4988 = vmatprep.subr.bf16.mxu1 %v4987_v3 }
 0x4ec   :  { %4990 = vmatpush3.bf16.msra.mxu1 %v4987_v3 }
 0x4ef   :  { %4656 = vmatmul.mubr.msk.f32.vlgmr.msra.gmra.mrb[16].mxu1 %vm377_vm1, %v5342_v28 }
 0x4f0   :  { %4658 = vmatprep.mubr.msk.f32.mxu1 %vm377_vm1, %v5349_v31  ;;  %v1262_v31 = vmul.f32 %v4646_v10, %v5518_v41 }
 0x4f3   :  { %4659 = vmatmul.mubr.msk.f32.gmra.mrb[18].mxu1 %vm377_vm1, %v5364_v35 }
 0x4f4   :  { %4683 = vmatprep.mubr.msk.f32.mxu1 %vm377_vm1, %v5579_v2 }
 0x5c2   :  { %v4657_v48 = vpop.f32.mrb[16].mxu1 }
 0x5c3   :  { %v1268_v55 = vmul.f32 %v4657_v48, %v5520_v25  ;;  %v1236_v17 = vpop.f32.mrb[17].mxu1 }
 0x5c4   :  { %v1267_v12 = vmul.f32 %v5520_v25, %v1236_v17 }
 0x5c5   :  { %v1272_v28 = vadd.f32 %v1268_v55, %v1260_v14 }
 0x5c6   :  { %v1271_v60 = vadd.f32 %v1267_v12, %v1259_v23  ;;  %v4660_v5 = vpop.f32.mrb[18].mxu1 }
 0x5c7   :  { %v1270_v35 = vmul.f32 %v4660_v5, %v5520_v25  ;;  %v1246_v47 = vpop.f32.mrb[19].mxu1 }
 0x5c8   :  { %v1269_v37 = vmul.f32 %v5520_v25, %v1246_v47  ;;  %v4991_v40 = vpack.c.bf16 %v1272_v28, %v1271_v60  ;;  %v1365_v25 = vmul.f32 %v5523_v1, %v1272_v28  ;;  %v1364_v27 = vmul.f32 %v5523_v1, %v1271_v60 }
 0x5c9   :  { %v1274_v44 = vadd.f32 %v1270_v35, %v1262_v31 }
 0x5ca   :  { %v1273_v45 = vadd.f32 %v1269_v37, %v1261_v34  ;;  %4992 = vmatprep.subr.bf16.mxu0 %v4991_v40 }
 0x5cb   :  { %4994 = vmatpush3.bf16.msra.mxu0 %v4991_v40  ;;  %v1367_v56 = vmul.f32 %v5523_v1, %v1274_v44 }
 0x5cc   :  { %v4995_v46 = vpack.c.bf16 %v1274_v44, %v1273_v45  ;;  %v1366_v20 = vmul.f32 %v5523_v1, %v1273_v45 }
 0x5ce   :  { %4996 = vmatprep.subr.bf16.mxu0 %v4995_v46 }
 0x5cf   :  { %4998 = vmatpush3.bf16.msra.mxu0 %v4995_v46 }
 0x5d2   :  { %4670 = vmatmul.mubr.msk.f32.vlgmr.msra.gmra.mrb[6].mxu0 %vm377_vm1, %v5555_v61 }
 0x5d3   :  { %4672 = vmatprep.mubr.msk.f32.mxu0 %vm377_vm1, %v5561_v4 }
 0x5d6   :  { %4673 = vmatmul.mubr.msk.f32.gmra.mrb[8].mxu0 %vm377_vm1, %v5575_v52 }
 0x5d7   :  { %4697 = vmatprep.mubr.msk.f32.mxu0 %vm377_vm1, %v5599_v33 }
 0x6a5   :  { %v4671_v41 = vpop.f32.mrb[6].mxu0 }
 0x6a6   :  { %v1373_v21 = vmul.f32 %v4671_v41, %v5526_v16  ;;  %v1341_v58 = vpop.f32.mrb[7].mxu0 }
 0x6a7   :  { %v1372_v57 = vmul.f32 %v5526_v16, %v1341_v58 }
 0x6a8   :  { %v1377_v0 = vadd.f32 %v1373_v21, %v1365_v25  ;;  %v1590_v25 = vld [vmem:[%s6436_s7] sm:$0xff]  ;;  %v1604_v21 = vld [vmem:[%s6436_s7 + $0x70] sm:$0xff] }
 0x6a9   :  { %v1376_v6 = vadd.f32 %v1372_v57, %v1364_v27  ;;  %v4674_v54 = vpop.f32.mrb[8].mxu0 }
 0x6aa   :  { %v1375_v7 = vmul.f32 %v4674_v54, %v5526_v16  ;;  %v1351_v8 = vpop.f32.mrb[9].mxu0  ;;  %v1470_v55 = vmul.f32 %v5529_v15, %v1377_v0 }
 0x6ab   :  { %v1374_v9 = vmul.f32 %v5526_v16, %v1351_v8  ;;  %v4999_v10 = vpack.c.bf16 %v1377_v0, %v1376_v6  ;;  %v1469_v12 = vmul.f32 %v5529_v15, %v1376_v6 }
 0x6ac   :  { %v1379_v62 = vadd.f32 %v1375_v7, %v1367_v56 }
 0x6ad   :  { %v1378_v3 = vadd.f32 %v1374_v9, %v1366_v20  ;;  %5000 = vmatprep.subr.bf16.mxu1 %v4999_v10 }
 0x6ae   :  { %5002 = vmatpush3.bf16.msra.mxu1 %v4999_v10  ;;  %v1472_v35 = vmul.f32 %v5529_v15, %v1379_v62 }
 0x6af   :  { %v5003_v48 = vpack.c.bf16 %v1379_v62, %v1378_v3  ;;  %v1471_v37 = vmul.f32 %v5529_v15, %v1378_v3 }
 0x6b1   :  { %5004 = vmatprep.subr.bf16.mxu1 %v5003_v48 }
 0x6b2   :  { %5006 = vmatpush3.bf16.msra.mxu1 %v5003_v48 }
 0x6b5   :  { %4684 = vmatmul.mubr.msk.f32.vlgmr.msra.gmra.mrb[20].mxu1 %vm377_vm1, %v5587_v32 }
 0x6b6   :  { %4686 = vmatprep.mubr.msk.f32.mxu1 %vm377_vm1, %v5589_v38 }
 0x6b9   :  { %4687 = vmatmul.mubr.msk.f32.gmra.mrb[22].mxu1 %vm377_vm1, %v5595_v36 }
 0x6ba   :  { %4732 = vmatprep.mubr.msk.f32.mxu1 %vm377_vm1, %v1604_v21  ;;  %v1615_v21 = vld [vmem:[%s6436_s7 + $0xc8] sm:$0xff] }
 0x788   :  { %v4685_v14 = vpop.f32.mrb[20].mxu1 }
 0x789   :  { %v1478_v17 = vmul.f32 %v4685_v14, %v5532_v59  ;;  %v1446_v23 = vpop.f32.mrb[21].mxu1  ;;  %v1591_v14 = vld [vmem:[%s6436_s7 + $0x8] sm:$0xff] }
 0x78a   :  { %v1477_v28 = vmul.f32 %v5532_v59, %v1446_v23  ;;  %v1606_v23 = vld [vmem:[%s6436_s7 + $0x80] sm:$0xff] }
 0x78b   :  { %v1482_v60 = vadd.f32 %v1478_v17, %v1470_v55  ;;  %v1605_v55 = vld [vmem:[%s6436_s7 + $0x78] sm:$0xff]  ;;  %v1592_v17 = vld [vmem:[%s6436_s7 + $0x10] sm:$0xff] }
 0x78c   :  { %v1481_v5 = vadd.f32 %v1477_v28, %v1469_v12  ;;  %v4688_v31 = vpop.f32.mrb[22].mxu1  ;;  %v1593_v12 = vld [vmem:[%s6436_s7 + $0x18] sm:$0xff]  ;;  %v1607_v28 = vld [vmem:[%s6436_s7 + $0x88] sm:$0xff] }
 0x78d   :  { %v1480_v47 = vmul.f32 %v4688_v31, %v5532_v59  ;;  %v1456_v34 = vpop.f32.mrb[23].mxu1  ;;  %v1609_v31 = vld [vmem:[%s6436_s7 + $0x98] sm:$0xff] }
 0x78e   :  { %v1479_v40 = vmul.f32 %v5532_v59, %v1456_v34  ;;  %v5007_v44 = vpack.c.bf16 %v1482_v60, %v1481_v5  ;;  %v1611_v34 = vld [vmem:[%s6436_s7 + $0xa8] sm:$0xff] }
 0x78f   :  { %v1484_v45 = vadd.f32 %v1480_v47, %v1472_v35  ;;  %v1596_v35 = vld [vmem:[%s6436_s7 + $0x30] sm:$0xff]  ;;  %v1597_v47 = vld [vmem:[%s6436_s7 + $0x38] sm:$0xff] }
 0x790   :  { %v1483_v46 = vadd.f32 %v1479_v40, %v1471_v37  ;;  %5008 = vmatprep.subr.bf16.mxu0 %v5007_v44  ;;  %v1598_v37 = vld [vmem:[%s6436_s7 + $0x40] sm:$0xff]  ;;  %v1612_v40 = vld [vmem:[%s6436_s7 + $0xb0] sm:$0xff] }
 0x791   :  { %5010 = vmatpush3.bf16.msra.mxu0 %v5007_v44  ;;  %v1577_v56 = vmul.f32 %v5535_v43, %v1484_v45  ;;  %v1599_v44 = vld [vmem:[%s6436_s7 + $0x48] sm:$0xff] }
 0x792   :  { %v5011_v41 = vpack.c.bf16 %v1484_v45, %v1483_v46  ;;  %v1576_v20 = vmul.f32 %v5535_v43, %v1483_v46  ;;  %v1613_v45 = vld [vmem:[%s6436_s7 + $0xb8] sm:$0xff]  ;;  %v1600_v46 = vld [vmem:[%s6436_s7 + $0x50] sm:$0xff] }
 0x794   :  { %5012 = vmatprep.subr.bf16.mxu0 %v5011_v41 }
 0x795   :  { %5014 = vmatpush3.bf16.msra.mxu0 %v5011_v41  ;;  %v1614_v41 = vld [vmem:[%s6436_s7 + $0xc0] sm:$0xff] }
 0x798   :  { %4698 = vmatmul.mubr.msk.f32.vlgmr.msra.gmra.mrb[10].mxu0 %vm377_vm1, %v5607_v19  ;;  %v1575_v19 = vmul.f32 %v5535_v43, %v1482_v60  ;;  %v1594_v60 = vld [vmem:[%s6436_s7 + $0x20] sm:$0xff] }
 0x799   :  { %4700 = vmatprep.mubr.msk.f32.mxu0 %vm377_vm1, %v5609_v53 }
 0x79c   :  { %4701 = vmatmul.mubr.msk.f32.gmra.mrb[12].mxu0 %vm377_vm1, %v5615_v29  ;;  %v1574_v29 = vmul.f32 %v5535_v43, %v1481_v5  ;;  %v1595_v5 = vld [vmem:[%s6436_s7 + $0x28] sm:$0xff] }
 0x79d   :  { %4711 = vmatprep.mubr.msk.f32.mxu0 %vm377_vm1, %v1590_v25  ;;  %v1601_v25 = vld [vmem:[%s6436_s7 + $0x58] sm:$0xff] }
 0x86b   :  { %v4699_v58 = vpop.f32.mrb[10].mxu0 }
 0x86c   :  { %v1583_v53 = vmul.f32 %v4699_v58, %v5538_v42  ;;  %v1551_v27 = vpop.f32.mrb[11].mxu0  ;;  %v1602_v58 = vld [vmem:[%s6436_s7 + $0x60] sm:$0xff] }
 0x86d   :  { %v1582_v57 = vmul.f32 %v5538_v42, %v1551_v27  ;;  %v1617_v27 = vld [vmem:[%s6436_s7 + $0xd8] sm:$0xff] }
 0x86e   :  { %v5705_v0 = vadd.f32 %v1583_v53, %v1575_v19  ;;  %v1616_v19 = vld [vmem:[%s6436_s7 + $0xd0] sm:$0xff]  ;;  %v1603_v53 = vld [vmem:[%s6436_s7 + $0x68] sm:$0xff] }
 0x86f   :  { %v5707_v6 = vadd.f32 %v1582_v57, %v1574_v29  ;;  %v4702_v54 = vpop.f32.mrb[12].mxu0  ;;  %v1618_v29 = vld [vmem:[%s6436_s7 + $0xe0] sm:$0xff] }
 0x870   :  { %v1585_v7 = vmul.f32 %v4702_v54, %v5538_v42  ;;  %v1561_v8 = vpop.f32.mrb[13].mxu0  ;;  %v5833_v57 = vld [vmem:[#allocation2 + $0x20] sm:$0xff]  ;;  %v1619_v54 = vld [vmem:[%s6436_s7 + $0xe8] sm:$0xff] }
 0x871   :  { %v1584_v9 = vmul.f32 %v5538_v42, %v1561_v8  ;;  %v5015_v10 = vpack.c.bf16 %v5705_v0, %v5707_v6 }
 0x872   :  { %v5715_v62 = vadd.f32 %v1585_v7, %v1577_v56  ;;  %v1620_v56 = vld [vmem:[%s6436_s7 + $0xf0] sm:$0xff]  ;;  %v1621_v7 = vld [vmem:[%s6436_s7 + $0xf8] sm:$0xff] }
 0x873   :  { %v5717_v3 = vadd.f32 %v1584_v9, %v1576_v20  ;;  %5016 = vmatprep.subr.bf16.mxu0 %v5015_v10  ;;  %5095 = vmatprep.subr.bf16.mxu1 %v5015_v10 }
 0x874   :  { %5018 = vmatpush3.bf16.msra.mxu0 %v5015_v10  ;;  %5097 = vmatpush3.bf16.msra.mxu1 %v5015_v10 }
 0x875   :  { %v5019_v48 = vpack.c.bf16 %v5715_v62, %v5717_v3 }
 0x877   :  { %5020 = vmatprep.subr.bf16.mxu0 %v5019_v48  ;;  %5096 = vmatprep.subr.bf16.mxu1 %v5019_v48 }
 0x878   :  { %5022 = vmatpush3.bf16.msra.mxu0 %v5019_v48  ;;  %5098 = vmatpush3.bf16.msra.mxu1 %v5019_v48 }
 0x879   :  { %5024 = vmatprep.subr.bf16.mxu0 %v5565_v50 }
 0x87b   :  { %4712 = vmatmul.mubr.msk.f32.vlgmr.msra.gmra.mrb[14].mxu0 %vm377_vm1, %v1591_v14  ;;  %4733 = vmatmul.mubr.msk.f32.vlgmr.msra.gmra.mrb[24].mxu1 %vm377_vm1, %v1605_v55 }
 0x87c   :  { %5026 = vmatpush3.bf16.msra.mxu0 %v5565_v50  ;;  %4714 = vmatprep.mubr.msk.f32.mxu0 %vm377_vm1, %v1592_v17  ;;  %v1608_v50 = vld [vmem:[%s6436_s7 + $0x90] sm:$0xff] }
 0x87d   :  { %5028 = vmatprep.subr.bf16.mxu0 %v5571_v51  ;;  %4735 = vmatprep.mubr.msk.f32.mxu1 %vm377_vm1, %v1606_v23 }
 0x87f   :  { %4715 = vmatmul.mubr.msk.f32.gmra.mrb[16].mxu0 %vm377_vm1, %v1593_v12  ;;  %4736 = vmatmul.mubr.msk.f32.gmra.mrb[26].mxu1 %vm377_vm1, %v1607_v28 }
 0x880   :  { %5030 = vmatpush3.bf16.msra.mxu0 %v5571_v51  ;;  %4717 = vmatprep.mubr.msk.f32.mxu0 %vm377_vm1, %v1594_v60  ;;  %v1610_v51 = vld [vmem:[%s6436_s7 + $0xa0] sm:$0xff] }
 0x881   :  { %4738 = vmatprep.mubr.msk.f32.mxu1 %vm377_vm1, %v1608_v50 }
 0x883   :  { %4718 = vmatmul.mubr.msk.f32.gmra.mrb[18].mxu0 %vm377_vm1, %v1595_v5  ;;  %4739 = vmatmul.mubr.msk.f32.gmra.mrb[28].mxu1 %vm377_vm1, %v1609_v31 }
 0x884   :  { %4720 = vmatprep.mubr.msk.f32.mxu0 %vm377_vm1, %v1596_v35  ;;  %4741 = vmatprep.mubr.msk.f32.mxu1 %vm377_vm1, %v1610_v51 }
 0x887   :  { %4721 = vmatmul.mubr.msk.f32.gmra.mrb[20].mxu0 %vm377_vm1, %v1597_v47  ;;  %4742 = vmatmul.mubr.msk.f32.gmra.mrb[30].mxu1 %vm377_vm1, %v1611_v34 }
 0x888   :  { %4723 = vmatprep.mubr.msk.f32.mxu0 %vm377_vm1, %v1598_v37  ;;  %4744 = vmatprep.mubr.msk.f32.mxu1 %vm377_vm1, %v1612_v40 }
 0x88b   :  { %4724 = vmatmul.mubr.msk.f32.gmra.mrb[22].mxu0 %vm377_vm1, %v1599_v44  ;;  %4745 = vmatmul.mubr.msk.f32.gmra.mrb[32].mxu1 %vm377_vm1, %v1613_v45 }
 0x88c   :  { %4726 = vmatprep.mubr.msk.f32.mxu0 %vm377_vm1, %v1600_v46  ;;  %4747 = vmatprep.mubr.msk.f32.mxu1 %vm377_vm1, %v1614_v41 }
 0x88f   :  { %4727 = vmatmul.mubr.msk.f32.gmra.mrb[24].mxu0 %vm377_vm1, %v1601_v25  ;;  %4748 = vmatmul.mubr.msk.f32.gmra.mrb[34].mxu1 %vm377_vm1, %v1615_v21 }
 0x890   :  { %4729 = vmatprep.mubr.msk.f32.mxu0 %vm377_vm1, %v1602_v58  ;;  %4750 = vmatprep.mubr.msk.f32.mxu1 %vm377_vm1, %v1616_v19 }
 0x893   :  { %4730 = vmatmul.mubr.msk.f32.gmra.mrb[26].mxu0 %vm377_vm1, %v1603_v53  ;;  %4751 = vmatmul.mubr.msk.f32.gmra.mrb[36].mxu1 %vm377_vm1, %v1617_v27 }
 0x894   :  { %4753 = vmatprep.mubr.msk.f32.mxu1 %vm377_vm1, %v1618_v29  ;;  %4767 = vmatprep.mubr.msk.f32.mxu0 %vm377_vm1, %v5833_v57 }
 0x897   :  { %4754 = vmatmul.mubr.msk.f32.gmra.mrb[38].mxu1 %vm377_vm1, %v1619_v54  ;;  %4768 = vmatmul.mubr.msk.f32.vlgmr.msra.gmra.mrb[28].mxu0 %vm377_vm1, %v5555_v61 }
 0x898   :  { %4756 = vmatprep.mubr.msk.f32.mxu1 %vm377_vm1, %v1620_v56  ;;  %4770 = vmatprep.mubr.msk.f32.mxu0 %vm377_vm1, %v5561_v4 }
 0x89b   :  { %4757 = vmatmul.mubr.msk.f32.gmra.mrb[40].mxu1 %vm377_vm1, %v1621_v7  ;;  %4771 = vmatmul.mubr.msk.f32.gmra.mrb[30].mxu0 %vm377_vm1, %v5575_v52 }
 0x89c   :  { %4781 = vmatprep.mubr.msk.f32.mxu0 %vm377_vm1, %v5579_v2 }
 0x94e   :  { %v4713_v8 = vpop.f32.mrb[14].mxu0  ;;  %v5857_v20 = vpop.f32.mrb[24].mxu1 }
 0x94f   :  { %v1944_v61 = vmul.f32 %v4713_v8, %v5705_v0  ;;  %v1784_v9 = vpop.f32.mrb[15].mxu0  ;;  %v5860_v10 = vpop.f32.mrb[25].mxu1 }
 0x950   :  { %v1943_v4 = vmul.f32 %v1784_v9, %v5707_v6 }
 0x952   :  { %v1947_v48 = vadd.f32 %v1944_v61, %v1943_v4  ;;  %v4716_v14 = vpop.f32.mrb[16].mxu0  ;;  %v4737_v55 = vpop.f32.mrb[26].mxu1 }
 0x953   :  { %v1996_v17 = vmul.f32 %v4737_v55, %v5705_v0  ;;  %v1794_v23 = vpop.f32.mrb[17].mxu0  ;;  %v1864_v52 = vpop.f32.mrb[27].mxu1  ;;  %v1946_v28 = vmul.f32 %v4716_v14, %v5715_v62 }
 0x954   :  { %v1945_v12 = vmul.f32 %v1794_v23, %v5717_v3  ;;  %v1995_v2 = vmul.f32 %v1864_v52, %v5707_v6 }
 0x956   :  { %v1948_v60 = vadd.f32 %v1947_v48, %v1945_v12  ;;  %v1999_v50 = vadd.f32 %v1996_v17, %v1995_v2  ;;  %v4719_v5 = vpop.f32.mrb[18].mxu0  ;;  %v4740_v31 = vpop.f32.mrb[28].mxu1 }
 0x957   :  { %v1957_v35 = vmul.f32 %v4719_v5, %v5705_v0  ;;  %v1804_v51 = vpop.f32.mrb[19].mxu0  ;;  %v1874_v47 = vpop.f32.mrb[29].mxu1  ;;  %v1998_v45 = vmul.f32 %v4740_v31, %v5715_v62  ;;  %v5882_v5 = vmul.f32 %v5553_v13, %v5523_v1 }
 0x958   :  { %v1949_v34 = vadd.f32 %v1948_v60, %v1946_v28  ;;  %v1956_v37 = vmul.f32 %v1804_v51, %v5707_v6  ;;  %v1997_v40 = vmul.f32 %v1874_v47, %v5717_v3 }
 0x95a   :  { %v1950_v44 = vrot.slane %v1949_v34, 4  ;;  %v1960_v46 = vadd.f32 %v1957_v35, %v1956_v37  ;;  %v2000_v41 = vadd.f32 %v1999_v50, %v1997_v40  ;;  %v4722_v25 = vpop.f32.mrb[20].mxu0  ;;  %v4743_v21 = vpop.f32.mrb[30].mxu1  ;;  %v2193_v50 = vmul.f32 %v5551_v11, %v5523_v1 }
 0x95b   :  { %v2009_v58 = vmul.f32 %v4743_v21, %v5705_v0  ;;  %v1814_v19 = vpop.f32.mrb[21].mxu0  ;;  %v1884_v53 = vpop.f32.mrb[31].mxu1  ;;  %v1959_v7 = vmul.f32 %v4722_v25, %v5715_v62  ;;  %v5888_v11 = vmul.f32 %v5557_v49, %v5523_v1 }
 0x95c   :  { %v1951_v27 = vadd.f32 %v1950_v44, %v1949_v34  ;;  %v2001_v29 = vadd.f32 %v2000_v41, %v1998_v45  ;;  %v1958_v54 = vmul.f32 %v1814_v19, %v5717_v3  ;;  %v2008_v56 = vmul.f32 %v1884_v53, %v5707_v6 }
 0x95d   :  { %v1985_v19 = vmul.f32 %v5857_v20, %v5715_v62 }
 0x95e   :  { %v1952_v8 = vrot.slane %v1951_v27, 2  ;;  %v2002_v61 = vrot.slane %v2001_v29, 4  ;;  %v1961_v9 = vadd.f32 %v1960_v46, %v1958_v54  ;;  %v2012_v4 = vadd.f32 %v2009_v58, %v2008_v56  ;;  %v4725_v48 = vpop.f32.mrb[22].mxu0  ;;  %v4746_v14 = vpop.f32.mrb[32].mxu1 }
 0x95f   :  { %v1970_v55 = vmul.f32 %v4725_v48, %v5705_v0  ;;  %v1824_v17 = vpop.f32.mrb[23].mxu0  ;;  %v1894_v23 = vpop.f32.mrb[33].mxu1  ;;  %v2011_v40 = vmul.f32 %v4746_v14, %v5715_v62  ;;  %v5893_v58 = vmul.f32 %v5559_v63, %v5523_v1 }
 0x960   :  { %v1953_v52 = vadd.f32 %v1952_v8, %v1951_v27  ;;  %v2003_v12 = vadd.f32 %v2002_v61, %v2001_v29  ;;  %v1962_v2 = vadd.f32 %v1961_v9, %v1959_v7  ;;  %v1969_v28 = vmul.f32 %v1824_v17, %v5707_v6 }
 0x961   :  { %v2010_v60 = vmul.f32 %v1894_v23, %v5717_v3  ;;  %v1984_v9 = vmul.f32 %v5860_v10, %v5717_v3 }
 0x962   :  { %v1954_v31 = vrot.slane %v1953_v52, 1  ;;  %v2004_v35 = vrot.slane %v2003_v12, 2  ;;  %v1963_v51 = vrot.slane %v1962_v2, 4  ;;  %v1973_v47 = vadd.f32 %v1970_v55, %v1969_v28  ;;  %v4728_v34 = vpop.f32.mrb[24].mxu0  ;;  %v4749_v37 = vpop.f32.mrb[34].mxu1 }
 0x963   :  { %v2013_v44 = vadd.f32 %v2012_v4, %v2010_v60  ;;  %v2022_v45 = vmul.f32 %v4749_v37, %v5705_v0  ;;  %v1834_v46 = vpop.f32.mrb[25].mxu0  ;;  %v1904_v41 = vpop.f32.mrb[35].mxu1  ;;  %v1972_v49 = vmul.f32 %v4728_v34, %v5715_v62 }
 0x964   :  { %v2005_v25 = vadd.f32 %v2004_v35, %v2003_v12  ;;  %v1964_v13 = vadd.f32 %v1963_v51, %v1962_v2  ;;  %v1971_v21 = vmul.f32 %v1834_v46, %v5717_v3  ;;  %v1955_v53 = vadd.f32 %v1954_v31, %v1953_v52 }
 0x965   :  { %v2014_v27 = vadd.f32 %v2013_v44, %v2011_v40  ;;  %v2021_v29 = vmul.f32 %v1904_v41, %v5707_v6 }
 0x966   :  { %v2006_v54 = vrot.slane %v2005_v25, 1  ;;  %v1965_v56 = vrot.slane %v1964_v13, 2  ;;  %v1974_v7 = vadd.f32 %v1973_v47, %v1971_v21  ;;  %v4731_v8 = vpop.f32.mrb[26].mxu0  ;;  %v4752_v61 = vpop.f32.mrb[36].mxu1  ;;  %v2047_v52 = vmul.f32 %v1955_v53, %v1955_v53 }
 0x967   :  { %v2015_v4 = vrot.slane %v2014_v27, 4  ;;  %v2025_v1 = vadd.f32 %v2022_v45, %v2021_v29  ;;  %v1983_v63 = vmul.f32 %v4731_v8, %v5705_v0  ;;  %v1844_v48 = vpop.f32.mrb[27].mxu0  ;;  %v1914_v20 = vpop.f32.mrb[37].mxu1  ;;  %v2024_v2 = vmul.f32 %v4752_v61, %v5715_v62 }
 0x968   :  { %v2007_v14 = vadd.f32 %v2006_v54, %v2005_v25  ;;  %v1966_v55 = vadd.f32 %v1965_v56, %v1964_v13  ;;  %v1975_v17 = vadd.f32 %v1974_v7, %v1972_v49  ;;  %v1982_v23 = vmul.f32 %v1844_v48, %v5707_v6 }
 0x969   :  { %v2016_v12 = vadd.f32 %v2015_v4, %v2014_v27  ;;  %v2023_v28 = vmul.f32 %v1914_v20, %v5717_v3 }
 0x96a   :  { %v2048_v60 = vmul.f32 %v2007_v14, %v2007_v14  ;;  %v1967_v31 = vrot.slane %v1966_v55, 1  ;;  %v1976_v10 = vrot.slane %v1975_v17, 4  ;;  %v1986_v35 = vadd.f32 %v1983_v63, %v1982_v23  ;;  %v4755_v51 = vpop.f32.mrb[38].mxu1  ;;  %v4769_v47 = vpop.f32.mrb[28].mxu0 }
 0x96b   :  { %v2017_v34 = vrot.slane %v2016_v12, 2  ;;  %v2026_v37 = vadd.f32 %v2025_v1, %v2023_v28  ;;  %v2035_v40 = vmul.f32 %v4755_v51, %v5705_v0  ;;  %v2197_v44 = vmul.f32 %v4769_v47, %v5526_v16  ;;  %v1924_v45 = vpop.f32.mrb[39].mxu1  ;;  %v2173_v46 = vpop.f32.mrb[29].mxu0 }
 0x96c   :  { %v5907_v41 = vadd.f32 %v2048_v60, %v2047_v52  ;;  %v1968_v25 = vadd.f32 %v1967_v31, %v1966_v55  ;;  %v1977_v13 = vadd.f32 %v1976_v10, %v1975_v17  ;;  %v1987_v21 = vadd.f32 %v1986_v35, %v1984_v9 }
 0x96d   :  { %v2018_v53 = vadd.f32 %v2017_v34, %v2016_v12  ;;  %v2027_v27 = vadd.f32 %v2026_v37, %v2024_v2  ;;  %v5909_v29 = vadd.f32 %v2197_v44, %v2193_v50  ;;  %v2034_v54 = vmul.f32 %v1924_v45, %v5707_v6 }
 0x96e   :  { %5144 = vrsqrt.f32 %v5907_v41  ;;  %v2059_v56 = vmul.f32 %v1968_v25, %v1968_v25  ;;  %v1978_v49 = vrot.slane %v1977_v13, 2  ;;  %v1988_v0 = vadd.f32 %v1987_v21, %v1985_v19  ;;  %v4758_v7 = vpop.f32.mrb[40].mxu1  ;;  %v4772_v8 = vpop.f32.mrb[30].mxu0 }
 0x96f   :  { %v2019_v61 = vrot.slane %v2018_v53, 1  ;;  %v2028_v4 = vrot.slane %v2027_v27, 4  ;;  %v2038_v1 = vadd.f32 %v2035_v40, %v2034_v54  ;;  %v2196_v63 = vmul.f32 %v2173_v46, %v5526_v16  ;;  %v1934_v48 = vpop.f32.mrb[41].mxu1  ;;  %v2183_v9 = vpop.f32.mrb[31].mxu0 }
 0x970   :  { %v1979_v20 = vadd.f32 %v1978_v49, %v1977_v13  ;;  %v1989_v14 = vrot.slane %v1988_v0, 4  ;;  %v2037_v50 = vmul.f32 %v4758_v7, %v5715_v62  ;;  %v2199_v6 = vmul.f32 %v4772_v8, %v5526_v16 }
 0x971   :  { %v2020_v55 = vadd.f32 %v2019_v61, %v2018_v53  ;;  %v2029_v17 = vadd.f32 %v2028_v4, %v2027_v27  ;;  %v5917_v23 = vadd.f32 %v2196_v63, %v5882_v5  ;;  %v2036_v19 = vmul.f32 %v1934_v48, %v5717_v3 }
 0x972   :  { %v1980_v52 = vrot.slane %v1979_v20, 1  ;;  %v1990_v12 = vadd.f32 %v1989_v14, %v1988_v0  ;;  %v5921_v2 = vadd.f32 %v2199_v6, %v5888_v11  ;;  %v2198_v28 = vmul.f32 %v2183_v9, %v5526_v16 }
 0x973   :  { %v2060_v60 = vmul.f32 %v2020_v55, %v2020_v55  ;;  %v2030_v31 = vrot.slane %v2029_v17, 2  ;;  %v2039_v10 = vadd.f32 %v2038_v1, %v2036_v19  ;;  %v5031_v62 = vpack.c.bf16 %v5909_v29, %v5917_v23 }
 0x974   :  { %v1991_v35 = vrot.slane %v1990_v12, 2  ;;  %v5927_v51 = vadd.f32 %v2198_v28, %v5893_v58  ;;  %v1981_v34 = vadd.f32 %v1980_v52, %v1979_v20  ;;  %vm2052_vm5 = vcmp.eq.f32.partialorder %v5907_v41, inf }
 0x975   :  { %v5929_v5 = vadd.f32 %v2060_v60, %v2059_v56  ;;  %v2031_v3 = vadd.f32 %v2030_v31, %v2029_v17  ;;  %v2040_v47 = vadd.f32 %v2039_v10, %v2037_v50  ;;  %5032 = vmatprep.subr.bf16.mxu0 %v5031_v62  ;;  %v2055_v21 = vand.u32 2147483648, %v5907_v41 }
 0x976   :  { %v1992_v11 = vadd.f32 %v1991_v35, %v1990_v12  ;;  %5034 = vmatpush3.bf16.msra.mxu0 %v5031_v62  ;;  %v5035_v16 = vpack.c.bf16 %v5921_v2, %v5927_v51  ;;  %v2071_v25 = vmul.f32 %v1981_v34, %v1981_v34  ;;  %vm2054_vm6 = vcmp.eq.f32.partialorder %v5907_v41, 0.0 }
 0x977   :  { %v2032_v37 = vrot.slane %v2031_v3, 1  ;;  %v2041_v40 = vrot.slane %v2040_v47, 4 }
 0x978   :  { %v5145_v44 = vpop.eup %5144  ;;  %5036 = vmatprep.subr.bf16.mxu0 %v5035_v16  ;;  %v1993_v13 = vrot.slane %v1992_v11, 1 }
 0x979   :  { %v2033_v45 = vadd.f32 %v2032_v37, %v2031_v3  ;;  %v2042_v46 = vadd.f32 %v2041_v40, %v2040_v47  ;;  %v2051_v58 = vmul.f32 %v5145_v44, %v5907_v41 }
 0x97a   :  { %5038 = vmatpush3.bf16.msra.mxu0 %v5035_v16  ;;  %v1994_v7 = vadd.f32 %v1993_v13, %v1992_v11 }
 0x97b   :  { %v2072_v53 = vmul.f32 %v2033_v45, %v2033_v45  ;;  %v2043_v27 = vrot.slane %v2042_v46, 2  ;;  %v2053_v54 = vsel %vm2052_vm5, %v5907_v41, %v2051_v58 }
 0x97c   :  { %v2056_v56 = vsel %vm2054_vm6, %v2055_v21, %v2053_v54  ;;  %v2083_v41 = vmul.f32 %v1994_v7, %v1994_v7 }
 0x97d   :  { %v5938_v49 = vadd.f32 %v2072_v53, %v2071_v25  ;;  %v2044_v0 = vadd.f32 %v2043_v27, %v2042_v46  ;;  %4782 = vmatmul.mubr.msk.f32.vlgmr.msra.gmra.mrb[32].mxu0 %vm377_vm1, %v5587_v32  ;;  %5146 = vtanh.f32 %v2056_v56 }
 0x97e   :  { %4784 = vmatprep.mubr.msk.f32.mxu0 %vm377_vm1, %v5589_v38 }
 0x97f   :  { %v2045_v8 = vrot.slane %v2044_v0, 1 }
 0x981   :  { %v2046_v61 = vadd.f32 %v2045_v8, %v2044_v0  ;;  %4785 = vmatmul.mubr.msk.f32.gmra.mrb[34].mxu0 %vm377_vm1, %v5595_v36 }
 0x982   :  { %4795 = vmatprep.mubr.msk.f32.mxu0 %vm377_vm1, %v5599_v33 }
 0x983   :  { %v2084_v4 = vmul.f32 %v2046_v61, %v2046_v61 }
 0x985   :  { %v5948_v1 = vadd.f32 %v2084_v4, %v2083_v41 }
 0x987   :  { %v5147_v63 = vpop.eup %5146 }
 0x988   :  { %v2058_v48 = vmul.f32 3.1415927, %v5147_v63 }
 0x98a   :  { %v5950_v32 = vmul.f32 0.5, %v2058_v48 }
 0x98c   :  { %v2503_v9 = vand.u32 2139095040, %v5950_v32  ;;  %v2500_v50 = vand.u32 2147483647, %v5950_v32  ;;  %vm2502_vm14 = vcmp.lt.s32.totalorder %v5950_v32, 0 }
 0x98e   :  { %v2504_v38 = vshrl.u32 %v2503_v9, 23  ;;  %v2507_v33 = vand.u32 8388607, %v2500_v50  ;;  %vm2501_vm15 = vcmp.le.f32.partialorder %v2500_v50, 0.7853982 }
 0x990   :  { %v4298_v20 = vadd.s32 4294967169, %v2504_v38  ;;  %v2508_v47 = vor.u32 8388608, %v2507_v33 }
 0x992   :  { %v2510_v14 = vadd.s32 1, %v4298_v20  ;;  %v2548_v27 = vshll.u32 %v2508_v47, 8 }
 0x994   :  { %vm2511_vm7 = vcmp.gt.s32.totalorder %v2510_v14, 0 }
 0x995   :  { %v2512_v36 = vsel %vm2511_vm7, %v2510_v14, 0  ;;  %vm2592_vm7 = vweird.f32 %v5950_v32 }
 0x996   :  { %v2514_v6 = vand.u32 31, %v2512_v36  ;;  %v2513_v17 = vshrl.u32 %v2512_v36, 5 }
 0x998   :  { %v2515_v55 = vsub.s32 32, %v2514_v6  ;;  %v2517_v19 = vshll.u32 %v5222_v18, %v2514_v6  ;;  %v2520_v52 = vshll.u32 %v5223_v22, %v2514_v6  ;;  %v2523_v60 = vshll.u32 %v5224_v24, %v2514_v6 }
 0x999   :  { %v2526_v10 = vshll.u32 %v5225_v26, %v2514_v6  ;;  %v2529_v35 = vshll.u32 %v5226_v30, %v2514_v6  ;;  %vm2532_vm8 = vcmp.lt.s32.totalorder %v2513_v17, 1  ;;  %vm2535_vm9 = vcmp.lt.s32.totalorder %v2513_v17, 4 }
 0x99a   :  { %v2518_v12 = vshrl.u32 %v5223_v22, %v2515_v55  ;;  %v2521_v28 = vshrl.u32 %v5224_v24, %v2515_v55  ;;  %v2524_v31 = vshrl.u32 %v5225_v26, %v2515_v55  ;;  %v2527_v62 = vshrl.u32 %v5226_v30, %v2515_v55 }
 0x99b   :  { %v2530_v3 = vshrl.u32 %v5227_v39, %v2515_v55  ;;  %v2516_v58 = vshrl.u32 %v5222_v18, %v2515_v55  ;;  %vm2534_vm10 = vcmp.lt.s32.totalorder %v2513_v17, 3  ;;  %vm2533_vm11 = vcmp.lt.s32.totalorder %v2513_v17, 2 }
 0x99c   :  { %v2519_v34 = vor.u32 %v2518_v12, %v2517_v19  ;;  %v2522_v11 = vor.u32 %v2521_v28, %v2520_v52  ;;  %v2525_v16 = vor.u32 %v2524_v31, %v2523_v60  ;;  %v2528_v37 = vor.u32 %v2527_v62, %v2526_v10 }
 0x99d   :  { %v2531_v40 = vor.u32 %v2530_v3, %v2529_v35 }
 0x99e   :  { %v2537_v44 = vsel %vm2535_vm9, %v2525_v16, 2102212464  ;;  %v2540_v45 = vsel %vm2532_vm8, %v2519_v34, %v2522_v11  ;;  %v2544_v46 = vsel %vm2532_vm8, %v2522_v11, %v2525_v16  ;;  %v2541_v25 = vsel %vm2535_vm9, %v2528_v37, 920167782 }
 0x99f   :  { %v2545_v13 = vsel %vm2535_vm9, %v2531_v40, 1326507024  ;;  %v2542_v21 = vsel %vm2534_vm10, %v2525_v16, %v2541_v25  ;;  %v2536_v54 = vsel %vm2532_vm8, %v2516_v58, %v2519_v34  ;;  %v2538_v56 = vsel %vm2534_vm10, %v2522_v11, %v2537_v44 }
 0x9a0   :  { %v2546_v53 = vsel %vm2534_vm10, %v2528_v37, %v2545_v13  ;;  %v2543_v0 = vsel %vm2533_vm11, %v2540_v45, %v2542_v21  ;;  %v2539_v63 = vsel %vm2533_vm11, %v2536_v54, %v2538_v56  ;;  %vm2064_vm8 = vcmp.eq.f32.partialorder %v5929_v5, inf }
 0x9a1   :  { %v2547_v7 = vsel %vm2533_vm11, %v2544_v46, %v2546_v53  ;;  %v5970_v41 = vmul.u32.u64.low %v2548_v27, %v2543_v0  ;;  %v5971_v4 = vmul.u32.u64.high %v2548_v27, %v2543_v0, %v5970_v41  ;;  %v2555_v9 = vmul.u32 %v2548_v27, %v2539_v63 }
 0x9a2   :  { %v5967_v8 = vmul.u32.u64.low %v2548_v27, %v2547_v7  ;;  %v5968_v61 = vmul.u32.u64.high %v2548_v27, %v2547_v7, %v5967_v8  ;;  %vm2066_vm9 = vcmp.eq.f32.partialorder %v5929_v5, 0.0 }
 0x9a3   :  { %v2558_v48 = vadd.s32 1, %v5971_v4 }
 0x9a4   :  { %vm2557_vm12 = vc.u32 %v5968_v61, %v5970_v41  ;;  %v2556_v28 = vadd.s32 %v5970_v41, %v5968_v61 }
 0x9a5   :  { %v2559_v38 = vsel %vm2557_vm12, %v2558_v48, %v5971_v4 }
 0x9a6   :  { %v2560_v20 = vadd.s32 %v2559_v38, %v2555_v9  ;;  %v2290_v38 = vmul.f32 %v5909_v29, %v5529_v15  ;;  %v2291_v29 = vmul.f32 %v5927_v51, %v5529_v15 }
 0x9a8   :  { %v2561_v14 = vadd.s32 536870912, %v2560_v20 }
 0x9aa   :  { %v2562_v36 = vshrl.u32 %v2561_v14, 30 }
 0x9ac   :  { %v2563_v6 = vshll.u32 %v2562_v36, 30  ;;  %v2586_v40 = vsub.s32 4, %v2562_v36 }
 0x9ae   :  { %v2564_v33 = vsub.s32 %v2560_v20, %v2563_v6  ;;  %v2587_v46 = vsel %vm2502_vm14, %v2586_v40, %v2562_v36  ;;  %v2289_v36 = vmul.f32 %v5917_v23, %v5529_v15 }
 0x9af   :  { %v2589_v25 = vsel %vm2501_vm15, 0, %v2587_v46 }
 0x9b0   :  { %v2566_v55 = vsub.s32 0, %v2564_v33  ;;  %v2696_v13 = vadd.s32 3, %v2589_v25  ;;  %v2593_v21 = vand.u32 3, %v2589_v25 }
 0x9b2   :  { %v4299_v17 = vmin.u32 %v2566_v55, %v2564_v33  ;;  %v2697_v53 = vand.u32 3, %v2696_v13  ;;  %vm2598_vm0 = vcmp.eq.s32.totalorder %v2593_v21, 2  ;;  %vm2595_vm3 = vcmp.eq.s32.totalorder %v2593_v21, 0 }
 0x9b3   :  { %vm2594_vm5 = vcmp.lt.s32.totalorder %v2593_v21, 2 }
 0x9b4   :  { %v2568_v19 = vclz %v4299_v17  ;;  %vm2702_vm2 = vcmp.eq.s32.totalorder %v2697_v53, 2  ;;  %vm2699_vm4 = vcmp.eq.s32.totalorder %v2697_v53, 0  ;;  %vm2698_vm6 = vcmp.lt.s32.totalorder %v2697_v53, 2 }
 0x9b5   :  { %v2292_v17 = vmul.f32 %v5921_v2, %v5529_v15  ;;  %v6002_v2 = vld [vmem:[#allocation2 + $0x70] sm:$0xff]  ;;  %v6006_v15 = vld [vmem:[#allocation2 + $0x78] sm:$0xff] }
 0x9b6   :  { %v4300_v52 = vadd.s32 4294967294, %v2568_v19 }
 0x9b8   :  { %vm4301_vm13 = vcmp.lt.s32.totalorder %v4300_v52, 0 }
 0x9b9   :  { %v2571_v12 = vsel %vm4301_vm13, 0, %v4300_v52 }
 0x9ba   :  { %v2572_v60 = vsub.s32 32, %v2571_v12  ;;  %v2576_v31 = vsub.s32 4294967266, %v2571_v12  ;;  %v2573_v10 = vshll.u32 %v2564_v33, %v2571_v12 }
 0x9bc   :  { %v2574_v62 = vshrl.u32 %v2556_v28, %v2572_v60  ;;  %v2577_v35 = vadd.s32 127, %v2576_v31 }
 0x9be   :  { %v2575_v3 = vor.u32 %v2574_v62, %v2573_v10  ;;  %v2578_v47 = vshll.u32 %v2577_v35, 23  ;;  %v5998_v10 = vld [vmem:[#allocation2 + $0x68] sm:$0xff] }
 0x9c0   :  { %v2579_v34 = vor.u32 4788187, %v2578_v47  ;;  %v2582_v16 = vcvt.s32.f32 %v2575_v3 }
 0x9c2   :  { %v2580_v11 = vand.u32 2147483647, %v2579_v34 }
 0x9c4   :  { %v2583_v37 = vmul.f32 %v2582_v16, %v2580_v11 }
 0x9c6   :  { %v2584_v44 = vxor.u32 2147483648, %v2583_v37 }
 0x9c8   :  { %v2585_v45 = vsel %vm2502_vm14, %v2584_v44, %v2583_v37 }
 0x9c9   :  { %v2588_v58 = vsel %vm2501_vm15, %v5950_v32, %v2585_v45 }
 0x9ca   :  { %5148 = vcosq.f32 %v2588_v58 }
 0x9cb   :  { %5150 = vsinq.f32 %v2588_v58 }
 0x9cc   :  { %5152 = vrsqrt.f32 %v5929_v5 }
 0x9d4   :  { %v5149_v27 = vpop.eup %5148 }
 0x9d5   :  { %v5151_v54 = vpop.eup %5150  ;;  %v2599_v56 = vxor.u32 2147483648, %v5149_v27 }
 0x9d6   :  { %v2596_v0 = vxor.u32 2147483648, %v5151_v54 }
 0x9d7   :  { %v2600_v7 = vsel %vm2598_vm0, %v2599_v56, %v5151_v54  ;;  %v2704_v50 = vsel %vm2702_vm2, %v2599_v56, %v5151_v54  ;;  %v2400_v54 = vld [vmem:[%s6435_s6 + $0x10] sm:$0xff] }
 0x9d8   :  { %v2597_v8 = vsel %vm2595_vm3, %v5149_v27, %v2596_v0  ;;  %v2701_v61 = vsel %vm2699_vm4, %v5149_v27, %v2596_v0  ;;  %v2399_v27 = vld [vmem:[%s6435_s6 + $0x8] sm:$0xff] }
 0x9d9   :  { %v2601_v41 = vsel %vm2594_vm5, %v2597_v8, %v2600_v7  ;;  %v2705_v4 = vsel %vm2698_vm6, %v2701_v61, %v2704_v50 }
 0x9da   :  { %v5982_v63 = vsel %vm2592_vm7, nan, %v2601_v41  ;;  %v5984_v48 = vsel %vm2592_vm7, nan, %v2705_v4 }
 0xa50   :  { %v4783_v9 = vpop.f32.mrb[32].mxu0 }
 0xa51   :  { %v2294_v20 = vmul.f32 %v4783_v9, %v5532_v59  ;;  %v2270_v14 = vpop.f32.mrb[33].mxu0 }
 0xa52   :  { %v2293_v6 = vmul.f32 %v2270_v14, %v5532_v59  ;;  %v5182_v14 = vld [vmem:[#allocation2 + $0x10] sm:$0xff] }
 0xa53   :  { %v2298_v33 = vadd.f32 %v2294_v20, %v2290_v38  ;;  %v5181_v20 = vld [vmem:[#allocation2 + $0x8] sm:$0xff] }
 0xa54   :  { %v2297_v32 = vadd.f32 %v2293_v6, %v2289_v36  ;;  %v4786_v55 = vpop.f32.mrb[34].mxu0  ;;  %v5183_v36 = vld [vmem:[#allocation2 + $0x18] sm:$0xff] }
 0xa55   :  { %v2296_v19 = vmul.f32 %v4786_v55, %v5532_v59  ;;  %v2280_v52 = vpop.f32.mrb[35].mxu0  ;;  %v2387_v62 = vmul.f32 %v2298_v33, %v5535_v43 }
 0xa56   :  { %v2295_v12 = vmul.f32 %v2280_v52, %v5532_v59  ;;  %v5039_v28 = vpack.c.bf16 %v2298_v33, %v2297_v32  ;;  %v2398_v59 = vld [vmem:[%s6435_s6] sm:$0xff]  ;;  %v2386_v47 = vmul.f32 %v2297_v32, %v5535_v43 }
 0xa57   :  { %v2300_v60 = vadd.f32 %v2296_v19, %v2292_v17 }
 0xa58   :  { %v2299_v31 = vadd.f32 %v2295_v12, %v2291_v29  ;;  %5040 = vmatprep.subr.bf16.mxu0 %v5039_v28 }
 0xa59   :  { %5042 = vmatpush3.bf16.msra.mxu0 %v5039_v28  ;;  %v2389_v40 = vmul.f32 %v2300_v60, %v5535_v43 }
 0xa5a   :  { %v5043_v23 = vpack.c.bf16 %v2300_v60, %v2299_v31  ;;  %v2388_v46 = vmul.f32 %v2299_v31, %v5535_v43  ;;  %v2401_v43 = vld [vmem:[%s6435_s6 + $0x18] sm:$0xff] }
 0xa5c   :  { %5044 = vmatprep.subr.bf16.mxu0 %v5043_v23 }
 0xa5d   :  { %5046 = vmatpush3.bf16.msra.mxu0 %v5043_v23  ;;  %v5184_v23 = vld [vmem:[#allocation2 + $0x28] sm:$0xff] }
 0xa60   :  { %4796 = vmatmul.mubr.msk.f32.vlgmr.msra.gmra.mrb[36].mxu0 %vm377_vm1, %v5998_v10 }
 0xa61   :  { %4798 = vmatprep.mubr.msk.f32.mxu0 %vm377_vm1, %v6002_v2 }
 0xa64   :  { %4799 = vmatmul.mubr.msk.f32.gmra.mrb[38].mxu0 %vm377_vm1, %v6006_v15 }
 0xa65   :  { %4809 = vmatprep.mubr.msk.f32.mxu0 %vm377_vm1, %v2398_v59  ;;  %v5185_v59 = vld [vmem:[#allocation2 + $0x30] sm:$0xff] }
 0xb33   :  { %v4797_v51 = vpop.f32.mrb[36].mxu0 }
 0xb34   :  { %v2391_v35 = vmul.f32 %v4797_v51, %v5538_v42  ;;  %v2367_v3 = vpop.f32.mrb[37].mxu0  ;;  %v5187_v51 = vld [vmem:[#allocation2 + $0x40] sm:$0xff] }
 0xb35   :  { %v2390_v34 = vmul.f32 %v2367_v3, %v5538_v42 }
 0xb36   :  { %v2395_v11 = vadd.f32 %v2391_v35, %v2387_v62  ;;  %v5153_v62 = vpop.eup %5152 }
 0xb37   :  { %v2394_v16 = vadd.f32 %v2390_v34, %v2386_v47  ;;  %v4800_v37 = vpop.f32.mrb[38].mxu0  ;;  %v2063_v35 = vmul.f32 %v5153_v62, %v5929_v5  ;;  %v2067_v47 = vand.u32 2147483648, %v5929_v5 }
 0xb38   :  { %v2393_v44 = vmul.f32 %v4800_v37, %v5538_v42  ;;  %v2377_v45 = vpop.f32.mrb[39].mxu0 }
 0xb39   :  { %v2392_v58 = vmul.f32 %v2377_v45, %v5538_v42  ;;  %v5047_v25 = vpack.c.bf16 %v2395_v11, %v2394_v16  ;;  %v5180_v42 = vld [vmem:[#allocation2] sm:$0xff]  ;;  %v2065_v3 = vsel %vm2064_vm8, %v5929_v5, %v2063_v35 }
 0xb3a   :  { %v2397_v13 = vadd.f32 %v2393_v44, %v2389_v40  ;;  %v2068_v34 = vsel %vm2066_vm9, %v2067_v47, %v2065_v3 }
 0xb3b   :  { %v2396_v21 = vadd.f32 %v2392_v58, %v2388_v46  ;;  %5048 = vmatprep.subr.bf16.mxu0 %v5047_v25  ;;  %5154 = vtanh.f32 %v2068_v34 }
 0xb3c   :  { %5050 = vmatpush3.bf16.msra.mxu0 %v5047_v25 }
 0xb3d   :  { %v5051_v53 = vpack.c.bf16 %v2397_v13, %v2396_v21 }
 0xb3f   :  { %5052 = vmatprep.subr.bf16.mxu0 %v5051_v53 }
 0xb40   :  { %5054 = vmatpush3.bf16.msra.mxu0 %v5051_v53 }
 0xb43   :  { %4810 = vmatmul.mubr.msk.f32.vlgmr.msra.gmra.mrb[40].mxu0 %vm377_vm1, %v2399_v27 }
 0xb44   :  { %4812 = vmatprep.mubr.msk.f32.mxu0 %vm377_vm1, %v2400_v54 }
 0xb45   :  { %v5155_v11 = vpop.eup %5154 }
 0xb46   :  { %v2070_v16 = vmul.f32 3.1415927, %v5155_v11 }
 0xb47   :  { %4813 = vmatmul.mubr.msk.f32.gmra.mrb[42].mxu0 %vm377_vm1, %v2401_v43 }
 0xb48   :  { %4823 = vmatprep.mubr.msk.f32.mxu0 %vm377_vm1, %v5180_v42  ;;  %v6070_v37 = vmul.f32 0.5, %v2070_v16 }
 0xb4a   :  { %v2808_v40 = vand.u32 2139095040, %v6070_v37  ;;  %v2805_v5 = vand.u32 2147483647, %v6070_v37  ;;  %vm2807_vm2 = vcmp.lt.s32.totalorder %v6070_v37, 0 }
 0xb4c   :  { %v2809_v44 = vshrl.u32 %v2808_v40, 23  ;;  %vm2806_vm3 = vcmp.le.f32.partialorder %v2805_v5, 0.7853982 }
 0xb4e   :  { %v4310_v45 = vadd.s32 4294967169, %v2809_v44 }
 0xb50   :  { %v2815_v46 = vadd.s32 1, %v4310_v45 }
 0xb52   :  { %vm2816_vm10 = vcmp.gt.s32.totalorder %v2815_v46, 0 }
 0xb53   :  { %v2817_v58 = vsel %vm2816_vm10, %v2815_v46, 0  ;;  %vm2897_vm10 = vweird.f32 %v6070_v37 }
 0xb54   :  { %v2819_v25 = vand.u32 31, %v2817_v58  ;;  %v2818_v27 = vshrl.u32 %v2817_v58, 5 }
 0xb56   :  { %v2820_v13 = vsub.s32 32, %v2819_v25  ;;  %v2831_v54 = vshll.u32 %v5225_v26, %v2819_v25  ;;  %vm2840_vm11 = vcmp.lt.s32.totalorder %v2818_v27, 4  ;;  %vm2837_vm12 = vcmp.lt.s32.totalorder %v2818_v27, 1 }
 0xb57   :  { %vm2839_vm13 = vcmp.lt.s32.totalorder %v2818_v27, 3  ;;  %vm2838_vm14 = vcmp.lt.s32.totalorder %v2818_v27, 2 }
 0xb58   :  { %v2832_v21 = vshrl.u32 %v5226_v30, %v2820_v13  ;;  %v2835_v53 = vshrl.u32 %v5227_v39, %v2820_v13  ;;  %v2823_v43 = vshrl.u32 %v5223_v22, %v2820_v13  ;;  %v2826_v42 = vshrl.u32 %v5224_v24, %v2820_v13 }
 0xc16   :  { %v4811_v56 = vpop.f32.mrb[40].mxu0 }
 0xc17   :  { %v2793_v0 = vmul.f32 %v4811_v56, %v5982_v63  ;;  %v2480_v7 = vpop.f32.mrb[41].mxu0 }
 0xc18   :  { %v5055_v50 = vpack.c.bf16 %v4811_v56, %v2480_v7  ;;  %v2792_v8 = vmul.f32 %v5982_v63, %v2480_v7  ;;  %v2829_v56 = vshrl.u32 %v5225_v26, %v2820_v13  ;;  %v2833_v7 = vor.u32 %v2832_v21, %v2831_v54 }
 0xc1a   :  { %v4814_v61 = vpop.f32.mrb[42].mxu0  ;;  %5056 = vmatprep.subr.bf16.mxu0 %v5055_v50 }
 0xc1b   :  { %v2795_v41 = vmul.f32 %v4814_v61, %v5982_v63  ;;  %v2490_v4 = vpop.f32.mrb[43].mxu0  ;;  %5058 = vmatpush3.bf16.msra.mxu0 %v5055_v50  ;;  %v2822_v50 = vshll.u32 %v5222_v18, %v2819_v25 }
 0xc1c   :  { %v5059_v9 = vpack.c.bf16 %v4814_v61, %v2490_v4  ;;  %v2794_v38 = vmul.f32 %v5982_v63, %v2490_v4  ;;  %v2828_v61 = vshll.u32 %v5224_v24, %v2819_v25  ;;  %v2812_v4 = vand.u32 8388607, %v2805_v5 }
 0xc1e   :  { %5060 = vmatprep.subr.bf16.mxu0 %v5059_v9 }
 0xc1f   :  { %5062 = vmatpush3.bf16.msra.mxu0 %v5059_v9  ;;  %v2824_v9 = vor.u32 %v2823_v43, %v2822_v50 }
 0xc22   :  { %4824 = vmatmul.mubr.msk.f32.vlgmr.msra.gmra.mrb[44].mxu0 %vm377_vm1, %v5181_v20  ;;  %v2830_v20 = vor.u32 %v2829_v56, %v2828_v61 }
 0xc23   :  { %4826 = vmatprep.mubr.msk.f32.mxu0 %vm377_vm1, %v5182_v14  ;;  %v2846_v14 = vsel %vm2840_vm11, %v2833_v7, 920167782 }
 0xc26   :  { %4827 = vmatmul.mubr.msk.f32.gmra.mrb[46].mxu0 %vm377_vm1, %v5183_v36 }
 0xc27   :  { %4837 = vmatprep.mubr.msk.f32.mxu0 %vm377_vm1, %v5833_v57 }
 0xcf5   :  { %v4825_v6 = vpop.f32.mrb[44].mxu0 }
 0xcf6   :  { %v2797_v33 = vmul.f32 %v4825_v6, %v5984_v48  ;;  %v2773_v32 = vpop.f32.mrb[45].mxu0  ;;  %v2813_v6 = vor.u32 8388608, %v2812_v4 }
 0xcf7   :  { %v2796_v63 = vmul.f32 %v2773_v32, %v5984_v48  ;;  %v2847_v32 = vsel %vm2839_vm13, %v2830_v20, %v2846_v14 }
 0xcf8   :  { %v6046_v55 = vadd.f32 %v2797_v33, %v2793_v0  ;;  %v2834_v0 = vshll.u32 %v5226_v30, %v2819_v25 }
 0xcf9   :  { %v6048_v17 = vadd.f32 %v2796_v63, %v2792_v8  ;;  %v4828_v19 = vpop.f32.mrb[46].mxu0  ;;  %v2825_v8 = vshll.u32 %v5223_v22, %v2819_v25 }
 0xcfa   :  { %v2799_v52 = vmul.f32 %v4828_v19, %v5984_v48  ;;  %v2783_v29 = vpop.f32.mrb[47].mxu0 }
 0xcfb   :  { %v2798_v12 = vmul.f32 %v2783_v29, %v5984_v48  ;;  %v5063_v28 = vpack.c.bf16 %v6046_v55, %v6048_v17  ;;  %v5186_v48 = vld [vmem:[#allocation2 + $0x38] sm:$0xff] }
 0xcfc   :  { %v6054_v57 = vadd.f32 %v2799_v52, %v2795_v41  ;;  %v2836_v41 = vor.u32 %v2835_v53, %v2834_v0 }
 0xcfd   :  { %v6056_v60 = vadd.f32 %v2798_v12, %v2794_v38  ;;  %5064 = vmatprep.subr.bf16.mxu0 %v5063_v28  ;;  %v2827_v38 = vor.u32 %v2826_v42, %v2825_v8  ;;  %v2853_v12 = vshll.u32 %v2813_v6, 8 }
 0xcfe   :  { %5066 = vmatpush3.bf16.msra.mxu0 %v5063_v28  ;;  %v2850_v36 = vsel %vm2840_vm11, %v2836_v41, 1326507024 }
 0xcff   :  { %v5067_v31 = vpack.c.bf16 %v6054_v57, %v6056_v60  ;;  %v2845_v33 = vsel %vm2837_vm12, %v2824_v9, %v2827_v38  ;;  %v2849_v63 = vsel %vm2837_vm12, %v2827_v38, %v2830_v20  ;;  %v2851_v19 = vsel %vm2839_vm13, %v2833_v7, %v2850_v36 }
 0xd00   :  { %v2848_v52 = vsel %vm2838_vm14, %v2845_v33, %v2847_v32  ;;  %v2852_v29 = vsel %vm2838_vm14, %v2849_v63, %v2851_v19 }
 0xd01   :  { %5068 = vmatprep.subr.bf16.mxu0 %v5067_v31 }
 0xd02   :  { %5070 = vmatpush3.bf16.msra.mxu0 %v5067_v31  ;;  %v6092_v28 = vmul.u32.u64.low %v2853_v12, %v2848_v52  ;;  %v6093_v31 = vmul.u32.u64.high %v2853_v12, %v2848_v52, %v6092_v28 }
 0xd04   :  { %v2863_v3 = vadd.s32 1, %v6093_v31 }
 0xd05   :  { %4838 = vmatmul.mubr.msk.f32.vlgmr.msra.gmra.mrb[48].mxu0 %vm377_vm1, %v5184_v23 }
 0xd06   :  { %4840 = vmatprep.mubr.msk.f32.mxu0 %vm377_vm1, %v5185_v59  ;;  %v6095_v23 = vmul.u32.u64.low %v2853_v12, %v2852_v29  ;;  %v6096_v59 = vmul.u32.u64.high %v2853_v12, %v2852_v29, %v6095_v23 }
 0xd08   :  { %vm2862_vm15 = vc.u32 %v6096_v59, %v6092_v28  ;;  %v2861_v42 = vadd.s32 %v6092_v28, %v6096_v59 }
 0xd09   :  { %4841 = vmatmul.mubr.msk.f32.gmra.mrb[50].mxu0 %vm377_vm1, %v5186_v48  ;;  %v2842_v48 = vsel %vm2840_vm11, %v2830_v20, 2102212464  ;;  %v2864_v34 = vsel %vm2862_vm15, %v2863_v3, %v6093_v31  ;;  %vm2076_vm11 = vcmp.eq.f32.partialorder %v5938_v49, inf }
 0xd0a   :  { %4851 = vmatprep.mubr.msk.f32.mxu0 %vm377_vm1, %v5187_v51  ;;  %v2821_v51 = vshrl.u32 %v5222_v18, %v2820_v13  ;;  %v2843_v35 = vsel %vm2839_vm13, %v2827_v38, %v2842_v48 }
 0xd0c   :  { %v2841_v62 = vsel %vm2837_vm12, %v2821_v51, %v2824_v9  ;;  %vm2078_vm12 = vcmp.eq.f32.partialorder %v5938_v49, 0.0 }
 0xd0d   :  { %v2844_v47 = vsel %vm2838_vm14, %v2841_v62, %v2843_v35 }
 0xd0e   :  { %v2860_v11 = vmul.u32 %v2853_v12, %v2844_v47 }
 0xd10   :  { %v2865_v16 = vadd.s32 %v2864_v34, %v2860_v11 }
 0xd12   :  { %v2866_v40 = vadd.s32 536870912, %v2865_v16 }
 0xd14   :  { %v2867_v44 = vshrl.u32 %v2866_v40, 30 }
 0xd16   :  { %v2868_v45 = vshll.u32 %v2867_v44, 30  ;;  %v2891_v14 = vsub.s32 4, %v2867_v44 }
 0xd18   :  { %v2869_v46 = vsub.s32 %v2865_v16, %v2868_v45  ;;  %v2892_v36 = vsel %vm2807_vm2, %v2891_v14, %v2867_v44 }
 0xd19   :  { %v2894_v6 = vsel %vm2806_vm3, 0, %v2892_v36 }
 0xd1a   :  { %v2871_v58 = vsub.s32 0, %v2869_v46  ;;  %v3001_v33 = vadd.s32 3, %v2894_v6  ;;  %v2898_v19 = vand.u32 3, %v2894_v6 }
 0xd1c   :  { %v4311_v25 = vmin.u32 %v2871_v58, %v2869_v46  ;;  %v3002_v52 = vand.u32 3, %v3001_v33  ;;  %vm2900_vm4 = vcmp.eq.s32.totalorder %v2898_v19, 0  ;;  %vm2903_vm5 = vcmp.eq.s32.totalorder %v2898_v19, 2 }
 0xd1d   :  { %vm2899_vm8 = vcmp.lt.s32.totalorder %v2898_v19, 2 }
 0xd1e   :  { %v2873_v13 = vclz %v4311_v25  ;;  %vm3004_vm6 = vcmp.eq.s32.totalorder %v3002_v52, 0  ;;  %vm3007_vm7 = vcmp.eq.s32.totalorder %v3002_v52, 2  ;;  %vm3003_vm9 = vcmp.lt.s32.totalorder %v3002_v52, 2 }
 0xd20   :  { %v4312_v21 = vadd.s32 4294967294, %v2873_v13 }
 0xd22   :  { %vm4313_vm0 = vcmp.lt.s32.totalorder %v4312_v21, 0 }
 0xd23   :  { %v2876_v53 = vsel %vm4313_vm0, 0, %v4312_v21 }
 0xd24   :  { %v2881_v27 = vsub.s32 4294967266, %v2876_v53  ;;  %v2877_v43 = vsub.s32 32, %v2876_v53  ;;  %v2878_v7 = vshll.u32 %v2869_v46, %v2876_v53 }
 0xd26   :  { %v2882_v54 = vadd.s32 127, %v2881_v27  ;;  %v2879_v0 = vshrl.u32 %v2861_v42, %v2877_v43  ;;  %v5189_v27 = vld [vmem:[#allocation2 + $0x50] sm:$0xff] }
 0xd28   :  { %v2883_v56 = vshll.u32 %v2882_v54, 23  ;;  %v2880_v8 = vor.u32 %v2879_v0, %v2878_v7  ;;  %v5191_v54 = vld [vmem:[#allocation2 + $0x60] sm:$0xff]  ;;  %v2079_v0 = vand.u32 2147483648, %v5938_v49 }
 0xd2a   :  { %v2884_v50 = vor.u32 4788187, %v2883_v56  ;;  %v2887_v41 = vcvt.s32.f32 %v2880_v8 }
 0xd2c   :  { %v2885_v61 = vand.u32 2147483647, %v2884_v50 }
 0xd2e   :  { %v2888_v4 = vmul.f32 %v2887_v41, %v2885_v61 }
 0xd30   :  { %v2889_v9 = vxor.u32 2147483648, %v2888_v4 }
 0xd32   :  { %v2890_v38 = vsel %vm2807_vm2, %v2889_v9, %v2888_v4 }
 0xd33   :  { %v2893_v20 = vsel %vm2806_vm3, %v6070_v37, %v2890_v38 }
 0xd34   :  { %5156 = vcosq.f32 %v2893_v20 }
 0xd35   :  { %5158 = vsinq.f32 %v2893_v20 }
 0xd36   :  { %5160 = vrsqrt.f32 %v5938_v49 }
 0xd3e   :  { %v5157_v32 = vpop.eup %5156 }
 0xd3f   :  { %v5159_v63 = vpop.eup %5158  ;;  %v2904_v12 = vxor.u32 2147483648, %v5157_v32 }
 0xd40   :  { %v2901_v29 = vxor.u32 2147483648, %v5159_v63  ;;  %v5161_v43 = vpop.eup %5160 }
 0xd41   :  { %v2905_v5 = vsel %vm2903_vm5, %v2904_v12, %v5159_v63  ;;  %v3009_v23 = vsel %vm3007_vm7, %v2904_v12, %v5159_v63  ;;  %v2075_v42 = vmul.f32 %v5161_v43, %v5938_v49 }
 0xd42   :  { %v2902_v28 = vsel %vm2900_vm4, %v5157_v32, %v2901_v29  ;;  %v3006_v31 = vsel %vm3004_vm6, %v5157_v32, %v2901_v29 }
 0xd43   :  { %v2906_v59 = vsel %vm2899_vm8, %v2902_v28, %v2905_v5  ;;  %v3010_v48 = vsel %vm3003_vm9, %v3006_v31, %v3009_v23  ;;  %v2077_v56 = vsel %vm2076_vm11, %v5938_v49, %v2075_v42 }
 0xd44   :  { %v2907_v51 = vsel %vm2897_vm10, nan, %v2906_v59  ;;  %v3011_v62 = vsel %vm2897_vm10, nan, %v3010_v48  ;;  %v2080_v7 = vsel %vm2078_vm12, %v2079_v0, %v2077_v56 }
 0xd45   :  { %v3098_v3 = vmul.f32 %v2907_v51, %v6046_v55  ;;  %v3097_v11 = vmul.f32 %v2907_v51, %v6048_v17  ;;  %v3100_v46 = vmul.f32 %v2907_v51, %v6054_v57  ;;  %v3099_v37 = vmul.f32 %v2907_v51, %v6056_v60  ;;  %v5188_v57 = vld [vmem:[#allocation2 + $0x48] sm:$0xff]  ;;  %v5190_v60 = vld [vmem:[#allocation2 + $0x58] sm:$0xff] }
 0xd46   :  { %5162 = vtanh.f32 %v2080_v7 }
 0xd50   :  { %v5163_v50 = vpop.eup %5162 }
 0xd51   :  { %v2082_v8 = vmul.f32 3.1415927, %v5163_v50 }
 0xd53   :  { %v6137_v61 = vmul.f32 0.5, %v2082_v8 }
 0xd55   :  { %v3113_v41 = vand.u32 2139095040, %v6137_v61  ;;  %v3110_v49 = vand.u32 2147483647, %v6137_v61  ;;  %vm3112_vm5 = vcmp.lt.s32.totalorder %v6137_v61, 0 }
 0xd57   :  { %v3114_v4 = vshrl.u32 %v3113_v41, 23  ;;  %v3117_v48 = vand.u32 8388607, %v3110_v49  ;;  %vm3111_vm6 = vcmp.le.f32.partialorder %v3110_v49, 0.7853982 }
 0xd59   :  { %v4322_v9 = vadd.s32 4294967169, %v3114_v4 }
 0xd5b   :  { %v3120_v38 = vadd.s32 1, %v4322_v9 }
 0xd5d   :  { %vm3121_vm13 = vcmp.gt.s32.totalorder %v3120_v38, 0 }
 0xd5e   :  { %v3122_v20 = vsel %vm3121_vm13, %v3120_v38, 0  ;;  %vm3202_vm13 = vweird.f32 %v6137_v61 }
 0xd5f   :  { %v3124_v14 = vand.u32 31, %v3122_v20  ;;  %v3123_v32 = vshrl.u32 %v3122_v20, 5 }
 0xd61   :  { %v3125_v36 = vsub.s32 32, %v3124_v14  ;;  %v3136_v63 = vshll.u32 %v5225_v26, %v3124_v14  ;;  %v3139_v12 = vshll.u32 %v5226_v30, %v3124_v14  ;;  %v3127_v5 = vshll.u32 %v5222_v18, %v3124_v14 }
 0xd62   :  { %v3130_v31 = vshll.u32 %v5223_v22, %v3124_v14  ;;  %v3133_v23 = vshll.u32 %v5224_v24, %v3124_v14  ;;  %vm3145_vm14 = vcmp.lt.s32.totalorder %v3123_v32, 4  ;;  %vm3142_vm15 = vcmp.lt.s32.totalorder %v3123_v32, 1 }
 0xd63   :  { %v3137_v6 = vshrl.u32 %v5226_v30, %v3125_v36  ;;  %v3140_v33 = vshrl.u32 %v5227_v39, %v3125_v36  ;;  %v3128_v19 = vshrl.u32 %v5223_v22, %v3125_v36  ;;  %v3131_v52 = vshrl.u32 %v5224_v24, %v3125_v36 }
 0xd64   :  { %v3134_v29 = vshrl.u32 %v5225_v26, %v3125_v36  ;;  %vm3144_vm0 = vcmp.lt.s32.totalorder %v3123_v32, 3  ;;  %vm3143_vm2 = vcmp.lt.s32.totalorder %v3123_v32, 2 }
 0xd65   :  { %v3138_v28 = vor.u32 %v3137_v6, %v3136_v63  ;;  %v3141_v59 = vor.u32 %v3140_v33, %v3139_v12  ;;  %v3129_v51 = vor.u32 %v3128_v19, %v3127_v5 }
 0xdd8   :  { %v4839_v35 = vpop.f32.mrb[48].mxu0 }
 0xdd9   :  { %v3102_v47 = vmul.f32 %v4839_v35, %v3011_v62  ;;  %v3078_v34 = vpop.f32.mrb[49].mxu0  ;;  %v3135_v35 = vor.u32 %v3134_v29, %v3133_v23 }
 0xdda   :  { %v3101_v16 = vmul.f32 %v3078_v34, %v3011_v62  ;;  %v3118_v34 = vor.u32 8388608, %v3117_v48 }
 0xddb   :  { %v6113_v40 = vadd.f32 %v3102_v47, %v3098_v3  ;;  %v3151_v3 = vsel %vm3145_vm14, %v3138_v28, 920167782  ;;  %v3155_v47 = vsel %vm3145_vm14, %v3141_v59, 1326507024 }
 0xddc   :  { %v6115_v44 = vadd.f32 %v3101_v16, %v3097_v11  ;;  %v4842_v45 = vpop.f32.mrb[50].mxu0  ;;  %v3152_v16 = vsel %vm3144_vm0, %v3135_v35, %v3151_v3 }
 0xddd   :  { %v3104_v58 = vmul.f32 %v4842_v45, %v3011_v62  ;;  %v3088_v25 = vpop.f32.mrb[51].mxu0 }
 0xdde   :  { %v3103_v13 = vmul.f32 %v3088_v25, %v3011_v62  ;;  %v5071_v55 = vpack.c.bf16 %v6113_v40, %v6115_v44  ;;  %v3132_v62 = vor.u32 %v3131_v52, %v3130_v31 }
 0xddf   :  { %v6121_v21 = vadd.f32 %v3104_v58, %v3100_v46  ;;  %v3156_v46 = vsel %vm3144_vm0, %v3138_v28, %v3155_v47 }
 0xde0   :  { %v6123_v53 = vadd.f32 %v3103_v13, %v3099_v37  ;;  %5072 = vmatprep.subr.bf16.mxu0 %v5071_v55  ;;  %v3150_v11 = vsel %vm3142_vm15, %v3129_v51, %v3132_v62  ;;  %v3154_v45 = vsel %vm3142_vm15, %v3132_v62, %v3135_v35  ;;  %v3158_v37 = vshll.u32 %v3118_v34, 8 }
 0xde1   :  { %5074 = vmatpush3.bf16.msra.mxu0 %v5071_v55  ;;  %v3153_v58 = vsel %vm3143_vm2, %v3150_v11, %v3152_v16  ;;  %v3157_v25 = vsel %vm3143_vm2, %v3154_v45, %v3156_v46 }
 0xde2   :  { %v5075_v17 = vpack.c.bf16 %v6121_v21, %v6123_v53  ;;  %v6159_v13 = vmul.u32.u64.low %v3158_v37, %v3153_v58  ;;  %v6160_v55 = vmul.u32.u64.high %v3158_v37, %v3153_v58, %v6159_v13 }
 0xde4   :  { %5076 = vmatprep.subr.bf16.mxu0 %v5075_v17  ;;  %v3168_v42 = vadd.s32 1, %v6160_v55 }
 0xde5   :  { %5078 = vmatpush3.bf16.msra.mxu0 %v5075_v17 }
 0xde8   :  { %4852 = vmatmul.mubr.msk.f32.vlgmr.msra.gmra.mrb[52].mxu0 %vm377_vm1, %v5188_v57  ;;  %v6162_v17 = vmul.u32.u64.low %v3158_v37, %v3157_v25  ;;  %v6163_v57 = vmul.u32.u64.high %v3158_v37, %v3157_v25, %v6162_v17 }
 0xde9   :  { %4854 = vmatprep.mubr.msk.f32.mxu0 %vm377_vm1, %v5189_v27  ;;  %v3147_v27 = vsel %vm3145_vm14, %v3135_v35, 2102212464  ;;  %vm2088_vm14 = vcmp.eq.f32.partialorder %v5948_v1, inf }
 0xdea   :  { %v3148_v43 = vsel %vm3144_vm0, %v3132_v62, %v3147_v27  ;;  %vm3167_vm3 = vc.u32 %v6163_v57, %v6159_v13  ;;  %v3166_v19 = vadd.s32 %v6159_v13, %v6163_v57 }
 0xdeb   :  { %v3169_v0 = vsel %vm3167_vm3, %v3168_v42, %v6160_v55 }
 0xdec   :  { %4855 = vmatmul.mubr.msk.f32.gmra.mrb[54].mxu0 %vm377_vm1, %v5190_v60  ;;  %v3126_v60 = vshrl.u32 %v5222_v18, %v3125_v36 }
 0xded   :  { %4865 = vmatprep.mubr.msk.f32.mxu0 %vm377_vm1, %v5191_v54 }
 0xdee   :  { %v3146_v54 = vsel %vm3142_vm15, %v3126_v60, %v3129_v51  ;;  %vm2090_vm15 = vcmp.eq.f32.partialorder %v5948_v1, 0.0 }
 0xdef   :  { %v3149_v56 = vsel %vm3143_vm2, %v3146_v54, %v3148_v43 }
 0xdf0   :  { %v3165_v7 = vmul.u32 %v3158_v37, %v3149_v56 }
 0xdf2   :  { %v3170_v50 = vadd.s32 %v3169_v0, %v3165_v7 }
 0xdf4   :  { %v3171_v8 = vadd.s32 536870912, %v3170_v50 }
 0xdf6   :  { %v3172_v41 = vshrl.u32 %v3171_v8, 30 }
 0xdf8   :  { %v3173_v4 = vshll.u32 %v3172_v41, 30  ;;  %v3196_v35 = vsub.s32 4, %v3172_v41 }
 0xdfa   :  { %v3174_v9 = vsub.s32 %v3170_v50, %v3173_v4  ;;  %v3197_v3 = vsel %vm3112_vm5, %v3196_v35, %v3172_v41 }
 0xdfb   :  { %v3199_v47 = vsel %vm3111_vm6, 0, %v3197_v3 }
 0xdfc   :  { %v3176_v38 = vsub.s32 0, %v3174_v9  ;;  %v3306_v34 = vadd.s32 3, %v3199_v47  ;;  %v3203_v45 = vand.u32 3, %v3199_v47 }
 0xdfe   :  { %v4323_v20 = vmin.u32 %v3176_v38, %v3174_v9  ;;  %v3307_v46 = vand.u32 3, %v3306_v34  ;;  %vm3205_vm7 = vcmp.eq.s32.totalorder %v3203_v45, 0  ;;  %vm3208_vm8 = vcmp.eq.s32.totalorder %v3203_v45, 2 }
 0xdff   :  { %vm3204_vm11 = vcmp.lt.s32.totalorder %v3203_v45, 2 }
 0xe00   :  { %v3178_v14 = vclz %v4323_v20  ;;  %vm3309_vm9 = vcmp.eq.s32.totalorder %v3307_v46, 0  ;;  %vm3312_vm10 = vcmp.eq.s32.totalorder %v3307_v46, 2  ;;  %vm3308_vm12 = vcmp.lt.s32.totalorder %v3307_v46, 2 }
 0xe02   :  { %v4324_v36 = vadd.s32 4294967294, %v3178_v14 }
 0xe04   :  { %vm4325_vm4 = vcmp.lt.s32.totalorder %v4324_v36, 0 }
 0xe05   :  { %v3181_v6 = vsel %vm4325_vm4, 0, %v4324_v36 }
 0xe06   :  { %v3186_v33 = vsub.s32 4294967266, %v3181_v6  ;;  %v3182_v63 = vsub.s32 32, %v3181_v6  ;;  %v3183_v12 = vshll.u32 %v3174_v9, %v3181_v6 }
 0xe08   :  { %v3187_v32 = vadd.s32 127, %v3186_v33  ;;  %v3184_v29 = vshrl.u32 %v3166_v19, %v3182_v63  ;;  %v2091_v33 = vand.u32 2147483648, %v5948_v1 }
 0xe0a   :  { %v3188_v52 = vshll.u32 %v3187_v32, 23  ;;  %v3185_v5 = vor.u32 %v3184_v29, %v3183_v12 }
 0xe0c   :  { %v3189_v28 = vor.u32 4788187, %v3188_v52  ;;  %v3192_v23 = vcvt.s32.f32 %v3185_v5 }
 0xe0e   :  { %v3190_v31 = vand.u32 2147483647, %v3189_v28 }
 0xe10   :  { %v3193_v59 = vmul.f32 %v3192_v23, %v3190_v31 }
 0xe12   :  { %v3194_v48 = vxor.u32 2147483648, %v3193_v59 }
 0xe14   :  { %v3195_v51 = vsel %vm3112_vm5, %v3194_v48, %v3193_v59 }
 0xe15   :  { %v3198_v62 = vsel %vm3111_vm6, %v6137_v61, %v3195_v51 }
 0xe16   :  { %5164 = vcosq.f32 %v3198_v62 }
 0xe17   :  { %5166 = vsinq.f32 %v3198_v62 }
 0xe18   :  { %5168 = vrsqrt.f32 %v5948_v1 }
 0xe20   :  { %v5165_v11 = vpop.eup %5164 }
 0xe21   :  { %v5167_v16 = vpop.eup %5166  ;;  %v3209_v25 = vxor.u32 2147483648, %v5165_v11 }
 0xe22   :  { %v3206_v58 = vxor.u32 2147483648, %v5167_v16 }
 0xe23   :  { %v3210_v49 = vsel %vm3208_vm8, %v3209_v25, %v5167_v16  ;;  %v3314_v55 = vsel %vm3312_vm10, %v3209_v25, %v5167_v16 }
 0xe24   :  { %v3207_v37 = vsel %vm3205_vm7, %v5165_v11, %v3206_v58  ;;  %v3311_v13 = vsel %vm3309_vm9, %v5165_v11, %v3206_v58 }
 0xe25   :  { %v3211_v17 = vsel %vm3204_vm11, %v3207_v37, %v3210_v49  ;;  %v3315_v57 = vsel %vm3308_vm12, %v3311_v13, %v3314_v55 }
 0xe26   :  { %v3212_v27 = vsel %vm3202_vm13, nan, %v3211_v17  ;;  %v3316_v60 = vsel %vm3202_vm13, nan, %v3315_v57 }
 0xe27   :  { %v3403_v43 = vmul.f32 %v3212_v27, %v6113_v40  ;;  %v3402_v0 = vmul.f32 %v3212_v27, %v6115_v44  ;;  %v3405_v4 = vmul.f32 %v3212_v27, %v6121_v21  ;;  %v3404_v61 = vmul.f32 %v3212_v27, %v6123_v53  ;;  %v5169_v21 = vpop.eup %5168 }
 0xe28   :  { %v2087_v53 = vmul.f32 %v5169_v21, %v5948_v1 }
 0xe2a   :  { %v2089_v6 = vsel %vm2088_vm14, %v5948_v1, %v2087_v53 }
 0xebb   :  { %v4853_v54 = vpop.f32.mrb[52].mxu0 }
 0xebc   :  { %v3407_v42 = vmul.f32 %v4853_v54, %v3316_v60  ;;  %v3383_v56 = vpop.f32.mrb[53].mxu0  ;;  %v3719_v54 = vld [vmem:[%s6437_s8] sm:$0xff] }
 0xebd   :  { %v3406_v7 = vmul.f32 %v3383_v56, %v3316_v60  ;;  %4879 = vmatprep.mubr.msk.f32.mxu1 %vm377_vm1, %v3719_v54 }
 0xebe   :  { %v6180_v50 = vadd.f32 %v3407_v42, %v3403_v43 }
 0xebf   :  { %v6182_v8 = vadd.f32 %v3406_v7, %v3402_v0  ;;  %v4856_v41 = vpop.f32.mrb[54].mxu0 }
 0xec0   :  { %v3409_v9 = vmul.f32 %v4856_v41, %v3316_v60  ;;  %v3393_v38 = vpop.f32.mrb[55].mxu0 }
 0xec1   :  { %v3408_v20 = vmul.f32 %v3393_v38, %v3316_v60  ;;  %v5079_v40 = vpack.c.bf16 %v6180_v50, %v6182_v8 }
 0xec2   :  { %v6188_v14 = vadd.f32 %v3409_v9, %v3405_v4 }
 0xec3   :  { %v6190_v36 = vadd.f32 %v3408_v20, %v3404_v61  ;;  %5080 = vmatprep.subr.bf16.mxu0 %v5079_v40 }
 0xec4   :  { %5082 = vmatpush3.bf16.msra.mxu0 %v5079_v40 }
 0xec5   :  { %v5083_v44 = vpack.c.bf16 %v6188_v14, %v6190_v36 }
 0xec7   :  { %5084 = vmatprep.subr.bf16.mxu0 %v5083_v44 }
 0xec8   :  { %5086 = vmatpush3.bf16.msra.mxu0 %v5083_v44 }
 0xecb   :  { %4866 = vmatmul.mubr.msk.f32.vlgmr.msra.gmra.mrb[56].mxu0 %vm377_vm1, %v5998_v10  ;;  %v2092_v10 = vsel %vm2090_vm15, %v2091_v33, %v2089_v6 }
 0xecc   :  { %4868 = vmatprep.mubr.msk.f32.mxu0 %vm377_vm1, %v6002_v2  ;;  %5170 = vtanh.f32 %v2092_v10 }
 0xecf   :  { %4869 = vmatmul.mubr.msk.f32.gmra.mrb[58].mxu0 %vm377_vm1, %v6006_v15 }
 0xed6   :  { %v5171_v32 = vpop.eup %5170 }
 0xed7   :  { %v2094_v2 = vmul.f32 3.1415927, %v5171_v32 }
 0xed9   :  { %v6206_v63 = vmul.f32 0.5, %v2094_v2 }
 0xedb   :  { %v3418_v15 = vand.u32 2139095040, %v6206_v63  ;;  %v3415_v1 = vand.u32 2147483647, %v6206_v63  ;;  %vm3417_vm8 = vcmp.lt.s32.totalorder %v6206_v63, 0 }
 0xedd   :  { %v3419_v19 = vshrl.u32 %v3418_v15, 23  ;;  %v3422_v45 = vand.u32 8388607, %v3415_v1  ;;  %vm3416_vm9 = vcmp.le.f32.partialorder %v3415_v1, 0.7853982 }
 0xedf   :  { %v4334_v52 = vadd.s32 4294967169, %v3419_v19 }
 0xee1   :  { %v3425_v29 = vadd.s32 1, %v4334_v52 }
 0xee3   :  { %vm3426_vm0 = vcmp.gt.s32.totalorder %v3425_v29, 0 }
 0xee4   :  { %v3427_v12 = vsel %vm3426_vm0, %v3425_v29, 0  ;;  %vm3507_vm0 = vweird.f32 %v6206_v63 }
 0xee5   :  { %v3429_v28 = vand.u32 31, %v3427_v12  ;;  %v3428_v59 = vshrl.u32 %v3427_v12, 5 }
 0xee7   :  { %v3430_v5 = vsub.s32 32, %v3429_v28  ;;  %v3441_v48 = vshll.u32 %v5225_v26, %v3429_v28  ;;  %v3444_v3 = vshll.u32 %v5226_v30, %v3429_v28  ;;  %v3432_v34 = vshll.u32 %v5222_v18, %v3429_v28 }
 0xee8   :  { %v3435_v11 = vshll.u32 %v5223_v22, %v3429_v28  ;;  %vm3450_vm2 = vcmp.lt.s32.totalorder %v3428_v59, 4  ;;  %vm3447_vm3 = vcmp.lt.s32.totalorder %v3428_v59, 1  ;;  %vm3449_vm4 = vcmp.lt.s32.totalorder %v3428_v59, 3 }
 0xee9   :  { %v3442_v31 = vshrl.u32 %v5226_v30, %v3430_v5  ;;  %v3445_v23 = vshrl.u32 %v5227_v39, %v3430_v5  ;;  %v3433_v51 = vshrl.u32 %v5223_v22, %v3430_v5  ;;  %v3436_v62 = vshrl.u32 %v5224_v24, %v3430_v5 }
 0xeea   :  { %v3439_v35 = vshrl.u32 %v5225_v26, %v3430_v5  ;;  %v3438_v39 = vshll.u32 %v5224_v24, %v3429_v28  ;;  %v3423_v30 = vor.u32 8388608, %v3422_v45  ;;  %vm3448_vm5 = vcmp.lt.s32.totalorder %v3428_v59, 2 }
 0xeeb   :  { %v3443_v47 = vor.u32 %v3442_v31, %v3441_v48  ;;  %v3446_v16 = vor.u32 %v3445_v23, %v3444_v3  ;;  %v3434_v46 = vor.u32 %v3433_v51, %v3432_v34  ;;  %v3437_v58 = vor.u32 %v3436_v62, %v3435_v11 }
 0xeec   :  { %v3440_v25 = vor.u32 %v3439_v35, %v3438_v39  ;;  %v3463_v57 = vshll.u32 %v3423_v30, 8  ;;  %v3431_v0 = vshrl.u32 %v5222_v18, %v3430_v5 }
 0xeed   :  { %v3456_v37 = vsel %vm3450_vm2, %v3443_v47, 920167782  ;;  %v3460_v26 = vsel %vm3450_vm2, %v3446_v16, 1326507024  ;;  %v3455_v49 = vsel %vm3447_vm3, %v3434_v46, %v3437_v58 }
 0xeee   :  { %v3457_v22 = vsel %vm3449_vm4, %v3440_v25, %v3456_v37  ;;  %v3459_v24 = vsel %vm3447_vm3, %v3437_v58, %v3440_v25  ;;  %v3461_v13 = vsel %vm3449_vm4, %v3443_v47, %v3460_v26  ;;  %v3452_v56 = vsel %vm3450_vm2, %v3440_v25, 2102212464 }
 0xeef   :  { %v3458_v55 = vsel %vm3448_vm5, %v3455_v49, %v3457_v22  ;;  %v3462_v17 = vsel %vm3448_vm5, %v3459_v24, %v3461_v13  ;;  %v3451_v7 = vsel %vm3447_vm3, %v3431_v0, %v3434_v46  ;;  %v3453_v41 = vsel %vm3449_vm4, %v3437_v58, %v3452_v56 }
 0xef0   :  { %v6230_v27 = vmul.u32.u64.low %v3463_v57, %v3458_v55  ;;  %v6231_v60 = vmul.u32.u64.high %v3463_v57, %v3458_v55, %v6230_v27  ;;  %v6236_v43 = vmul.u32.u64.low %v3463_v57, %v3462_v17  ;;  %v6237_v42 = vmul.u32.u64.high %v3463_v57, %v3462_v17, %v6236_v43 }
 0xef1   :  { %v3454_v9 = vsel %vm3448_vm5, %v3451_v7, %v3453_v41  ;;  %vm4178_vm2 = vcmask 1041408   ;;  %vm4180_vm3 = vcmask 1042432   ;;  %vm4182_vm4 = vcmask 1043456  }
 0xef2   :  { %v3473_v4 = vadd.s32 1, %v6231_v60  ;;  %vm3472_vm6 = vc.u32 %v6237_v42, %v6230_v27  ;;  %v3470_v61 = vmul.u32 %v3463_v57, %v3454_v9  ;;  %v3471_v52 = vadd.s32 %v6230_v27, %v6237_v42 }
 0xef3   :  { %vm4184_vm5 = vcmask 1044480  }
 0xef4   :  { %v3474_v38 = vsel %vm3472_vm6, %v3473_v4, %v6231_v60  ;;  %vm4186_vm6 = vcmask 1045504  }
 0xef5   :  { %v3475_v20 = vadd.s32 %v3474_v38, %v3470_v61  ;;  %v3722_v61 = vld [vmem:[%s6437_s8 + $0x18] sm:$0xff] }
 0xef7   :  { %v3476_v40 = vadd.s32 536870912, %v3475_v20 }
 0xef9   :  { %v3477_v44 = vshrl.u32 %v3476_v40, 30  ;;  %v3724_v40 = vld [vmem:[%s6437_s8 + $0x28] sm:$0xff] }
 0xefb   :  { %v3478_v21 = vshll.u32 %v3477_v44, 30  ;;  %v3501_v3 = vsub.s32 4, %v3477_v44 }
 0xefd   :  { %v3479_v53 = vsub.s32 %v3475_v20, %v3478_v21  ;;  %v3502_v47 = vsel %vm3417_vm8, %v3501_v3, %v3477_v44  ;;  %v3723_v20 = vld [vmem:[%s6437_s8 + $0x20] sm:$0xff]  ;;  %v3725_v44 = vld [vmem:[%s6437_s8 + $0x30] sm:$0xff]  ;;  %v3726_v21 = vld [vmem:[%s6437_s8 + $0x38] sm:$0xff] }
 0xefe   :  { %v3504_v34 = vsel %vm3416_vm9, 0, %v3502_v47  ;;  %v3748_v3 = vld [vmem:[%s6437_s8 + $0xe8] sm:$0xff]  ;;  %v3749_v47 = vld [vmem:[%s6437_s8 + $0xf0] sm:$0xff] }
 0xeff   :  { %v3481_v6 = vsub.s32 0, %v3479_v53  ;;  %v3611_v11 = vadd.s32 3, %v3504_v34  ;;  %v3508_v45 = vand.u32 3, %v3504_v34  ;;  %v3750_v34 = vld [vmem:[%s6437_s8 + $0xf8] sm:$0xff] }
 0xf01   :  { %v4335_v18 = vmin.u32 %v3481_v6, %v3479_v53  ;;  %v3612_v46 = vand.u32 3, %v3611_v11  ;;  %vm3510_vm10 = vcmp.eq.s32.totalorder %v3508_v45, 0  ;;  %vm3513_vm11 = vcmp.eq.s32.totalorder %v3508_v45, 2  ;;  %v3728_v6 = vld [vmem:[%s6437_s8 + $0x48] sm:$0xff] }
 0xf02   :  { %vm3509_vm14 = vcmp.lt.s32.totalorder %v3508_v45, 2 }
 0xf03   :  { %v3483_v33 = vclz %v4335_v18  ;;  %vm3614_vm12 = vcmp.eq.s32.totalorder %v3612_v46, 0  ;;  %vm3617_vm13 = vcmp.eq.s32.totalorder %v3612_v46, 2  ;;  %vm3613_vm15 = vcmp.lt.s32.totalorder %v3612_v46, 2  ;;  %v3729_v18 = vld [vmem:[%s6437_s8 + $0x50] sm:$0xff] }
 0xf05   :  { %v4336_v10 = vadd.s32 4294967294, %v3483_v33  ;;  %v3730_v33 = vld [vmem:[%s6437_s8 + $0x58] sm:$0xff] }
 0xf07   :  { %vm4337_vm7 = vcmp.lt.s32.totalorder %v4336_v10, 0 }
 0xf08   :  { %v3486_v32 = vsel %vm4337_vm7, 0, %v4336_v10  ;;  %v3731_v10 = vld [vmem:[%s6437_s8 + $0x60] sm:$0xff]  ;;  %vm4188_vm7 = vcmask 1046528  }
 0xf09   :  { %v3491_v2 = vsub.s32 4294967266, %v3486_v32  ;;  %v3487_v19 = vsub.s32 32, %v3486_v32  ;;  %v3488_v28 = vshll.u32 %v3479_v53, %v3486_v32  ;;  %v3727_v53 = vld [vmem:[%s6437_s8 + $0x40] sm:$0xff]  ;;  %v3732_v32 = vld [vmem:[%s6437_s8 + $0x68] sm:$0xff] }
 0xf0b   :  { %v3492_v15 = vadd.s32 127, %v3491_v2  ;;  %v3489_v12 = vshrl.u32 %v3471_v52, %v3487_v19  ;;  %v3733_v2 = vld [vmem:[%s6437_s8 + $0x70] sm:$0xff]  ;;  %v3735_v19 = vld [vmem:[%s6437_s8 + $0x80] sm:$0xff]  ;;  %v3736_v52 = vld [vmem:[%s6437_s8 + $0x88] sm:$0xff] }
 0xf0d   :  { %v3493_v29 = vshll.u32 %v3492_v15, 23  ;;  %v3490_v31 = vor.u32 %v3489_v12, %v3488_v28  ;;  %v3734_v15 = vld [vmem:[%s6437_s8 + $0x78] sm:$0xff]  ;;  %v3739_v28 = vld [vmem:[%s6437_s8 + $0xa0] sm:$0xff] }
 0xf0e   :  { %v3738_v12 = vld [vmem:[%s6437_s8 + $0x98] sm:$0xff] }
 0xf0f   :  { %v3494_v5 = vor.u32 4788187, %v3493_v29  ;;  %v3497_v59 = vcvt.s32.f32 %v3490_v31  ;;  %v3737_v29 = vld [vmem:[%s6437_s8 + $0x90] sm:$0xff] }
 0xf10   :  { %v3741_v31 = vld [vmem:[%s6437_s8 + $0xb0] sm:$0xff] }
 0xf11   :  { %v3495_v23 = vand.u32 2147483647, %v3494_v5  ;;  %v3740_v5 = vld [vmem:[%s6437_s8 + $0xa8] sm:$0xff] }
 0xf13   :  { %v3498_v48 = vmul.f32 %v3497_v59, %v3495_v23  ;;  %v3742_v23 = vld [vmem:[%s6437_s8 + $0xb8] sm:$0xff]  ;;  %v3743_v59 = vld [vmem:[%s6437_s8 + $0xc0] sm:$0xff] }
 0xf15   :  { %v3499_v51 = vxor.u32 2147483648, %v3498_v48 }
 0xf17   :  { %v3500_v62 = vsel %vm3417_vm8, %v3499_v51, %v3498_v48  ;;  %v3744_v48 = vld [vmem:[%s6437_s8 + $0xc8] sm:$0xff]  ;;  %v3745_v51 = vld [vmem:[%s6437_s8 + $0xd0] sm:$0xff] }
 0xf18   :  { %v3503_v35 = vsel %vm3416_vm9, %v6206_v63, %v3500_v62  ;;  %v3746_v62 = vld [vmem:[%s6437_s8 + $0xd8] sm:$0xff] }
 0xf19   :  { %5172 = vcosq.f32 %v3503_v35 }
 0xf1a   :  { %5174 = vsinq.f32 %v3503_v35  ;;  %v3747_v35 = vld [vmem:[%s6437_s8 + $0xe0] sm:$0xff] }
 0xf23   :  { %v5173_v39 = vpop.eup %5172 }
 0xf24   :  { %v5175_v16 = vpop.eup %5174  ;;  %v3514_v25 = vxor.u32 2147483648, %v5173_v39 }
 0xf25   :  { %v3511_v58 = vxor.u32 2147483648, %v5175_v16 }
 0xf26   :  { %v3515_v1 = vsel %vm3513_vm11, %v3514_v25, %v5175_v16  ;;  %v3619_v30 = vsel %vm3617_vm13, %v3514_v25, %v5175_v16 }
 0xf27   :  { %v3512_v37 = vsel %vm3510_vm10, %v5173_v39, %v3511_v58  ;;  %v3616_v26 = vsel %vm3614_vm12, %v5173_v39, %v3511_v58 }
 0xf28   :  { %v3516_v49 = vsel %vm3509_vm14, %v3512_v37, %v3515_v1  ;;  %v3620_v22 = vsel %vm3613_vm15, %v3616_v26, %v3619_v30 }
 0xf29   :  { %v3517_v24 = vsel %vm3507_vm0, nan, %v3516_v49  ;;  %v3621_v13 = vsel %vm3507_vm0, nan, %v3620_v22 }
 0xf2a   :  { %v3708_v17 = vmul.f32 %v3517_v24, %v6180_v50  ;;  %v3707_v60 = vmul.f32 %v3517_v24, %v6182_v8  ;;  %v3710_v0 = vmul.f32 %v3517_v24, %v6188_v14  ;;  %v3709_v63 = vmul.f32 %v3517_v24, %v6190_v36  ;;  %v3720_v14 = vld [vmem:[%s6437_s8 + $0x8] sm:$0xff]  ;;  %v3721_v36 = vld [vmem:[%s6437_s8 + $0x10] sm:$0xff] }
 0xf9e   :  { %v4867_v55 = vpop.f32.mrb[56].mxu0 }
 0xf9f   :  { %v3712_v57 = vmul.f32 %v4867_v55, %v3621_v13  ;;  %v3688_v27 = vpop.f32.mrb[57].mxu0 }
 0xfa0   :  { %v3711_v54 = vmul.f32 %v3688_v27, %v3621_v13 }
 0xfa1   :  { %v6256_v43 = vadd.f32 %v3712_v57, %v3708_v17 }
 0xfa2   :  { %v6258_v42 = vadd.f32 %v3711_v54, %v3707_v60  ;;  %v4870_v56 = vpop.f32.mrb[58].mxu0 }
 0xfa3   :  { %v3714_v7 = vmul.f32 %v4870_v56, %v3621_v13  ;;  %v3698_v41 = vpop.f32.mrb[59].mxu0 }
 0xfa4   :  { %v3713_v4 = vmul.f32 %v3698_v41, %v3621_v13  ;;  %v5087_v50 = vpack.c.bf16 %v6256_v43, %v6258_v42 }
 0xfa5   :  { %v6264_v9 = vadd.f32 %v3714_v7, %v3710_v0 }
 0xfa6   :  { %v6266_v38 = vadd.f32 %v3713_v4, %v3709_v63  ;;  %5088 = vmatprep.subr.bf16.mxu1 %v5087_v50 }
 0xfa7   :  { %5090 = vmatpush3.bf16.msra.mxu1 %v5087_v50 }
 0xfa8   :  { %v5091_v8 = vpack.c.bf16 %v6264_v9, %v6266_v38 }
 0xfaa   :  { %5092 = vmatprep.subr.bf16.mxu1 %v5091_v8 }
 0xfab   :  { %5094 = vmatpush3.bf16.msra.mxu1 %v5091_v8 }
 0xfae   :  { %4880 = vmatmul.mubr.msk.f32.vlgmr.msra.gmra.mrb[42].mxu1 %vm377_vm1, %v3720_v14 }
 0xfaf   :  { %4882 = vmatprep.mubr.msk.f32.mxu1 %vm377_vm1, %v3721_v36 }
 0xfb2   :  { %4883 = vmatmul.mubr.msk.f32.gmra.mrb[44].mxu1 %vm377_vm1, %v3722_v61 }
 0xfb3   :  { %4885 = vmatprep.mubr.msk.f32.mxu1 %vm377_vm1, %v3723_v20 }
 0xfb6   :  { %4886 = vmatmul.mubr.msk.f32.gmra.mrb[46].mxu1 %vm377_vm1, %v3724_v40 }
 0xfb7   :  { %4888 = vmatprep.mubr.msk.f32.mxu1 %vm377_vm1, %v3725_v44 }
 0xfba   :  { %4889 = vmatmul.mubr.msk.f32.gmra.mrb[48].mxu1 %vm377_vm1, %v3726_v21 }
 0xfbb   :  { %4891 = vmatprep.mubr.msk.f32.mxu1 %vm377_vm1, %v3727_v53 }
 0xfbe   :  { %4892 = vmatmul.mubr.msk.f32.gmra.mrb[50].mxu1 %vm377_vm1, %v3728_v6 }
 0xfbf   :  { %4894 = vmatprep.mubr.msk.f32.mxu1 %vm377_vm1, %v3729_v18 }
 0xfc2   :  { %4895 = vmatmul.mubr.msk.f32.gmra.mrb[52].mxu1 %vm377_vm1, %v3730_v33 }
 0xfc3   :  { %4897 = vmatprep.mubr.msk.f32.mxu1 %vm377_vm1, %v3731_v10 }
 0xfc6   :  { %4898 = vmatmul.mubr.msk.f32.gmra.mrb[54].mxu1 %vm377_vm1, %v3732_v32 }
 0xfc7   :  { %4900 = vmatprep.mubr.msk.f32.mxu1 %vm377_vm1, %v3733_v2 }
 0xfca   :  { %4901 = vmatmul.mubr.msk.f32.gmra.mrb[56].mxu1 %vm377_vm1, %v3734_v15 }
 0xfcb   :  { %4903 = vmatprep.mubr.msk.f32.mxu1 %vm377_vm1, %v3735_v19 }
 0xfce   :  { %4904 = vmatmul.mubr.msk.f32.gmra.mrb[58].mxu1 %vm377_vm1, %v3736_v52 }
 0xfcf   :  { %4906 = vmatprep.mubr.msk.f32.mxu1 %vm377_vm1, %v3737_v29 }
 0xfd2   :  { %4907 = vmatmul.mubr.msk.f32.gmra.mrb[60].mxu1 %vm377_vm1, %v3738_v12 }
 0xfd3   :  { %4909 = vmatprep.mubr.msk.f32.mxu1 %vm377_vm1, %v3739_v28 }
 0xfd6   :  { %4910 = vmatmul.mubr.msk.f32.gmra.mrb[62].mxu1 %vm377_vm1, %v3740_v5 }
 0xfd7   :  { %4912 = vmatprep.mubr.msk.f32.mxu1 %vm377_vm1, %v3741_v31 }
 0xfda   :  { %4913 = vmatmul.mubr.msk.f32.gmra.mrb[64].mxu1 %vm377_vm1, %v3742_v23 }
 0xfdb   :  { %4915 = vmatprep.mubr.msk.f32.mxu1 %vm377_vm1, %v3743_v59 }
 0xfde   :  { %4916 = vmatmul.mubr.msk.f32.gmra.mrb[66].mxu1 %vm377_vm1, %v3744_v48 }
 0xfdf   :  { %4918 = vmatprep.mubr.msk.f32.mxu1 %vm377_vm1, %v3745_v51 }
 0xfe2   :  { %4919 = vmatmul.mubr.msk.f32.gmra.mrb[68].mxu1 %vm377_vm1, %v3746_v62 }
 0xfe3   :  { %4921 = vmatprep.mubr.msk.f32.mxu1 %vm377_vm1, %v3747_v35 }
 0xfe6   :  { %4922 = vmatmul.mubr.msk.f32.gmra.mrb[70].mxu1 %vm377_vm1, %v3748_v3 }
 0xfe7   :  { %4924 = vmatprep.mubr.msk.f32.mxu1 %vm377_vm1, %v3749_v47 }
 0xfea   :  { %4925 = vmatmul.mubr.msk.f32.gmra.mrb[72].mxu1 %vm377_vm1, %v3750_v34  ;;  %vm4176_vm1 = vcmask 1040384  }
0x1081   :  { %v4881_v11 = vpop.f32.mrb[42].mxu1 }
0x1082   :  { %v4073_v39 = vmul.f32 %v4881_v11, %v6256_v43  ;;  %v3913_v16 = vpop.f32.mrb[43].mxu1 }
0x1083   :  { %v4072_v45 = vmul.f32 %v3913_v16, %v6258_v42 }
0x1085   :  { %v4076_v46 = vadd.f32 %v4073_v39, %v4072_v45  ;;  %v4884_v58 = vpop.f32.mrb[44].mxu1 }
0x1086   :  { %v3923_v25 = vpop.f32.mrb[45].mxu1  ;;  %v4075_v1 = vmul.f32 %v4884_v58, %v6264_v9 }
0x1087   :  { %v4074_v37 = vmul.f32 %v3923_v25, %v6266_v38 }
0x1089   :  { %v4077_v26 = vadd.f32 %v4076_v46, %v4074_v37  ;;  %v4887_v30 = vpop.f32.mrb[46].mxu1 }
0x108a   :  { %v4086_v49 = vmul.f32 %v4887_v30, %v6256_v43  ;;  %v3933_v22 = vpop.f32.mrb[47].mxu1 }
0x108b   :  { %v4078_v24 = vadd.f32 %v4077_v26, %v4075_v1  ;;  %v4085_v13 = vmul.f32 %v3933_v22, %v6258_v42 }
0x108d   :  { %v4079_v55 = vrot.slane %v4078_v24, 4  ;;  %v4089_v17 = vadd.f32 %v4086_v49, %v4085_v13  ;;  %v4890_v57 = vpop.f32.mrb[48].mxu1 }
0x108e   :  { %v3943_v27 = vpop.f32.mrb[49].mxu1  ;;  %v4088_v56 = vmul.f32 %v4890_v57, %v6264_v9 }
0x108f   :  { %v4080_v60 = vadd.f32 %v4079_v55, %v4078_v24  ;;  %v4087_v54 = vmul.f32 %v3943_v27, %v6266_v38 }
0x1091   :  { %v4090_v0 = vadd.f32 %v4089_v17, %v4087_v54  ;;  %v4893_v7 = vpop.f32.mrb[50].mxu1  ;;  %v4081_v4 = vrot.slane %v4080_v60, 2 }
0x1092   :  { %v4099_v41 = vmul.f32 %v4893_v7, %v6256_v43  ;;  %v3953_v63 = vpop.f32.mrb[51].mxu1 }
0x1093   :  { %v4091_v50 = vadd.f32 %v4090_v0, %v4088_v56  ;;  %v4098_v8 = vmul.f32 %v3953_v63, %v6258_v42  ;;  %v4082_v40 = vadd.f32 %v4081_v4, %v4080_v60 }
0x1095   :  { %v4092_v14 = vrot.slane %v4091_v50, 4  ;;  %v4102_v36 = vadd.f32 %v4099_v41, %v4098_v8  ;;  %v4896_v61 = vpop.f32.mrb[52].mxu1  ;;  %v4083_v2 = vrot.slane %v4082_v40, 1 }
0x1096   :  { %v3963_v20 = vpop.f32.mrb[53].mxu1  ;;  %v4101_v6 = vmul.f32 %v4896_v61, %v6264_v9 }
0x1097   :  { %v4093_v44 = vadd.f32 %v4092_v14, %v4091_v50  ;;  %v4100_v21 = vmul.f32 %v3963_v20, %v6266_v38  ;;  %v4084_v23 = vadd.f32 %v4083_v2, %v4082_v40 }
0x1099   :  { %v4094_v53 = vrot.slane %v4093_v44, 2  ;;  %v4103_v18 = vadd.f32 %v4102_v36, %v4100_v21  ;;  %v4899_v33 = vpop.f32.mrb[54].mxu1 }
0x109a   :  { %v4112_v10 = vmul.f32 %v4899_v33, %v6256_v43  ;;  %v3973_v32 = vpop.f32.mrb[55].mxu1 }
0x109b   :  { %v4095_v15 = vadd.f32 %v4094_v53, %v4093_v44  ;;  %v4104_v19 = vadd.f32 %v4103_v18, %v4101_v6  ;;  %v4111_v52 = vmul.f32 %v3973_v32, %v6258_v42 }
0x109d   :  { %v4096_v29 = vrot.slane %v4095_v15, 1  ;;  %v4105_v12 = vrot.slane %v4104_v19, 4  ;;  %v4115_v28 = vadd.f32 %v4112_v10, %v4111_v52  ;;  %v4902_v5 = vpop.f32.mrb[56].mxu1 }
0x109e   :  { %v3983_v31 = vpop.f32.mrb[57].mxu1  ;;  %v4114_v3 = vmul.f32 %v4902_v5, %v6264_v9 }
0x109f   :  { %v4097_v59 = vadd.f32 %v4096_v29, %v4095_v15  ;;  %v4106_v48 = vadd.f32 %v4105_v12, %v4104_v19  ;;  %v4113_v51 = vmul.f32 %v3983_v31, %v6266_v38 }
0x10a1   :  { %v4177_v62 = vsel %vm4176_vm1, %v4084_v23, %v4097_v59  ;;  %v4107_v35 = vrot.slane %v4106_v48, 2  ;;  %v4116_v47 = vadd.f32 %v4115_v28, %v4113_v51  ;;  %v4905_v34 = vpop.f32.mrb[58].mxu1 }
0x10a2   :  { %v4125_v11 = vmul.f32 %v4905_v34, %v6256_v43  ;;  %v3993_v39 = vpop.f32.mrb[59].mxu1 }
0x10a3   :  { %v4108_v16 = vadd.f32 %v4107_v35, %v4106_v48  ;;  %v4117_v45 = vadd.f32 %v4116_v47, %v4114_v3  ;;  %v4124_v46 = vmul.f32 %v3993_v39, %v6258_v42 }
0x10a5   :  { %v4109_v58 = vrot.slane %v4108_v16, 1  ;;  %v4118_v25 = vrot.slane %v4117_v45, 4  ;;  %v4128_v37 = vadd.f32 %v4125_v11, %v4124_v46  ;;  %v4908_v1 = vpop.f32.mrb[60].mxu1 }
0x10a6   :  { %v4003_v26 = vpop.f32.mrb[61].mxu1  ;;  %v4127_v55 = vmul.f32 %v4908_v1, %v6264_v9 }
0x10a7   :  { %v4110_v30 = vadd.f32 %v4109_v58, %v4108_v16  ;;  %v4119_v49 = vadd.f32 %v4118_v25, %v4117_v45  ;;  %v4126_v22 = vmul.f32 %v4003_v26, %v6266_v38 }
0x10a9   :  { %v4179_v24 = vsel %vm4178_vm2, %v4177_v62, %v4110_v30  ;;  %v4120_v13 = vrot.slane %v4119_v49, 2  ;;  %v4129_v17 = vadd.f32 %v4128_v37, %v4126_v22  ;;  %v4911_v57 = vpop.f32.mrb[62].mxu1 }
0x10aa   :  { %v4138_v27 = vmul.f32 %v4911_v57, %v6256_v43  ;;  %v4013_v60 = vpop.f32.mrb[63].mxu1 }
0x10ab   :  { %v4121_v54 = vadd.f32 %v4120_v13, %v4119_v49  ;;  %v4130_v56 = vadd.f32 %v4129_v17, %v4127_v55  ;;  %v4137_v0 = vmul.f32 %v4013_v60, %v6258_v42 }
0x10ad   :  { %v4122_v7 = vrot.slane %v4121_v54, 1  ;;  %v4131_v41 = vrot.slane %v4130_v56, 4  ;;  %v4141_v63 = vadd.f32 %v4138_v27, %v4137_v0  ;;  %v4914_v4 = vpop.f32.mrb[64].mxu1 }
0x10ae   :  { %v4023_v50 = vpop.f32.mrb[65].mxu1  ;;  %v4140_v40 = vmul.f32 %v4914_v4, %v6264_v9 }
0x10af   :  { %v4123_v8 = vadd.f32 %v4122_v7, %v4121_v54  ;;  %v4132_v14 = vadd.f32 %v4131_v41, %v4130_v56  ;;  %v4139_v36 = vmul.f32 %v4023_v50, %v6266_v38 }
0x10b1   :  { %v4181_v61 = vsel %vm4180_vm3, %v4179_v24, %v4123_v8  ;;  %v4133_v20 = vrot.slane %v4132_v14, 2  ;;  %v4142_v44 = vadd.f32 %v4141_v63, %v4139_v36  ;;  %v4917_v21 = vpop.f32.mrb[66].mxu1 }
0x10b2   :  { %v4151_v53 = vmul.f32 %v4917_v21, %v6256_v43  ;;  %v4033_v6 = vpop.f32.mrb[67].mxu1 }
0x10b3   :  { %v4134_v18 = vadd.f32 %v4133_v20, %v4132_v14  ;;  %v4143_v33 = vadd.f32 %v4142_v44, %v4140_v40  ;;  %v4150_v10 = vmul.f32 %v4033_v6, %v6258_v42 }
0x10b5   :  { %v4135_v32 = vrot.slane %v4134_v18, 1  ;;  %v4144_v2 = vrot.slane %v4143_v33, 4  ;;  %v4154_v15 = vadd.f32 %v4151_v53, %v4150_v10  ;;  %v4920_v19 = vpop.f32.mrb[68].mxu1 }
0x10b6   :  { %v4043_v52 = vpop.f32.mrb[69].mxu1  ;;  %v4153_v23 = vmul.f32 %v4920_v19, %v6264_v9 }
0x10b7   :  { %v4136_v29 = vadd.f32 %v4135_v32, %v4134_v18  ;;  %v4145_v12 = vadd.f32 %v4144_v2, %v4143_v33  ;;  %v4152_v28 = vmul.f32 %v4043_v52, %v6266_v38 }
0x10b9   :  { %v4183_v5 = vsel %vm4182_vm4, %v4181_v61, %v4136_v29  ;;  %v4146_v31 = vrot.slane %v4145_v12, 2  ;;  %v4155_v59 = vadd.f32 %v4154_v15, %v4152_v28  ;;  %v4923_v48 = vpop.f32.mrb[70].mxu1 }
0x10ba   :  { %v4164_v51 = vmul.f32 %v4923_v48, %v6256_v43  ;;  %v4053_v62 = vpop.f32.mrb[71].mxu1 }
0x10bb   :  { %v4147_v35 = vadd.f32 %v4146_v31, %v4145_v12  ;;  %v4156_v3 = vadd.f32 %v4155_v59, %v4153_v23  ;;  %v4163_v47 = vmul.f32 %v4053_v62, %v6258_v42 }
0x10bd   :  { %v4148_v34 = vrot.slane %v4147_v35, 1  ;;  %v4157_v11 = vrot.slane %v4156_v3, 4  ;;  %v4167_v39 = vadd.f32 %v4164_v51, %v4163_v47  ;;  %v4926_v16 = vpop.f32.mrb[72].mxu1 }
0x10be   :  { %v4063_v45 = vpop.f32.mrb[73].mxu1  ;;  %v4166_v26 = vmul.f32 %v4926_v16, %v6264_v9 }
0x10bf   :  { %v4149_v46 = vadd.f32 %v4148_v34, %v4147_v35  ;;  %v4158_v58 = vadd.f32 %v4157_v11, %v4156_v3  ;;  %v4165_v25 = vmul.f32 %v4063_v45, %v6266_v38 }
0x10c1   :  { %v4185_v37 = vsel %vm4184_vm5, %v4183_v5, %v4149_v46  ;;  %v4159_v1 = vrot.slane %v4158_v58, 2  ;;  %v4168_v43 = vadd.f32 %v4167_v39, %v4165_v25 }
0x10c3   :  { %v4160_v30 = vadd.f32 %v4159_v1, %v4158_v58  ;;  %v4169_v49 = vadd.f32 %v4168_v43, %v4166_v26 }
0x10c5   :  { %v4161_v22 = vrot.slane %v4160_v30, 1  ;;  %v4170_v24 = vrot.slane %v4169_v49, 4 }
0x10c7   :  { %v4162_v42 = vadd.f32 %v4161_v22, %v4160_v30  ;;  %v4171_v13 = vadd.f32 %v4170_v24, %v4169_v49 }
0x10c9   :  { %v4187_v55 = vsel %vm4186_vm6, %v4185_v37, %v4162_v42  ;;  %v4172_v17 = vrot.slane %v4171_v13, 2 }
0x10cb   :  { %v4173_v57 = vadd.f32 %v4172_v17, %v4171_v13 }
0x10cd   :  { %v4174_v27 = vrot.slane %v4173_v57, 1 }
0x10cf   :  { %v4175_v60 = vadd.f32 %v4174_v27, %v4173_v57 }
0x10d1   :  { %v4189_v54 = vsel %vm4188_vm7, %v4187_v55, %v4175_v60 }
0x10d2   :  { %4190 = vst [vmem:[%s6438_s9] sm:$0xff] %v4189_v54 }
0x10d3   :  { %4195 = vsyncpa [#allocation3], 1 }

</bundles_post_ra>
